<compile_context>
chip_gen: v6e
topology: v6e:2x2x1
jax: 0.10.0
libtpu: 0.0.40
codegen_flags: <defaults>
</compile_context>

<pallas_src>
import math

import jax
import jax.numpy as jnp
from jax.experimental import pallas as pl
from jax.experimental.pallas import tpu as pltpu

MXU_DTYPE = jnp.bfloat16   # MXU input dtype (f32 accumulation).
_MAX_BLOCK_B = 128         # batch-tile cap (keeps total VMEM well under 16 MiB)


# ---------------------------------------------------------------------------
# The fused kernel
# ---------------------------------------------------------------------------
def _lenet5_fused_kernel(x_ref, w1_ref, b1_ref, w2_ref, b2_ref,
                         wf1_ref, bf1_ref, wf2_ref, bf2_ref,
                         o_ref, acc1_ref, acc2_ref, h1_ref):
    bt = x_ref.shape[1]                      # batch tile (multiple of 16)
    mxu = w1_ref.dtype

    # ---- conv1: 5 banded matmuls over the kernel rows.  Each RHS band is
    #      (28, 256): lanes 0..127 = even output columns, 128..255 = odd
    #      (pool-over-W folded into the weights).  LHS slices are leading-axis
    #      views of the H-leading x layout -> no relayout.
    for i in range(5):
        a = x_ref[i:i + 24, :, :].reshape(24 * bt, 28)          # bf16, free view
        part = jnp.dot(a, w1_ref[i], preferred_element_type=jnp.float32)
        if i == 0:
            acc1_ref[...] = part
        else:
            acc1_ref[...] += part

    # ---- conv1 epilogue: pool W (lane halves), pool H (row pairs), bias, ReLU.
    y1 = acc1_ref[...].reshape(12, 2, bt, 256)                  # rows (oh, n)
    y1w = jnp.maximum(y1[..., :128], y1[..., 128:])             # pool over W
    y1h = jnp.maximum(y1w[:, 0], y1w[:, 1])                     # pool over H
    h1_ref[...] = jnp.maximum(y1h + b1_ref[...], 0.0).astype(h1_ref.dtype)

    # ---- conv2: same banded trick; contraction over (w, c) = 120 (+8 zero pad).
    for i in range(5):
        a2 = h1_ref[i:i + 8, :, :].reshape(8 * bt, 128)         # bf16, free view
        part = jnp.dot(a2, w2_ref[i], preferred_element_type=jnp.float32)
        if i == 0:
            acc2_ref[...] = part
        else:
            acc2_ref[...] += part

    # ---- conv2 epilogue: pool W, pool H, bias, ReLU (all vectorized).
    y2 = acc2_ref[...].reshape(4, 2, bt, 256)
    y2w = jnp.maximum(y2[..., :128], y2[..., 128:])
    y2h = jnp.maximum(y2w[:, 0], y2w[:, 1])                     # (4, bt, 128)
    h2 = jnp.maximum(y2h + b2_ref[...], 0.0).astype(mxu)        # (4, bt, 128)

    # ---- fc1: one dot per pooled row (r is the spatial h of the 4x4 map).
    z1 = jnp.dot(h2[0], wf1_ref[0], preferred_element_type=jnp.float32)
    for r in range(1, 4):
        z1 = z1 + jnp.dot(h2[r], wf1_ref[r], preferred_element_type=jnp.float32)
    z1 = jnp.maximum(z1 + bf1_ref[...], 0.0).astype(mxu)        # (bt, 64)

    # ---- fc2 (logits, padded to 128 lanes -> unmasked store).
    out = jnp.dot(z1, wf2_ref[...], preferred_element_type=jnp.float32) + bf2_ref[...]
    o_ref[...] = out.astype(o_ref.dtype)


def _const_spec(shape):
    n = len(shape)
    return pl.BlockSpec(shape, lambda b: (0,) * n)


def _round_up(a, m):
    return (a + m - 1) // m * m


@jax.jit
def lenet5_forward(kp, x):
    """x: (N, 1, 28, 28) float32 -> logits (N, 10) float32."""
    n = x.shape[0]
    assert x.shape[1:] == (1, 28, 28), x.shape

    # Batch tiling: pad batch to a multiple of 16 (bf16 sublane packing), cap
    # the tile at _MAX_BLOCK_B, and keep >= 2 grid steps when the batch is big
    # enough so v7x can shard the parallel axis across both TensorCores.
    n16 = _round_up(n, 16)
    n_steps = -(-n16 // _MAX_BLOCK_B)
    if n_steps == 1 and n16 >= 32:
        n_steps = 2
    block_b = _round_up(-(-n16 // n_steps), 16)
    n_pad = block_b * n_steps
    grid = (n_steps,)

    # H-leading layout (28, n, 28), bf16 cast once, batch padded.
    xt = jnp.transpose(x.reshape(n, 28, 28), (1, 0, 2)).astype(MXU_DTYPE)
    if n_pad != n:
        xt = jnp.pad(xt, ((0, 0), (0, n_pad - n), (0, 0)))

    out = pl.pallas_call(
        _lenet5_fused_kernel,
        out_shape=jax.ShapeDtypeStruct((n_pad, 128), jnp.float32),
        grid=grid,
        in_specs=[
            pl.BlockSpec((28, block_b, 28), lambda b: (0, b, 0)),  # x (H, N, W)
            _const_spec((5, 28, 256)),     # conv1 banded weights (even|odd fused)
            _const_spec((1, 1, 128)),      # conv1 bias (tiled over ow', padded)
            _const_spec((5, 128, 256)),    # conv2 banded weights (even|odd fused)
            _const_spec((1, 1, 128)),      # conv2 bias (tiled over ow', padded)
            _const_spec((4, 128, 64)),     # fc1 weights split per pooled row
            _const_spec((1, 64)),          # fc1 bias (padded)
            _const_spec((64, 128)),        # fc2 weights (padded)
            _const_spec((1, 128)),         # fc2 bias (padded)
        ],
        out_specs=pl.BlockSpec((block_b, 128), lambda b: (b, 0)),
        scratch_shapes=[
            pltpu.VMEM((24 * block_b, 256), jnp.float32),   # conv1 accumulator
            pltpu.VMEM((8 * block_b, 256), jnp.float32),    # conv2 accumulator
            pltpu.VMEM((12, block_b, 128), MXU_DTYPE),      # pooled conv1 acts
        ],
        compiler_params=pltpu.CompilerParams(
            dimension_semantics=("parallel",),
            vmem_limit_bytes=32 * 1024 * 1024),
    )(xt, kp["w1"], kp["b1"], kp["w2"], kp["b2"],
      kp["wf1"], kp["bf1"], kp["wf2"], kp["bf2"])

    return out[:n, :10]


# ---------------------------------------------------------------------------
# One-time weight preparation (torch layout -> banded / lane-dense matrices)
# ---------------------------------------------------------------------------
def _pad_last(a, size):
    pad = size - a.shape[-1]
    if pad == 0:
        return a
    cfg = [(0, 0)] * (a.ndim - 1) + [(0, pad)]
    return jnp.pad(a, cfg)


def prepare_params(p):
    w1, b1 = p["conv1_w"], p["conv1_b"]               # (10,1,5,5), (10,)
    w2, b2 = p["conv2_w"], p["conv2_b"]               # (20,10,5,5), (20,)
    fw1, fb1 = p["fc1_w"], p["fc1_b"]                 # (50,320), (50,)
    fw2, fb2 = p["fc2_w"], p["fc2_b"]                 # (10,50), (10,)

    # conv1: W1B[i, w, ow, oc] = w1[oc,0,i,w-ow] if 0 <= w-ow < 5 else 0.
    ow = jnp.arange(24)
    wi = jnp.arange(28)
    j = wi[:, None] - ow[None, :]                     # (28, 24)
    valid = ((j >= 0) & (j < 5)).astype(jnp.float32)
    w1_perm = jnp.transpose(w1[:, 0], (1, 2, 0))      # (5,5,10) [i,j,oc]
    w1b = w1_perm[:, jnp.clip(j, 0, 4), :] * valid[None, :, :, None]   # (5,28,24,10)
    w1e = w1b[:, :, 0::2, :].reshape(5, 28, 120)      # even ow columns
    w1o = w1b[:, :, 1::2, :].reshape(5, 28, 120)      # odd ow columns
    w1f = jnp.concatenate([_pad_last(w1e, 128), _pad_last(w1o, 128)],
                          axis=-1).astype(MXU_DTYPE)  # (5, 28, 256)
    b1k = _pad_last(jnp.tile(b1, 12), 128).reshape(1, 1, 128).astype(jnp.float32)

    # conv2: W2B[i, (w*10+c), (ow*20+oc)] = w2[oc,c,i,w-ow] if 0 <= w-ow < 5.
    ow2 = jnp.arange(8)
    wi2 = jnp.arange(12)
    j2 = wi2[:, None] - ow2[None, :]                  # (12, 8)
    valid2 = ((j2 >= 0) & (j2 < 5)).astype(jnp.float32)
    w2_perm = jnp.transpose(w2, (2, 3, 1, 0))         # (5,5,10,20) [i,j,c,oc]
    w2b = w2_perm[:, jnp.clip(j2, 0, 4)] * valid2[None, :, :, None, None]  # (5,12,8,10,20)
    w2b = jnp.transpose(w2b, (0, 1, 3, 2, 4))         # (5,12,10,8,20) [i,w,c,ow,oc]
    w2e = jnp.pad(w2b[:, :, :, 0::2, :].reshape(5, 120, 80), ((0, 0), (0, 8), (0, 48)))
    w2o = jnp.pad(w2b[:, :, :, 1::2, :].reshape(5, 120, 80), ((0, 0), (0, 8), (0, 48)))
    w2f = jnp.concatenate([w2e, w2o], axis=-1).astype(MXU_DTYPE)   # (5, 128, 256)
    b2k = _pad_last(jnp.tile(b2, 4), 128).reshape(1, 1, 128).astype(jnp.float32)

    # fc1: torch flattens NCHW as (c, h, w); kernel rows are (h, w*20+c).
    wf1 = fw1.reshape(50, 20, 4, 4)                   # [o, c, h, w]
    wf1 = jnp.transpose(wf1, (2, 3, 1, 0)).reshape(4, 80, 50)     # [h, w*20+c, o]
    wf1 = jnp.pad(wf1, ((0, 0), (0, 48), (0, 14))).astype(MXU_DTYPE)  # (4,128,64)
    bf1 = _pad_last(fb1, 64).reshape(1, 64).astype(jnp.float32)

    wf2 = jnp.pad(fw2.T, ((0, 14), (0, 118))).astype(MXU_DTYPE)   # (64, 128)
    bf2 = _pad_last(fb2, 128).reshape(1, 128).astype(jnp.float32)

    return dict(w1=w1f, b1=b1k, w2=w2f, b2=b2k,
                wf1=wf1, bf1=bf1, wf2=wf2, bf2=bf2)


# ---------------------------------------------------------------------------
# Deterministic torch-style init (uniform(-1/sqrt(fan_in), 1/sqrt(fan_in)))
# ---------------------------------------------------------------------------
def init_params(key):
    def uni(k, shape, fan_in):
        bound = 1.0 / math.sqrt(fan_in)
        return jax.random.uniform(k, shape, jnp.float32, -bound, bound)

    ks = jax.random.split(key, 8)
    return {
        "conv1_w": uni(ks[0], (10, 1, 5, 5), 1 * 5 * 5),
        "conv1_b": uni(ks[1], (10,), 1 * 5 * 5),
        "conv2_w": uni(ks[2], (20, 10, 5, 5), 10 * 5 * 5),
        "conv2_b": uni(ks[3], (20,), 10 * 5 * 5),
        "fc1_w": uni(ks[4], (50, 320), 320),
        "fc1_b": uni(ks[5], (50,), 320),
        "fc2_w": uni(ks[6], (10, 50), 50),
        "fc2_b": uni(ks[7], (10,), 50),
    }


# ---------------------------------------------------------------------------
# Pure-XLA reference (mirrors the PyTorch module) for a numeric self-check.
# ---------------------------------------------------------------------------
def reference_forward(p, x):
    dn = ("NCHW", "OIHW", "NCHW")
    y = jax.lax.conv_general_dilated(x, p["conv1_w"], (1, 1), "VALID",
                                     dimension_numbers=dn)
    y = y + p["conv1_b"].reshape(1, -1, 1, 1)
    y = jax.lax.reduce_window(y, -jnp.inf, jax.lax.max, (1, 1, 2, 2),
                              (1, 1, 2, 2), "VALID")
    y = jnp.maximum(y, 0.0)
    y = jax.lax.conv_general_dilated(y, p["conv2_w"], (1, 1), "VALID",
                                     dimension_numbers=dn)
    y = y + p["conv2_b"].reshape(1, -1, 1, 1)
    y = jax.lax.reduce_window(y, -jnp.inf, jax.lax.max, (1, 1, 2, 2),
                              (1, 1, 2, 2), "VALID")
    y = jnp.maximum(y, 0.0)
    y = y.reshape(y.shape[0], -1)                     # torch .view(-1, 320): (c,h,w)
    y = jnp.maximum(y @ p["fc1_w"].T + p["fc1_b"], 0.0)
    return y @ p["fc2_w"].T + p["fc2_b"]


if __name__ == "__main__":
    root = jax.random.PRNGKey(0)
    k_x, k_p = jax.random.split(root)
    x = jax.random.normal(k_x, (2, 1, 28, 28), jnp.float32)   # MNIST-shaped input
    params = init_params(k_p)

    kparams = prepare_params(params)          # one-time weight transform
    out = lenet5_forward(kparams, x)
    out = jax.block_until_ready(out)
    assert out.shape == (2, 10) and out.dtype == jnp.float32

    ref = reference_forward(params, x)
    err = float(jnp.max(jnp.abs(out - ref)))
    assert err < 5e-2, f"kernel vs reference mismatch: max abs err = {err}"

    print("KERNEL_OK")
</pallas_src>

<mosaic_0001>
module attributes {stable_mosaic.version = 11 : i64} {
  func.func @_lenet5_fused_kernel(%arg0: i32, %arg1: memref<28x16x28xbf16, #tpu.memory_space<vmem>>, %arg2: memref<5x28x256xbf16, #tpu.memory_space<vmem>>, %arg3: memref<1x1x128xf32, #tpu.memory_space<vmem>>, %arg4: memref<5x128x256xbf16, #tpu.memory_space<vmem>>, %arg5: memref<1x1x128xf32, #tpu.memory_space<vmem>>, %arg6: memref<4x128x64xbf16, #tpu.memory_space<vmem>>, %arg7: memref<1x64xf32, #tpu.memory_space<vmem>>, %arg8: memref<64x128xbf16, #tpu.memory_space<vmem>>, %arg9: memref<1x128xf32, #tpu.memory_space<vmem>>, %arg10: memref<16x128xf32, #tpu.memory_space<vmem>>, %arg11: memref<384x256xf32, #tpu.memory_space<vmem>>, %arg12: memref<128x256xf32, #tpu.memory_space<vmem>>, %arg13: memref<12x16x128xbf16, #tpu.memory_space<vmem>>) attributes {dimension_semantics = [#tpu.dimension_semantics<parallel>], iteration_bounds = array<i64: 1>, scalar_prefetch = 0 : i64, scratch_operands = 3 : i64, tpu.core_type = #tpu.core_type<tc>, window_params = [{transform_indices = @transform_0, window_bounds = array<i64: 28, 16, 28>}, {pipeline_mode = #tpu.pipeline_mode<synchronous>, transform_indices = @transform_1, window_bounds = array<i64: 5, 28, 256>}, {pipeline_mode = #tpu.pipeline_mode<synchronous>, transform_indices = @transform_2, window_bounds = array<i64: 1, 1, 128>}, {pipeline_mode = #tpu.pipeline_mode<synchronous>, transform_indices = @transform_3, window_bounds = array<i64: 5, 128, 256>}, {pipeline_mode = #tpu.pipeline_mode<synchronous>, transform_indices = @transform_4, window_bounds = array<i64: 1, 1, 128>}, {pipeline_mode = #tpu.pipeline_mode<synchronous>, transform_indices = @transform_5, window_bounds = array<i64: 4, 128, 64>}, {pipeline_mode = #tpu.pipeline_mode<synchronous>, transform_indices = @transform_6, window_bounds = array<i64: 1, 64>}, {pipeline_mode = #tpu.pipeline_mode<synchronous>, transform_indices = @transform_7, window_bounds = array<i64: 64, 128>}, {pipeline_mode = #tpu.pipeline_mode<synchronous>, transform_indices = @transform_8, window_bounds = array<i64: 1, 128>}, {transform_indices = @transform_9, window_bounds = array<i64: 16, 128>}]} {
    %c0 = arith.constant 0 : index
    %c0_0 = arith.constant 0 : index
    %c0_1 = arith.constant 0 : index
    %0 = vector.load %arg1[%c0, %c0_0, %c0_1] : memref<28x16x28xbf16, #tpu.memory_space<vmem>>, vector<24x16x28xbf16>
    %1 = vector.shape_cast %0 : vector<24x16x28xbf16> to vector<384x28xbf16>
    %c0_2 = arith.constant 0 : index
    %c0_3 = arith.constant 0 : index
    %c0_4 = arith.constant 0 : index
    %2 = vector.load %arg2[%c0_2, %c0_3, %c0_4] : memref<5x28x256xbf16, #tpu.memory_space<vmem>>, vector<1x28x256xbf16>
    %3 = vector.shape_cast %2 : vector<1x28x256xbf16> to vector<28x256xbf16>
    %cst = arith.constant dense<0.000000e+00> : vector<384x256xf32>
    %4 = tpu.matmul %1, %3, %cst {dimension_numbers = #tpu.dot_dimension_numbers<[1], [0], [0], [1], [0, 0, 1, 1], [], []>} : vector<384x28xbf16>, vector<28x256xbf16>, vector<384x256xf32> -> vector<384x256xf32>
    %c0_5 = arith.constant 0 : index
    %c0_6 = arith.constant 0 : index
    %5 = vector.load %arg11[%c0_5, %c0_6] : memref<384x256xf32, #tpu.memory_space<vmem>>, vector<384x256xf32>
    tpu.vector_store %arg11[%c0_5, %c0_6], %4 {strides = array<i32>} : memref<384x256xf32, #tpu.memory_space<vmem>>, vector<384x256xf32>,
    %c1 = arith.constant 1 : index
    %c0_7 = arith.constant 0 : index
    %c0_8 = arith.constant 0 : index
    %6 = vector.load %arg1[%c1, %c0_7, %c0_8] : memref<28x16x28xbf16, #tpu.memory_space<vmem>>, vector<24x16x28xbf16>
    %7 = vector.shape_cast %6 : vector<24x16x28xbf16> to vector<384x28xbf16>
    %c1_9 = arith.constant 1 : index
    %c0_10 = arith.constant 0 : index
    %c0_11 = arith.constant 0 : index
    %8 = vector.load %arg2[%c1_9, %c0_10, %c0_11] : memref<5x28x256xbf16, #tpu.memory_space<vmem>>, vector<1x28x256xbf16>
    %9 = vector.shape_cast %8 : vector<1x28x256xbf16> to vector<28x256xbf16>
    %cst_12 = arith.constant dense<0.000000e+00> : vector<384x256xf32>
    %10 = tpu.matmul %7, %9, %cst_12 {dimension_numbers = #tpu.dot_dimension_numbers<[1], [0], [0], [1], [0, 0, 1, 1], [], []>} : vector<384x28xbf16>, vector<28x256xbf16>, vector<384x256xf32> -> vector<384x256xf32>
    %c0_13 = arith.constant 0 : index
    %c0_14 = arith.constant 0 : index
    %11 = vector.load %arg11[%c0_13, %c0_14] : memref<384x256xf32, #tpu.memory_space<vmem>>, vector<384x256xf32>
    %12 = arith.addf %11, %10 : vector<384x256xf32>
    %c0_15 = arith.constant 0 : index
    %c0_16 = arith.constant 0 : index
    %13 = vector.load %arg11[%c0_15, %c0_16] : memref<384x256xf32, #tpu.memory_space<vmem>>, vector<384x256xf32>
    tpu.vector_store %arg11[%c0_15, %c0_16], %12 {strides = array<i32>} : memref<384x256xf32, #tpu.memory_space<vmem>>, vector<384x256xf32>,
    %c2 = arith.constant 2 : index
    %c0_17 = arith.constant 0 : index
    %c0_18 = arith.constant 0 : index
    %14 = vector.load %arg1[%c2, %c0_17, %c0_18] : memref<28x16x28xbf16, #tpu.memory_space<vmem>>, vector<24x16x28xbf16>
    %15 = vector.shape_cast %14 : vector<24x16x28xbf16> to vector<384x28xbf16>
    %c2_19 = arith.constant 2 : index
    %c0_20 = arith.constant 0 : index
    %c0_21 = arith.constant 0 : index
    %16 = vector.load %arg2[%c2_19, %c0_20, %c0_21] : memref<5x28x256xbf16, #tpu.memory_space<vmem>>, vector<1x28x256xbf16>
    %17 = vector.shape_cast %16 : vector<1x28x256xbf16> to vector<28x256xbf16>
    %cst_22 = arith.constant dense<0.000000e+00> : vector<384x256xf32>
    %18 = tpu.matmul %15, %17, %cst_22 {dimension_numbers = #tpu.dot_dimension_numbers<[1], [0], [0], [1], [0, 0, 1, 1], [], []>} : vector<384x28xbf16>, vector<28x256xbf16>, vector<384x256xf32> -> vector<384x256xf32>
    %c0_23 = arith.constant 0 : index
    %c0_24 = arith.constant 0 : index
    %19 = vector.load %arg11[%c0_23, %c0_24] : memref<384x256xf32, #tpu.memory_space<vmem>>, vector<384x256xf32>
    %20 = arith.addf %19, %18 : vector<384x256xf32>
    %c0_25 = arith.constant 0 : index
    %c0_26 = arith.constant 0 : index
    %21 = vector.load %arg11[%c0_25, %c0_26] : memref<384x256xf32, #tpu.memory_space<vmem>>, vector<384x256xf32>
    tpu.vector_store %arg11[%c0_25, %c0_26], %20 {strides = array<i32>} : memref<384x256xf32, #tpu.memory_space<vmem>>, vector<384x256xf32>,
    %c3 = arith.constant 3 : index
    %c0_27 = arith.constant 0 : index
    %c0_28 = arith.constant 0 : index
    %22 = vector.load %arg1[%c3, %c0_27, %c0_28] : memref<28x16x28xbf16, #tpu.memory_space<vmem>>, vector<24x16x28xbf16>
    %23 = vector.shape_cast %22 : vector<24x16x28xbf16> to vector<384x28xbf16>
    %c3_29 = arith.constant 3 : index
    %c0_30 = arith.constant 0 : index
    %c0_31 = arith.constant 0 : index
    %24 = vector.load %arg2[%c3_29, %c0_30, %c0_31] : memref<5x28x256xbf16, #tpu.memory_space<vmem>>, vector<1x28x256xbf16>
    %25 = vector.shape_cast %24 : vector<1x28x256xbf16> to vector<28x256xbf16>
    %cst_32 = arith.constant dense<0.000000e+00> : vector<384x256xf32>
    %26 = tpu.matmul %23, %25, %cst_32 {dimension_numbers = #tpu.dot_dimension_numbers<[1], [0], [0], [1], [0, 0, 1, 1], [], []>} : vector<384x28xbf16>, vector<28x256xbf16>, vector<384x256xf32> -> vector<384x256xf32>
    %c0_33 = arith.constant 0 : index
    %c0_34 = arith.constant 0 : index
    %27 = vector.load %arg11[%c0_33, %c0_34] : memref<384x256xf32, #tpu.memory_space<vmem>>, vector<384x256xf32>
    %28 = arith.addf %27, %26 : vector<384x256xf32>
    %c0_35 = arith.constant 0 : index
    %c0_36 = arith.constant 0 : index
    %29 = vector.load %arg11[%c0_35, %c0_36] : memref<384x256xf32, #tpu.memory_space<vmem>>, vector<384x256xf32>
    tpu.vector_store %arg11[%c0_35, %c0_36], %28 {strides = array<i32>} : memref<384x256xf32, #tpu.memory_space<vmem>>, vector<384x256xf32>,
    %c4 = arith.constant 4 : index
    %c0_37 = arith.constant 0 : index
    %c0_38 = arith.constant 0 : index
    %30 = vector.load %arg1[%c4, %c0_37, %c0_38] : memref<28x16x28xbf16, #tpu.memory_space<vmem>>, vector<24x16x28xbf16>
    %31 = vector.shape_cast %30 : vector<24x16x28xbf16> to vector<384x28xbf16>
    %c4_39 = arith.constant 4 : index
    %c0_40 = arith.constant 0 : index
    %c0_41 = arith.constant 0 : index
    %32 = vector.load %arg2[%c4_39, %c0_40, %c0_41] : memref<5x28x256xbf16, #tpu.memory_space<vmem>>, vector<1x28x256xbf16>
    %33 = vector.shape_cast %32 : vector<1x28x256xbf16> to vector<28x256xbf16>
    %cst_42 = arith.constant dense<0.000000e+00> : vector<384x256xf32>
    %34 = tpu.matmul %31, %33, %cst_42 {dimension_numbers = #tpu.dot_dimension_numbers<[1], [0], [0], [1], [0, 0, 1, 1], [], []>} : vector<384x28xbf16>, vector<28x256xbf16>, vector<384x256xf32> -> vector<384x256xf32>
    %c0_43 = arith.constant 0 : index
    %c0_44 = arith.constant 0 : index
    %35 = vector.load %arg11[%c0_43, %c0_44] : memref<384x256xf32, #tpu.memory_space<vmem>>, vector<384x256xf32>
    %36 = arith.addf %35, %34 : vector<384x256xf32>
    %c0_45 = arith.constant 0 : index
    %c0_46 = arith.constant 0 : index
    %37 = vector.load %arg11[%c0_45, %c0_46] : memref<384x256xf32, #tpu.memory_space<vmem>>, vector<384x256xf32>
    tpu.vector_store %arg11[%c0_45, %c0_46], %36 {strides = array<i32>} : memref<384x256xf32, #tpu.memory_space<vmem>>, vector<384x256xf32>,
    %c0_47 = arith.constant 0 : index
    %c0_48 = arith.constant 0 : index
    %38 = vector.load %arg11[%c0_47, %c0_48] : memref<384x256xf32, #tpu.memory_space<vmem>>, vector<384x256xf32>
    %39 = vector.shape_cast %38 : vector<384x256xf32> to vector<12x2x16x256xf32>
    %40 = vector.extract_strided_slice %39 {offsets = [0, 0, 0, 0], sizes = [12, 2, 16, 128], strides = [1, 1, 1, 1]} : vector<12x2x16x256xf32> to vector<12x2x16x128xf32>
    %41 = vector.extract_strided_slice %39 {offsets = [0, 0, 0, 128], sizes = [12, 2, 16, 128], strides = [1, 1, 1, 1]} : vector<12x2x16x256xf32> to vector<12x2x16x128xf32>
    %42 = arith.maximumf %40, %41 : vector<12x2x16x128xf32>
    %43 = vector.extract_strided_slice %42 {offsets = [0, 0, 0, 0], sizes = [12, 1, 16, 128], strides = [1, 1, 1, 1]} : vector<12x2x16x128xf32> to vector<12x1x16x128xf32>
    %44 = vector.shape_cast %43 : vector<12x1x16x128xf32> to vector<12x16x128xf32>
    %45 = vector.extract_strided_slice %42 {offsets = [0, 1, 0, 0], sizes = [12, 1, 16, 128], strides = [1, 1, 1, 1]} : vector<12x2x16x128xf32> to vector<12x1x16x128xf32>
    %46 = vector.shape_cast %45 : vector<12x1x16x128xf32> to vector<12x16x128xf32>
    %47 = arith.maximumf %44, %46 : vector<12x16x128xf32>
    %c0_49 = arith.constant 0 : index
    %c0_50 = arith.constant 0 : index
    %c0_51 = arith.constant 0 : index
    %48 = vector.load %arg3[%c0_49, %c0_50, %c0_51] : memref<1x1x128xf32, #tpu.memory_space<vmem>>, vector<1x1x128xf32>
    %49 = vector.broadcast %48 : vector<1x1x128xf32> to vector<12x16x128xf32>
    %50 = arith.addf %47, %49 : vector<12x16x128xf32>
    %cst_52 = arith.constant 0.000000e+00 : f32
    %51 = vector.broadcast %cst_52 : f32 to vector<12x16x128xf32>
    %52 = arith.maximumf %50, %51 : vector<12x16x128xf32>
    %53 = arith.truncf %52 : vector<12x16x128xf32> to vector<12x16x128xbf16>
    %c0_53 = arith.constant 0 : index
    %c0_54 = arith.constant 0 : index
    %c0_55 = arith.constant 0 : index
    %54 = vector.load %arg13[%c0_53, %c0_54, %c0_55] : memref<12x16x128xbf16, #tpu.memory_space<vmem>>, vector<12x16x128xbf16>
    tpu.vector_store %arg13[%c0_53, %c0_54, %c0_55], %53 {strides = array<i32>} : memref<12x16x128xbf16, #tpu.memory_space<vmem>>, vector<12x16x128xbf16>,
    %c0_56 = arith.constant 0 : index
    %c0_57 = arith.constant 0 : index
    %c0_58 = arith.constant 0 : index
    %55 = vector.load %arg13[%c0_56, %c0_57, %c0_58] : memref<12x16x128xbf16, #tpu.memory_space<vmem>>, vector<8x16x128xbf16>
    %56 = vector.shape_cast %55 : vector<8x16x128xbf16> to vector<128x128xbf16>
    %c0_59 = arith.constant 0 : index
    %c0_60 = arith.constant 0 : index
    %c0_61 = arith.constant 0 : index
    %57 = vector.load %arg4[%c0_59, %c0_60, %c0_61] : memref<5x128x256xbf16, #tpu.memory_space<vmem>>, vector<1x128x256xbf16>
    %58 = vector.shape_cast %57 : vector<1x128x256xbf16> to vector<128x256xbf16>
    %cst_62 = arith.constant dense<0.000000e+00> : vector<128x256xf32>
    %59 = tpu.matmul %56, %58, %cst_62 {dimension_numbers = #tpu.dot_dimension_numbers<[1], [0], [0], [1], [0, 0, 1, 1], [], []>} : vector<128x128xbf16>, vector<128x256xbf16>, vector<128x256xf32> -> vector<128x256xf32>
    %c0_63 = arith.constant 0 : index
    %c0_64 = arith.constant 0 : index
    %60 = vector.load %arg12[%c0_63, %c0_64] : memref<128x256xf32, #tpu.memory_space<vmem>>, vector<128x256xf32>
    tpu.vector_store %arg12[%c0_63, %c0_64], %59 {strides = array<i32>} : memref<128x256xf32, #tpu.memory_space<vmem>>, vector<128x256xf32>,
    %c1_65 = arith.constant 1 : index
    %c0_66 = arith.constant 0 : index
    %c0_67 = arith.constant 0 : index
    %61 = vector.load %arg13[%c1_65, %c0_66, %c0_67] : memref<12x16x128xbf16, #tpu.memory_space<vmem>>, vector<8x16x128xbf16>
    %62 = vector.shape_cast %61 : vector<8x16x128xbf16> to vector<128x128xbf16>
    %c1_68 = arith.constant 1 : index
    %c0_69 = arith.constant 0 : index
    %c0_70 = arith.constant 0 : index
    %63 = vector.load %arg4[%c1_68, %c0_69, %c0_70] : memref<5x128x256xbf16, #tpu.memory_space<vmem>>, vector<1x128x256xbf16>
    %64 = vector.shape_cast %63 : vector<1x128x256xbf16> to vector<128x256xbf16>
    %cst_71 = arith.constant dense<0.000000e+00> : vector<128x256xf32>
    %65 = tpu.matmul %62, %64, %cst_71 {dimension_numbers = #tpu.dot_dimension_numbers<[1], [0], [0], [1], [0, 0, 1, 1], [], []>} : vector<128x128xbf16>, vector<128x256xbf16>, vector<128x256xf32> -> vector<128x256xf32>
    %c0_72 = arith.constant 0 : index
    %c0_73 = arith.constant 0 : index
    %66 = vector.load %arg12[%c0_72, %c0_73] : memref<128x256xf32, #tpu.memory_space<vmem>>, vector<128x256xf32>
    %67 = arith.addf %66, %65 : vector<128x256xf32>
    %c0_74 = arith.constant 0 : index
    %c0_75 = arith.constant 0 : index
    %68 = vector.load %arg12[%c0_74, %c0_75] : memref<128x256xf32, #tpu.memory_space<vmem>>, vector<128x256xf32>
    tpu.vector_store %arg12[%c0_74, %c0_75], %67 {strides = array<i32>} : memref<128x256xf32, #tpu.memory_space<vmem>>, vector<128x256xf32>,
    %c2_76 = arith.constant 2 : index
    %c0_77 = arith.constant 0 : index
    %c0_78 = arith.constant 0 : index
    %69 = vector.load %arg13[%c2_76, %c0_77, %c0_78] : memref<12x16x128xbf16, #tpu.memory_space<vmem>>, vector<8x16x128xbf16>
    %70 = vector.shape_cast %69 : vector<8x16x128xbf16> to vector<128x128xbf16>
    %c2_79 = arith.constant 2 : index
    %c0_80 = arith.constant 0 : index
    %c0_81 = arith.constant 0 : index
    %71 = vector.load %arg4[%c2_79, %c0_80, %c0_81] : memref<5x128x256xbf16, #tpu.memory_space<vmem>>, vector<1x128x256xbf16>
    %72 = vector.shape_cast %71 : vector<1x128x256xbf16> to vector<128x256xbf16>
    %cst_82 = arith.constant dense<0.000000e+00> : vector<128x256xf32>
    %73 = tpu.matmul %70, %72, %cst_82 {dimension_numbers = #tpu.dot_dimension_numbers<[1], [0], [0], [1], [0, 0, 1, 1], [], []>} : vector<128x128xbf16>, vector<128x256xbf16>, vector<128x256xf32> -> vector<128x256xf32>
    %c0_83 = arith.constant 0 : index
    %c0_84 = arith.constant 0 : index
    %74 = vector.load %arg12[%c0_83, %c0_84] : memref<128x256xf32, #tpu.memory_space<vmem>>, vector<128x256xf32>
    %75 = arith.addf %74, %73 : vector<128x256xf32>
    %c0_85 = arith.constant 0 : index
    %c0_86 = arith.constant 0 : index
    %76 = vector.load %arg12[%c0_85, %c0_86] : memref<128x256xf32, #tpu.memory_space<vmem>>, vector<128x256xf32>
    tpu.vector_store %arg12[%c0_85, %c0_86], %75 {strides = array<i32>} : memref<128x256xf32, #tpu.memory_space<vmem>>, vector<128x256xf32>,
    %c3_87 = arith.constant 3 : index
    %c0_88 = arith.constant 0 : index
    %c0_89 = arith.constant 0 : index
    %77 = vector.load %arg13[%c3_87, %c0_88, %c0_89] : memref<12x16x128xbf16, #tpu.memory_space<vmem>>, vector<8x16x128xbf16>
    %78 = vector.shape_cast %77 : vector<8x16x128xbf16> to vector<128x128xbf16>
    %c3_90 = arith.constant 3 : index
    %c0_91 = arith.constant 0 : index
    %c0_92 = arith.constant 0 : index
    %79 = vector.load %arg4[%c3_90, %c0_91, %c0_92] : memref<5x128x256xbf16, #tpu.memory_space<vmem>>, vector<1x128x256xbf16>
    %80 = vector.shape_cast %79 : vector<1x128x256xbf16> to vector<128x256xbf16>
    %cst_93 = arith.constant dense<0.000000e+00> : vector<128x256xf32>
    %81 = tpu.matmul %78, %80, %cst_93 {dimension_numbers = #tpu.dot_dimension_numbers<[1], [0], [0], [1], [0, 0, 1, 1], [], []>} : vector<128x128xbf16>, vector<128x256xbf16>, vector<128x256xf32> -> vector<128x256xf32>
    %c0_94 = arith.constant 0 : index
    %c0_95 = arith.constant 0 : index
    %82 = vector.load %arg12[%c0_94, %c0_95] : memref<128x256xf32, #tpu.memory_space<vmem>>, vector<128x256xf32>
    %83 = arith.addf %82, %81 : vector<128x256xf32>
    %c0_96 = arith.constant 0 : index
    %c0_97 = arith.constant 0 : index
    %84 = vector.load %arg12[%c0_96, %c0_97] : memref<128x256xf32, #tpu.memory_space<vmem>>, vector<128x256xf32>
    tpu.vector_store %arg12[%c0_96, %c0_97], %83 {strides = array<i32>} : memref<128x256xf32, #tpu.memory_space<vmem>>, vector<128x256xf32>,
    %c4_98 = arith.constant 4 : index
    %c0_99 = arith.constant 0 : index
    %c0_100 = arith.constant 0 : index
    %85 = vector.load %arg13[%c4_98, %c0_99, %c0_100] : memref<12x16x128xbf16, #tpu.memory_space<vmem>>, vector<8x16x128xbf16>
    %86 = vector.shape_cast %85 : vector<8x16x128xbf16> to vector<128x128xbf16>
    %c4_101 = arith.constant 4 : index
    %c0_102 = arith.constant 0 : index
    %c0_103 = arith.constant 0 : index
    %87 = vector.load %arg4[%c4_101, %c0_102, %c0_103] : memref<5x128x256xbf16, #tpu.memory_space<vmem>>, vector<1x128x256xbf16>
    %88 = vector.shape_cast %87 : vector<1x128x256xbf16> to vector<128x256xbf16>
    %cst_104 = arith.constant dense<0.000000e+00> : vector<128x256xf32>
    %89 = tpu.matmul %86, %88, %cst_104 {dimension_numbers = #tpu.dot_dimension_numbers<[1], [0], [0], [1], [0, 0, 1, 1], [], []>} : vector<128x128xbf16>, vector<128x256xbf16>, vector<128x256xf32> -> vector<128x256xf32>
    %c0_105 = arith.constant 0 : index
    %c0_106 = arith.constant 0 : index
    %90 = vector.load %arg12[%c0_105, %c0_106] : memref<128x256xf32, #tpu.memory_space<vmem>>, vector<128x256xf32>
    %91 = arith.addf %90, %89 : vector<128x256xf32>
    %c0_107 = arith.constant 0 : index
    %c0_108 = arith.constant 0 : index
    %92 = vector.load %arg12[%c0_107, %c0_108] : memref<128x256xf32, #tpu.memory_space<vmem>>, vector<128x256xf32>
    tpu.vector_store %arg12[%c0_107, %c0_108], %91 {strides = array<i32>} : memref<128x256xf32, #tpu.memory_space<vmem>>, vector<128x256xf32>,
    %c0_109 = arith.constant 0 : index
    %c0_110 = arith.constant 0 : index
    %93 = vector.load %arg12[%c0_109, %c0_110] : memref<128x256xf32, #tpu.memory_space<vmem>>, vector<128x256xf32>
    %94 = vector.shape_cast %93 : vector<128x256xf32> to vector<4x2x16x256xf32>
    %95 = vector.extract_strided_slice %94 {offsets = [0, 0, 0, 0], sizes = [4, 2, 16, 128], strides = [1, 1, 1, 1]} : vector<4x2x16x256xf32> to vector<4x2x16x128xf32>
    %96 = vector.extract_strided_slice %94 {offsets = [0, 0, 0, 128], sizes = [4, 2, 16, 128], strides = [1, 1, 1, 1]} : vector<4x2x16x256xf32> to vector<4x2x16x128xf32>
    %97 = arith.maximumf %95, %96 : vector<4x2x16x128xf32>
    %98 = vector.extract_strided_slice %97 {offsets = [0, 0, 0, 0], sizes = [4, 1, 16, 128], strides = [1, 1, 1, 1]} : vector<4x2x16x128xf32> to vector<4x1x16x128xf32>
    %99 = vector.shape_cast %98 : vector<4x1x16x128xf32> to vector<4x16x128xf32>
    %100 = vector.extract_strided_slice %97 {offsets = [0, 1, 0, 0], sizes = [4, 1, 16, 128], strides = [1, 1, 1, 1]} : vector<4x2x16x128xf32> to vector<4x1x16x128xf32>
    %101 = vector.shape_cast %100 : vector<4x1x16x128xf32> to vector<4x16x128xf32>
    %102 = arith.maximumf %99, %101 : vector<4x16x128xf32>
    %c0_111 = arith.constant 0 : index
    %c0_112 = arith.constant 0 : index
    %c0_113 = arith.constant 0 : index
    %103 = vector.load %arg5[%c0_111, %c0_112, %c0_113] : memref<1x1x128xf32, #tpu.memory_space<vmem>>, vector<1x1x128xf32>
    %104 = vector.broadcast %103 : vector<1x1x128xf32> to vector<4x16x128xf32>
    %105 = arith.addf %102, %104 : vector<4x16x128xf32>
    %cst_114 = arith.constant 0.000000e+00 : f32
    %106 = vector.broadcast %cst_114 : f32 to vector<4x16x128xf32>
    %107 = arith.maximumf %105, %106 : vector<4x16x128xf32>
    %108 = arith.truncf %107 : vector<4x16x128xf32> to vector<4x16x128xbf16>
    %109 = vector.extract_strided_slice %108 {offsets = [0, 0, 0], sizes = [1, 16, 128], strides = [1, 1, 1]} : vector<4x16x128xbf16> to vector<1x16x128xbf16>
    %110 = vector.shape_cast %109 : vector<1x16x128xbf16> to vector<16x128xbf16>
    %c0_115 = arith.constant 0 : index
    %c0_116 = arith.constant 0 : index
    %c0_117 = arith.constant 0 : index
    %111 = vector.load %arg6[%c0_115, %c0_116, %c0_117] : memref<4x128x64xbf16, #tpu.memory_space<vmem>>, vector<1x128x64xbf16>
    %112 = vector.shape_cast %111 : vector<1x128x64xbf16> to vector<128x64xbf16>
    %cst_118 = arith.constant dense<0.000000e+00> : vector<16x64xf32>
    %113 = tpu.matmul %110, %112, %cst_118 {dimension_numbers = #tpu.dot_dimension_numbers<[1], [0], [0], [1], [0, 0, 1, 1], [], []>} : vector<16x128xbf16>, vector<128x64xbf16>, vector<16x64xf32> -> vector<16x64xf32>
    %114 = vector.extract_strided_slice %108 {offsets = [1, 0, 0], sizes = [1, 16, 128], strides = [1, 1, 1]} : vector<4x16x128xbf16> to vector<1x16x128xbf16>
    %115 = vector.shape_cast %114 : vector<1x16x128xbf16> to vector<16x128xbf16>
    %c1_119 = arith.constant 1 : index
    %c0_120 = arith.constant 0 : index
    %c0_121 = arith.constant 0 : index
    %116 = vector.load %arg6[%c1_119, %c0_120, %c0_121] : memref<4x128x64xbf16, #tpu.memory_space<vmem>>, vector<1x128x64xbf16>
    %117 = vector.shape_cast %116 : vector<1x128x64xbf16> to vector<128x64xbf16>
    %cst_122 = arith.constant dense<0.000000e+00> : vector<16x64xf32>
    %118 = tpu.matmul %115, %117, %cst_122 {dimension_numbers = #tpu.dot_dimension_numbers<[1], [0], [0], [1], [0, 0, 1, 1], [], []>} : vector<16x128xbf16>, vector<128x64xbf16>, vector<16x64xf32> -> vector<16x64xf32>
    %119 = arith.addf %113, %118 : vector<16x64xf32>
    %120 = vector.extract_strided_slice %108 {offsets = [2, 0, 0], sizes = [1, 16, 128], strides = [1, 1, 1]} : vector<4x16x128xbf16> to vector<1x16x128xbf16>
    %121 = vector.shape_cast %120 : vector<1x16x128xbf16> to vector<16x128xbf16>
    %c2_123 = arith.constant 2 : index
    %c0_124 = arith.constant 0 : index
    %c0_125 = arith.constant 0 : index
    %122 = vector.load %arg6[%c2_123, %c0_124, %c0_125] : memref<4x128x64xbf16, #tpu.memory_space<vmem>>, vector<1x128x64xbf16>
    %123 = vector.shape_cast %122 : vector<1x128x64xbf16> to vector<128x64xbf16>
    %cst_126 = arith.constant dense<0.000000e+00> : vector<16x64xf32>
    %124 = tpu.matmul %121, %123, %cst_126 {dimension_numbers = #tpu.dot_dimension_numbers<[1], [0], [0], [1], [0, 0, 1, 1], [], []>} : vector<16x128xbf16>, vector<128x64xbf16>, vector<16x64xf32> -> vector<16x64xf32>
    %125 = arith.addf %119, %124 : vector<16x64xf32>
    %126 = vector.extract_strided_slice %108 {offsets = [3, 0, 0], sizes = [1, 16, 128], strides = [1, 1, 1]} : vector<4x16x128xbf16> to vector<1x16x128xbf16>
    %127 = vector.shape_cast %126 : vector<1x16x128xbf16> to vector<16x128xbf16>
    %c3_127 = arith.constant 3 : index
    %c0_128 = arith.constant 0 : index
    %c0_129 = arith.constant 0 : index
    %128 = vector.load %arg6[%c3_127, %c0_128, %c0_129] : memref<4x128x64xbf16, #tpu.memory_space<vmem>>, vector<1x128x64xbf16>
    %129 = vector.shape_cast %128 : vector<1x128x64xbf16> to vector<128x64xbf16>
    %cst_130 = arith.constant dense<0.000000e+00> : vector<16x64xf32>
    %130 = tpu.matmul %127, %129, %cst_130 {dimension_numbers = #tpu.dot_dimension_numbers<[1], [0], [0], [1], [0, 0, 1, 1], [], []>} : vector<16x128xbf16>, vector<128x64xbf16>, vector<16x64xf32> -> vector<16x64xf32>
    %131 = arith.addf %125, %130 : vector<16x64xf32>
    %c0_131 = arith.constant 0 : index
    %c0_132 = arith.constant 0 : index
    %132 = vector.load %arg7[%c0_131, %c0_132] : memref<1x64xf32, #tpu.memory_space<vmem>>, vector<1x64xf32>
    %133 = vector.broadcast %132 : vector<1x64xf32> to vector<16x64xf32>
    %134 = arith.addf %131, %133 : vector<16x64xf32>
    %cst_133 = arith.constant 0.000000e+00 : f32
    %135 = vector.broadcast %cst_133 : f32 to vector<16x64xf32>
    %136 = arith.maximumf %134, %135 : vector<16x64xf32>
    %137 = arith.truncf %136 : vector<16x64xf32> to vector<16x64xbf16>
    %c0_134 = arith.constant 0 : index
    %c0_135 = arith.constant 0 : index
    %138 = vector.load %arg8[%c0_134, %c0_135] : memref<64x128xbf16, #tpu.memory_space<vmem>>, vector<64x128xbf16>
    %cst_136 = arith.constant dense<0.000000e+00> : vector<16x128xf32>
    %139 = tpu.matmul %137, %138, %cst_136 {dimension_numbers = #tpu.dot_dimension_numbers<[1], [0], [0], [1], [0, 0, 1, 1], [], []>} : vector<16x64xbf16>, vector<64x128xbf16>, vector<16x128xf32> -> vector<16x128xf32>
    %c0_137 = arith.constant 0 : index
    %c0_138 = arith.constant 0 : index
    %140 = vector.load %arg9[%c0_137, %c0_138] : memref<1x128xf32, #tpu.memory_space<vmem>>, vector<1x128xf32>
    %141 = vector.broadcast %140 : vector<1x128xf32> to vector<16x128xf32>
    %142 = arith.addf %139, %141 : vector<16x128xf32>
    %c0_139 = arith.constant 0 : index
    %c0_140 = arith.constant 0 : index
    %143 = vector.load %arg10[%c0_139, %c0_140] : memref<16x128xf32, #tpu.memory_space<vmem>>, vector<16x128xf32>
    tpu.vector_store %arg10[%c0_139, %c0_140], %142 {strides = array<i32>} : memref<16x128xf32, #tpu.memory_space<vmem>>, vector<16x128xf32>,
    return
  }
  func.func @transform_0(%arg0: i32) -> (i32, i32, i32) {
    %c0_i32 = arith.constant 0 : i32
    %c0_i32_0 = arith.constant 0 : i32
    %c0_i32_1 = arith.constant 0 : i32
    return %c0_i32, %arg0, %c0_i32_0 : i32, i32, i32
  }
  func.func @transform_1(%arg0: i32) -> (i32, i32, i32) {
    %c0_i32 = arith.constant 0 : i32
    %c0_i32_0 = arith.constant 0 : i32
    %c0_i32_1 = arith.constant 0 : i32
    %c0_i32_2 = arith.constant 0 : i32
    return %c0_i32, %c0_i32_0, %c0_i32_1 : i32, i32, i32
  }
  func.func @transform_2(%arg0: i32) -> (i32, i32, i32) {
    %c0_i32 = arith.constant 0 : i32
    %c0_i32_0 = arith.constant 0 : i32
    %c0_i32_1 = arith.constant 0 : i32
    %c0_i32_2 = arith.constant 0 : i32
    return %c0_i32, %c0_i32_0, %c0_i32_1 : i32, i32, i32
  }
  func.func @transform_3(%arg0: i32) -> (i32, i32, i32) {
    %c0_i32 = arith.constant 0 : i32
    %c0_i32_0 = arith.constant 0 : i32
    %c0_i32_1 = arith.constant 0 : i32
    %c0_i32_2 = arith.constant 0 : i32
    return %c0_i32, %c0_i32_0, %c0_i32_1 : i32, i32, i32
  }
  func.func @transform_4(%arg0: i32) -> (i32, i32, i32) {
    %c0_i32 = arith.constant 0 : i32
    %c0_i32_0 = arith.constant 0 : i32
    %c0_i32_1 = arith.constant 0 : i32
    %c0_i32_2 = arith.constant 0 : i32
    return %c0_i32, %c0_i32_0, %c0_i32_1 : i32, i32, i32
  }
  func.func @transform_5(%arg0: i32) -> (i32, i32, i32) {
    %c0_i32 = arith.constant 0 : i32
    %c0_i32_0 = arith.constant 0 : i32
    %c0_i32_1 = arith.constant 0 : i32
    %c0_i32_2 = arith.constant 0 : i32
    return %c0_i32, %c0_i32_0, %c0_i32_1 : i32, i32, i32
  }
  func.func @transform_6(%arg0: i32) -> (i32, i32) {
    %c0_i32 = arith.constant 0 : i32
    %c0_i32_0 = arith.constant 0 : i32
    %c0_i32_1 = arith.constant 0 : i32
    return %c0_i32, %c0_i32_0 : i32, i32
  }
  func.func @transform_7(%arg0: i32) -> (i32, i32) {
    %c0_i32 = arith.constant 0 : i32
    %c0_i32_0 = arith.constant 0 : i32
    %c0_i32_1 = arith.constant 0 : i32
    return %c0_i32, %c0_i32_0 : i32, i32
  }
  func.func @transform_8(%arg0: i32) -> (i32, i32) {
    %c0_i32 = arith.constant 0 : i32
    %c0_i32_0 = arith.constant 0 : i32
    %c0_i32_1 = arith.constant 0 : i32
    return %c0_i32, %c0_i32_0 : i32, i32
  }
  func.func @transform_9(%arg0: i32) -> (i32, i32) {
    %c0_i32 = arith.constant 0 : i32
    %c0_i32_0 = arith.constant 0 : i32
    return %arg0, %c0_i32 : i32, i32
  }
}

</mosaic_0001>

<bundles_post_ra>
// kernel: lenet5_forward.1
= control target key start
LH: loop header
LB: loop body
LE: loop exit
PB: predicated region body
PF: predicated region fallthrough
CT: control target
= control target key end

     0   :  { %14 = vsyncpa [#allocation6], 0  ;;  %s8116_s30 = smov [#allocation5]   ;;  %s10497_s0 = inlined_call_operand.vmem [shape: bf16[28,16,28], index: 0, kind: input, shape index: {}]   ;;  %s10498_s1 = inlined_call_operand.hbm [shape: bf16[5,28,256], index: 1, kind: input, shape index: {}]   ;;  %s10499_s2 = inlined_call_operand.vmem [shape: f32[1,1,128], index: 2, kind: input, shape index: {}]   ;;  %s10500_s3 = inlined_call_operand.vmem [shape: bf16[5,128,256], index: 3, kind: input, shape index: {}]   ;;  %s10501_s4 = inlined_call_operand.vmem [shape: f32[1,1,128], index: 4, kind: input, shape index: {}]   ;;  %s10502_s5 = inlined_call_operand.vmem [shape: bf16[4,128,64], index: 5, kind: input, shape index: {}]   ;;  %s10503_s6 = inlined_call_operand.vmem [shape: f32[1,64], index: 6, kind: input, shape index: {}]   ;;  %s10504_s7 = inlined_call_operand.vmem [shape: bf16[64,128], index: 7, kind: input, shape index: {}]   ;;  %s10505_s8 = inlined_call_operand.vmem [shape: f32[1,128], index: 8, kind: input, shape index: {}]   ;;  %s10506_s9 = inlined_call_operand.vmem [shape: f32[16,128], index: 9, kind: output, shape index: {}]  }
   0x1   :  { %s22_s10 = sshll.u32 %s8116_s30, 4  ;;  %s23_s10 = int_to_ptr.vmem [resolvable:$true] %s22_s10 }
   0x2   :  { %s8102_s11 = scalar_lea.vmem %s23_s10, 2560  ;;  %p8107_p1 = scmp.lt.s32.totalorder %s23_s10, %s23_s10 }
   0x3   :  { %p8103_p0 = scmp.ne.s32.totalorder %s23_s10, %s8102_s11  ;;  %p8108_p2 = scmp.lt.s32.totalorder %s8102_s11, %s8102_s11 }
   0x5   :  { %p8109_p3 = por %p8108_p2, %p8107_p1 }
   0x7   :  { %p8110_p4 = pnand %p8109_p3, %p8103_p0 }
   0x9   :  { %8113 = shalt.err (!%p8110_p4)
}
   0xa   :  { %s8117_s12 = smov 128   ;;  %s8118_s13 = smov 8  }
   0xb   :  { %28 = dma.hbm_to_vmem [thread:$0]  %s10498_s1, 2560, %s23_s10, [#allocation6], %s8117_s12, %s8117_s12, %s8118_s13  }
   0xc   :  { %8114 = dma.done.wait [#allocation6], 2560  }
   0xd   :  { %8115 = vsyncadd [#allocation6], 4294964736  ;;  %v10507_v0 = vmov 0   ;;  %vm310_vm0 = vcmask 1045504   ;;  %v7750_v3 = vld [vmem:[#allocation5 + $0x4] ss:$8 sps:$4 sm:$0xff]  }
   0xe   :  { %349 = vmatprep.mubr.bf16.mxu0 %v10507_v0  ;;  %579 = vmatprep.mubr.bf16.mxu1 %v10507_v0  ;;  %v7747_v1 = vld [vmem:[#allocation5 + $0x14] ss:$8 sps:$4 sm:$0x3f]   ;;  %v7749_v2 = vld [vmem:[#allocation5 + $0x10] ss:$8 sps:$4 sm:$0x3f]  }
   0xf   :  { %6783 = vmatprep.subr.msk.bf16.mxu0 %vm310_vm0, %v7747_v1  ;;  %7737 = vmatprep.subr.msk.bf16.mxu1 %vm310_vm0, %v7747_v1  ;;  %v312_v4 = vsel %vm310_vm0, %v7749_v2, 0  ;;  %v7752_v5 = vld [vmem:[#allocation5] ss:$8 sps:$4 sm:$0xff]   ;;  %v7754_v7 = vld [vmem:[%s10497_s0 + $0xb8] sm:$0xff]   ;;  %vm237_vm1 = vcmask 228352   ;;  %v7766_v18 = vld [vmem:[%s10497_s0 + $0x10] sm:$0xff]  }
  0x10   :  { %330 = vmatpush1.bf16.msra.mxu0 %v312_v4  ;;  %7739 = vmatpush1.bf16.msra.mxu1 %v312_v4  ;;  %v7753_v6 = vld [vmem:[%s10497_s0] sm:$0xff]   ;;  %v7755_v8 = vld [vmem:[#allocation5 + $0x34] ss:$8 sps:$4 sm:$0x3f]   ;;  %v7764_v16 = vld [vmem:[%s10497_s0 + $0x8] sm:$0xff]   ;;  %vm8121_vm2 = vmmov 0  }
  0x11   :  { %331 = vmatprep.subr.bf16.mxu0 %v7750_v3  ;;  %7738 = vmatprep.subr.bf16.mxu1 %v7750_v3  ;;  %v7757_v9 = vld [vmem:[#allocation5 + $0x54] ss:$8 sps:$4 sm:$0x3f]   ;;  %v7759_v10 = vld [vmem:[#allocation5 + $0x30] ss:$8 sps:$4 sm:$0x3f]  }
  0x12   :  { %v7760_v11 = vld [vmem:[#allocation5 + $0x50] ss:$8 sps:$4 sm:$0x3f]   ;;  %v7763_v12 = vld [vmem:[#allocation5 + $0x24] ss:$8 sps:$4 sm:$0xff]   ;;  %v951_v13 = vsel %vm310_vm0, %v7759_v10, 0 }
  0x13   :  { %v1782_v14 = vsel %vm310_vm0, %v7760_v11, 0  ;;  %v7761_v15 = vld [vmem:[#allocation5 + $0x20] ss:$8 sps:$4 sm:$0xff]   ;;  %v7767_v19 = vld [vmem:[%s10497_s0 + $0x10] sm:$0xff]   ;;  %v7768_v20 = vld [vmem:[%s10497_s0 + $0x18] sm:$0xff]   ;;  %vm6703_vm3 = vcmask 523264  }
  0x14   :  { %332 = vmatpush1.bf16.msra.mxu0 %v7752_v5  ;;  %7740 = vmatpush1.bf16.msra.mxu1 %v7752_v5  ;;  %v7765_v17 = vld [vmem:[%s10497_s0 + $0x8] sm:$0xff]   ;;  %v7769_v21 = vld [vmem:[%s10497_s0 + $0x18] sm:$0xff]   ;;  %v7770_v24 = vld [vmem:[%s10497_s0 + $0x20] sm:$0xff]  }
  0x15   :  { %6884 = vmatprep.subr.msk.bf16.mxu1 %vm310_vm0, %v7755_v8  ;;  %6985 = vmatprep.subr.msk.bf16.mxu0 %vm310_vm0, %v7757_v9  ;;  %v7788_v22 = vld [vmem:[#allocation5 + $0x44] ss:$8 sps:$4 sm:$0xff]   ;;  %v7786_v23 = vld [vmem:[#allocation5 + $0x40] ss:$8 sps:$4 sm:$0xff]   ;;  %v7774_v28 = vld [vmem:[%s10497_s0 + $0x30] sm:$0xff]  }
  0x16   :  { %v7771_v25 = vld [vmem:[%s10497_s0 + $0x20] sm:$0xff]   ;;  %v7772_v26 = vld [vmem:[%s10497_s0 + $0x28] sm:$0xff]   ;;  %v7775_v29 = vld [vmem:[%s10497_s0 + $0x30] sm:$0xff]  }
  0x17   :  { %6784 = vmatmul.mubr.msk.bf16.vlgmr.msra.gmra.mxu0 %vm237_vm1, %v7753_v6  ;;  %6807 = vmatmul.mubr.msk.bf16.vlgmr.msra.gmra.mxu1 %vm237_vm1, %v7754_v7  ;;  %v7773_v27 = vld [vmem:[%s10497_s0 + $0x28] sm:$0xff]   ;;  %v7811_v30 = vld [vmem:[#allocation5 + $0x74] ss:$8 sps:$4 sm:$0x3f]   ;;  %v7778_v36 = vld [vmem:[%s10497_s0 + $0x40] sm:$0xff]  }
  0x18   :  { %969 = vmatpush1.bf16.msra.mxu1 %v951_v13  ;;  %1800 = vmatpush1.bf16.msra.mxu0 %v1782_v14  ;;  %v7813_v31 = vld [vmem:[#allocation5 + $0x70] ss:$8 sps:$4 sm:$0x3f]   ;;  %v7816_v35 = vld [vmem:[#allocation5 + $0x94] ss:$8 sps:$4 sm:$0x3f]  }
  0x19   :  { %970 = vmatprep.subr.bf16.mxu1 %v7763_v12  ;;  %359 = vmatprep.mubr.bf16.mxu0 %v10507_v0  ;;  %v7776_v32 = vld [vmem:[%s10497_s0 + $0x38] sm:$0xff]   ;;  %v2613_v34 = vsel %vm310_vm0, %v7813_v31, 0  ;;  %v7779_v37 = vld [vmem:[%s10497_s0 + $0x40] sm:$0xff]   ;;  %v7780_v38 = vld [vmem:[%s10497_s0 + $0x48] sm:$0xff]  }
  0x1a   :  { %988 = vmatprep.mubr.bf16.mxu1 %v10507_v0  ;;  %1801 = vmatprep.subr.bf16.mxu0 %v7788_v22  ;;  %v7777_v33 = vld [vmem:[%s10497_s0 + $0x38] sm:$0xff]   ;;  %v7781_v39 = vld [vmem:[%s10497_s0 + $0x48] sm:$0xff]   ;;  %v7782_v42 = vld [vmem:[%s10497_s0 + $0x50] sm:$0xff]  }
  0x1b   :  { %v7823_v40 = vld [vmem:[#allocation5 + $0x64] ss:$8 sps:$4 sm:$0xff]   ;;  %v7821_v41 = vld [vmem:[#allocation5 + $0x60] ss:$8 sps:$4 sm:$0xff]   ;;  %v7783_v43 = vld [vmem:[%s10497_s0 + $0x50] sm:$0xff]  }
  0x1c   :  { %971 = vmatpush1.bf16.msra.mxu1 %v7761_v15  ;;  %1802 = vmatpush1.bf16.msra.mxu0 %v7786_v23  ;;  %v7784_v44 = vld [vmem:[%s10497_s0 + $0x58] sm:$0xff]   ;;  %v7789_v46 = vld [vmem:[%s10497_s0 + $0x60] sm:$0xff]   ;;  %v7791_v48 = vld [vmem:[%s10497_s0 + $0x68] sm:$0xff]  }
  0x1d   :  { %7086 = vmatprep.subr.msk.bf16.mxu1 %vm310_vm0, %v7811_v30  ;;  %7187 = vmatprep.subr.msk.bf16.mxu0 %vm310_vm0, %v7816_v35  ;;  %v7785_v45 = vld [vmem:[%s10497_s0 + $0x58] sm:$0xff]   ;;  %v7790_v47 = vld [vmem:[%s10497_s0 + $0x60] sm:$0xff]   ;;  %v7792_v49 = vld [vmem:[%s10497_s0 + $0x68] sm:$0xff]  }
  0x1e   :  { %v7793_v50 = vld [vmem:[%s10497_s0 + $0x70] sm:$0xff]   ;;  %v7795_v52 = vld [vmem:[%s10497_s0 + $0x78] sm:$0xff]   ;;  %v7797_v54 = vld [vmem:[%s10497_s0 + $0x80] sm:$0xff]  }
  0x1f   :  { %6785 = vmatmul.mubr.msk.bf16.gmra.mxu0 %vm237_vm1, %v7764_v16  ;;  %6885 = vmatmul.mubr.msk.bf16.vlgmr.msra.gmra.mxu1 %vm237_vm1, %v7765_v17  ;;  %v7794_v51 = vld [vmem:[%s10497_s0 + $0x70] sm:$0xff]   ;;  %v7796_v53 = vld [vmem:[%s10497_s0 + $0x78] sm:$0xff]   ;;  %v7798_v55 = vld [vmem:[%s10497_s0 + $0x80] sm:$0xff]  }
  0x20   :  { %369 = vmatprep.mubr.bf16.mxu0 %v10507_v0  ;;  %998 = vmatprep.mubr.bf16.mxu1 %v10507_v0  ;;  %v7799_v56 = vld [vmem:[%s10497_s0 + $0x88] sm:$0xff]   ;;  %v7801_v58 = vld [vmem:[%s10497_s0 + $0x90] sm:$0xff]   ;;  %v7803_v60 = vld [vmem:[%s10497_s0 + $0x98] sm:$0xff]  }
  0x21   :  { %2631 = vmatpush1.bf16.msra.mxu1 %v2613_v34  ;;  %v7800_v57 = vld [vmem:[%s10497_s0 + $0x88] sm:$0xff]   ;;  %v7802_v59 = vld [vmem:[%s10497_s0 + $0x90] sm:$0xff]   ;;  %v7804_v61 = vld [vmem:[%s10497_s0 + $0x98] sm:$0xff]  }
  0x22   :  { %2632 = vmatprep.subr.bf16.mxu1 %v7823_v40  ;;  %v7805_v62 = vld [vmem:[%s10497_s0 + $0xa0] sm:$0xff]   ;;  %v7807_v1 = vld [vmem:[%s10497_s0 + $0xa8] sm:$0xff]   ;;  %v7809_v3 = vld [vmem:[%s10497_s0 + $0xb0] sm:$0xff]  }
  0x23   :  { %v7806_v63 = vld [vmem:[%s10497_s0 + $0xa0] sm:$0xff]   ;;  %v7808_v2 = vld [vmem:[%s10497_s0 + $0xa8] sm:$0xff]   ;;  %v7810_v4 = vld [vmem:[%s10497_s0 + $0xb0] sm:$0xff]  }
  0x24   :  { %v7818_v5 = vld [vmem:[#allocation5 + $0x90] ss:$8 sps:$4 sm:$0x3f]   ;;  %v7848_v9 = vld [vmem:[#allocation5 + $0x84] ss:$8 sps:$4 sm:$0xff]  }
  0x25   :  { %2633 = vmatpush1.bf16.msra.mxu1 %v7821_v41  ;;  %v7814_v6 = vld [vmem:[%s10497_s0 + $0xb8] sm:$0xff]   ;;  %v7815_v7 = vld [vmem:[%s10497_s0 + $0x10] sm:$0xff]   ;;  %v3444_v8 = vsel %vm310_vm0, %v7818_v5, 0  ;;  %v7846_v10 = vld [vmem:[#allocation5 + $0x80] ss:$8 sps:$4 sm:$0xff]  }
  0x26   :  { %v7819_v11 = vld [vmem:[%s10497_s0 + $0xc0] sm:$0xff]   ;;  %v7820_v12 = vld [vmem:[%s10497_s0 + $0x18] sm:$0xff]   ;;  %v7826_v31 = vld [vmem:[%s10497_s0 + $0x28] sm:$0xff]  }
  0x27   :  { %6786 = vmatmul.mubr.msk.bf16.gmra.mxu0 %vm237_vm1, %v7766_v18  ;;  %6886 = vmatmul.mubr.msk.bf16.gmra.mxu1 %vm237_vm1, %v7767_v19  ;;  %v7824_v19 = vld [vmem:[%s10497_s0 + $0x20] sm:$0xff]  }
  0x28   :  { %379 = vmatprep.mubr.bf16.mxu0 %v10507_v0  ;;  %1008 = vmatprep.mubr.bf16.mxu1 %v10507_v0 }
  0x2f   :  { %6787 = vmatmul.mubr.msk.bf16.gmra.mxu0 %vm237_vm1, %v7768_v20  ;;  %6887 = vmatmul.mubr.msk.bf16.gmra.mxu1 %vm237_vm1, %v7769_v21  ;;  %v7825_v20 = vld [vmem:[%s10497_s0 + $0x18] sm:$0xff]  }
  0x30   :  { %389 = vmatprep.mubr.bf16.mxu0 %v10507_v0  ;;  %1018 = vmatprep.mubr.bf16.mxu1 %v10507_v0 }
  0x37   :  { %6788 = vmatmul.mubr.msk.bf16.gmra.mxu0 %vm237_vm1, %v7770_v24  ;;  %6888 = vmatmul.mubr.msk.bf16.gmra.mxu1 %vm237_vm1, %v7771_v25 }
  0x38   :  { %399 = vmatprep.mubr.bf16.mxu0 %v10507_v0  ;;  %1028 = vmatprep.mubr.bf16.mxu1 %v10507_v0 }
  0x3f   :  { %6789 = vmatmul.mubr.msk.bf16.gmra.mxu0 %vm237_vm1, %v7772_v26  ;;  %6889 = vmatmul.mubr.msk.bf16.gmra.mxu1 %vm237_vm1, %v7773_v27 }
  0x40   :  { %409 = vmatprep.mubr.bf16.mxu0 %v10507_v0  ;;  %1038 = vmatprep.mubr.bf16.mxu1 %v10507_v0 }
  0x47   :  { %6790 = vmatmul.mubr.msk.bf16.gmra.mxu0 %vm237_vm1, %v7774_v28  ;;  %6890 = vmatmul.mubr.msk.bf16.gmra.mxu1 %vm237_vm1, %v7775_v29 }
  0x48   :  { %419 = vmatprep.mubr.bf16.mxu0 %v10507_v0  ;;  %1048 = vmatprep.mubr.bf16.mxu1 %v10507_v0 }
  0x4f   :  { %6791 = vmatmul.mubr.msk.bf16.gmra.mxu0 %vm237_vm1, %v7776_v32  ;;  %6891 = vmatmul.mubr.msk.bf16.gmra.mxu1 %vm237_vm1, %v7777_v33  ;;  %v7827_v32 = vld [vmem:[%s10497_s0 + $0x20] sm:$0xff]  }
  0x50   :  { %429 = vmatprep.mubr.bf16.mxu0 %v10507_v0  ;;  %1058 = vmatprep.mubr.bf16.mxu1 %v10507_v0 }
  0x57   :  { %6792 = vmatmul.mubr.msk.bf16.gmra.mxu0 %vm237_vm1, %v7778_v36  ;;  %6892 = vmatmul.mubr.msk.bf16.gmra.mxu1 %vm237_vm1, %v7779_v37 }
  0x58   :  { %439 = vmatprep.mubr.bf16.mxu0 %v10507_v0  ;;  %1068 = vmatprep.mubr.bf16.mxu1 %v10507_v0 }
  0x5f   :  { %6793 = vmatmul.mubr.msk.bf16.gmra.mxu0 %vm237_vm1, %v7780_v38  ;;  %6893 = vmatmul.mubr.msk.bf16.gmra.mxu1 %vm237_vm1, %v7781_v39 }
  0x60   :  { %449 = vmatprep.mubr.bf16.mxu0 %v10507_v0  ;;  %1078 = vmatprep.mubr.bf16.mxu1 %v10507_v0 }
  0x67   :  { %6794 = vmatmul.mubr.msk.bf16.gmra.mxu0 %vm237_vm1, %v7782_v42  ;;  %6894 = vmatmul.mubr.msk.bf16.gmra.mxu1 %vm237_vm1, %v7783_v43 }
  0x68   :  { %459 = vmatprep.mubr.bf16.mxu0 %v10507_v0  ;;  %1088 = vmatprep.mubr.bf16.mxu1 %v10507_v0 }
  0x6f   :  { %6795 = vmatmul.mubr.msk.bf16.gmra.mxu0 %vm237_vm1, %v7784_v44  ;;  %6895 = vmatmul.mubr.msk.bf16.gmra.mxu1 %vm237_vm1, %v7785_v45  ;;  %v7828_v45 = vld [vmem:[%s10497_s0 + $0x30] sm:$0xff]  }
  0x70   :  { %469 = vmatprep.mubr.bf16.mxu0 %v10507_v0  ;;  %1098 = vmatprep.mubr.bf16.mxu1 %v10507_v0 }
  0x77   :  { %6796 = vmatmul.mubr.msk.bf16.gmra.mxu0 %vm237_vm1, %v7789_v46  ;;  %6896 = vmatmul.mubr.msk.bf16.gmra.mxu1 %vm237_vm1, %v7790_v47  ;;  %v7829_v46 = vld [vmem:[%s10497_s0 + $0x28] sm:$0xff]  }
  0x78   :  { %479 = vmatprep.mubr.bf16.mxu0 %v10507_v0  ;;  %1108 = vmatprep.mubr.bf16.mxu1 %v10507_v0 }
  0x7f   :  { %6797 = vmatmul.mubr.msk.bf16.gmra.mxu0 %vm237_vm1, %v7791_v48  ;;  %6897 = vmatmul.mubr.msk.bf16.gmra.mxu1 %vm237_vm1, %v7792_v49 }
  0x80   :  { %489 = vmatprep.mubr.bf16.mxu0 %v10507_v0  ;;  %1118 = vmatprep.mubr.bf16.mxu1 %v10507_v0 }
  0x87   :  { %6798 = vmatmul.mubr.msk.bf16.gmra.mxu0 %vm237_vm1, %v7793_v50  ;;  %6898 = vmatmul.mubr.msk.bf16.gmra.mxu1 %vm237_vm1, %v7794_v51 }
  0x88   :  { %499 = vmatprep.mubr.bf16.mxu0 %v10507_v0  ;;  %1128 = vmatprep.mubr.bf16.mxu1 %v10507_v0 }
  0x8f   :  { %6799 = vmatmul.mubr.msk.bf16.gmra.mxu0 %vm237_vm1, %v7795_v52  ;;  %6899 = vmatmul.mubr.msk.bf16.gmra.mxu1 %vm237_vm1, %v7796_v53 }
  0x90   :  { %509 = vmatprep.mubr.bf16.mxu0 %v10507_v0  ;;  %1138 = vmatprep.mubr.bf16.mxu1 %v10507_v0 }
  0x97   :  { %6800 = vmatmul.mubr.msk.bf16.gmra.mxu0 %vm237_vm1, %v7797_v54  ;;  %6900 = vmatmul.mubr.msk.bf16.gmra.mxu1 %vm237_vm1, %v7798_v55 }
  0x98   :  { %519 = vmatprep.mubr.bf16.mxu0 %v10507_v0  ;;  %1148 = vmatprep.mubr.bf16.mxu1 %v10507_v0 }
  0x9f   :  { %6801 = vmatmul.mubr.msk.bf16.gmra.mxu0 %vm237_vm1, %v7799_v56  ;;  %6901 = vmatmul.mubr.msk.bf16.gmra.mxu1 %vm237_vm1, %v7800_v57 }
  0xa0   :  { %529 = vmatprep.mubr.bf16.mxu0 %v10507_v0  ;;  %1158 = vmatprep.mubr.bf16.mxu1 %v10507_v0 }
  0xa7   :  { %6802 = vmatmul.mubr.msk.bf16.gmra.mxu0 %vm237_vm1, %v7801_v58  ;;  %6902 = vmatmul.mubr.msk.bf16.gmra.mxu1 %vm237_vm1, %v7802_v59  ;;  %v7830_v59 = vld [vmem:[%s10497_s0 + $0x38] sm:$0xff]  }
  0xa8   :  { %539 = vmatprep.mubr.bf16.mxu0 %v10507_v0  ;;  %1168 = vmatprep.mubr.bf16.mxu1 %v10507_v0 }
  0xaf   :  { %6803 = vmatmul.mubr.msk.bf16.gmra.mxu0 %vm237_vm1, %v7803_v60  ;;  %6903 = vmatmul.mubr.msk.bf16.gmra.mxu1 %vm237_vm1, %v7804_v61  ;;  %v7831_v60 = vld [vmem:[%s10497_s0 + $0x30] sm:$0xff]  }
  0xb0   :  { %549 = vmatprep.mubr.bf16.mxu0 %v10507_v0  ;;  %1178 = vmatprep.mubr.bf16.mxu1 %v10507_v0 }
  0xb7   :  { %6804 = vmatmul.mubr.msk.bf16.gmra.mxu0 %vm237_vm1, %v7805_v62  ;;  %6904 = vmatmul.mubr.msk.bf16.gmra.mxu1 %vm237_vm1, %v7806_v63 }
  0xb8   :  { %559 = vmatprep.mubr.bf16.mxu0 %v10507_v0  ;;  %1188 = vmatprep.mubr.bf16.mxu1 %v10507_v0 }
  0xbf   :  { %6805 = vmatmul.mubr.msk.bf16.gmra.mxu0 %vm237_vm1, %v7807_v1  ;;  %6905 = vmatmul.mubr.msk.bf16.gmra.mxu1 %vm237_vm1, %v7808_v2 }
  0xc0   :  { %569 = vmatprep.mubr.bf16.mxu0 %v10507_v0  ;;  %1198 = vmatprep.mubr.bf16.mxu1 %v10507_v0 }
  0xc7   :  { %6806 = vmatmul.mubr.msk.bf16.gmra.mxu0 %vm237_vm1, %v7809_v3  ;;  %6906 = vmatmul.mubr.msk.bf16.gmra.mxu1 %vm237_vm1, %v7810_v4 }
  0xc8   :  { %1208 = vmatprep.mubr.bf16.mxu1 %v10507_v0  ;;  %1819 = vmatprep.mubr.bf16.mxu0 %v10507_v0 }
  0xcf   :  { %6907 = vmatmul.mubr.msk.bf16.gmra.mxu1 %vm237_vm1, %v7814_v6  ;;  %6986 = vmatmul.mubr.msk.bf16.vlgmr.msra.gmra.mxu0 %vm237_vm1, %v7815_v7 }
  0xd0   :  { %3462 = vmatpush1.bf16.msra.mxu0 %v3444_v8  ;;  %1218 = vmatprep.mubr.bf16.mxu1 %v10507_v0 }
  0xd1   :  { %1829 = vmatprep.mubr.bf16.mxu0 %v10507_v0  ;;  %3463 = vmatprep.subr.bf16.mxu0 %v7848_v9 }
  0xd4   :  { %3464 = vmatpush1.bf16.msra.mxu0 %v7846_v10  ;;  %v7832_v10 = vld [vmem:[%s10497_s0 + $0x40] sm:$0xff]  }
  0xd7   :  { %v351_v13 = vpop.f32.mrf.mxu0  ;;  %v8434_v14 = vpop.f32.mrf.mxu1  ;;  %6908 = vmatmul.mubr.msk.bf16.gmra.mxu1 %vm237_vm1, %v7819_v11  ;;  %6987 = vmatmul.mubr.msk.bf16.gmra.mxu0 %vm237_vm1, %v7820_v12  ;;  %v7833_v11 = vld [vmem:[%s10497_s0 + $0x38] sm:$0xff]  }
  0xd8   :  { %10511 = vst [vmem:[#allocation8_spill] sm:$0xff] %v8434_v14  ;;  %1839 = vmatprep.mubr.bf16.mxu0 %v10507_v0  ;;  %2650 = vmatprep.mubr.bf16.mxu1 %v10507_v0 }
  0xd9   :  { %v353_v15 = vpop.f32.mrf.mxu0  ;;  %v8440_v16 = vpop.f32.mrf.mxu1 }
  0xda   :  { %10512 = vst [vmem:[#allocation9_spill] sm:$0xff] %v8440_v16 }
  0xdb   :  { %v355_v17 = vpop.f32.mrf.mxu0  ;;  %v8442_v18 = vpop.f32.mrf.mxu1 }
  0xdc   :  { %10513 = vst [vmem:[#allocation10_spill] sm:$0xff] %v8442_v18 }
  0xdd   :  { %v357_v21 = vpop.f32.mrf.mxu0  ;;  %v8450_v22 = vpop.f32.mrf.mxu1 }
  0xde   :  { %10514 = vst [vmem:[#allocation11_spill] sm:$0xff] %v8450_v22 }
  0xdf   :  { %v361_v23 = vpop.f32.mrf.mxu0  ;;  %v990_v24 = vpop.f32.mrf.mxu1  ;;  %6988 = vmatmul.mubr.msk.bf16.gmra.mxu0 %vm237_vm1, %v7824_v19  ;;  %7087 = vmatmul.mubr.msk.bf16.vlgmr.msra.gmra.mxu1 %vm237_vm1, %v7825_v20 }
  0xe0   :  { %v8454_v25 = vadd.f32 %v990_v24, %v351_v13  ;;  %1849 = vmatprep.mubr.bf16.mxu0 %v10507_v0  ;;  %2660 = vmatprep.mubr.bf16.mxu1 %v10507_v0 }
  0xe1   :  { %v363_v26 = vpop.f32.mrf.mxu0  ;;  %v992_v27 = vpop.f32.mrf.mxu1 }
  0xe2   :  { %v8458_v28 = vadd.f32 %v992_v27, %v353_v15 }
  0xe3   :  { %v365_v29 = vpop.f32.mrf.mxu0  ;;  %v994_v30 = vpop.f32.mrf.mxu1 }
  0xe4   :  { %v8466_v33 = vadd.f32 %v994_v30, %v355_v17  ;;  %v7834_v30 = vld [vmem:[%s10497_s0 + $0x48] sm:$0xff]  }
  0xe5   :  { %v367_v34 = vpop.f32.mrf.mxu0  ;;  %v996_v35 = vpop.f32.mrf.mxu1 }
  0xe6   :  { %v8468_v36 = vadd.f32 %v996_v35, %v357_v21 }
  0xe7   :  { %v371_v37 = vpop.f32.mrf.mxu0  ;;  %v1000_v38 = vpop.f32.mrf.mxu1  ;;  %6989 = vmatmul.mubr.msk.bf16.gmra.mxu0 %vm237_vm1, %v7826_v31  ;;  %7088 = vmatmul.mubr.msk.bf16.gmra.mxu1 %vm237_vm1, %v7827_v32  ;;  %v7835_v31 = vld [vmem:[%s10497_s0 + $0x40] sm:$0xff]  }
  0xe8   :  { %v8472_v39 = vadd.f32 %v1000_v38, %v361_v23  ;;  %1859 = vmatprep.mubr.bf16.mxu0 %v10507_v0  ;;  %2670 = vmatprep.mubr.bf16.mxu1 %v10507_v0 }
  0xe9   :  { %v373_v40 = vpop.f32.mrf.mxu0  ;;  %v1002_v41 = vpop.f32.mrf.mxu1 }
  0xea   :  { %v8476_v42 = vadd.f32 %v1002_v41, %v363_v26 }
  0xeb   :  { %v375_v43 = vpop.f32.mrf.mxu0  ;;  %v1004_v44 = vpop.f32.mrf.mxu1 }
  0xec   :  { %v8484_v47 = vadd.f32 %v1004_v44, %v365_v29 }
  0xed   :  { %v377_v48 = vpop.f32.mrf.mxu0  ;;  %v1006_v49 = vpop.f32.mrf.mxu1 }
  0xee   :  { %v8486_v50 = vadd.f32 %v1006_v49, %v367_v34  ;;  %v7836_v49 = vld [vmem:[%s10497_s0 + $0x50] sm:$0xff]  }
  0xef   :  { %v381_v51 = vpop.f32.mrf.mxu0  ;;  %v1010_v52 = vpop.f32.mrf.mxu1  ;;  %6990 = vmatmul.mubr.msk.bf16.gmra.mxu0 %vm237_vm1, %v7828_v45  ;;  %7089 = vmatmul.mubr.msk.bf16.gmra.mxu1 %vm237_vm1, %v7829_v46 }
  0xf0   :  { %v8490_v53 = vadd.f32 %v1010_v52, %v371_v37  ;;  %1869 = vmatprep.mubr.bf16.mxu0 %v10507_v0  ;;  %2680 = vmatprep.mubr.bf16.mxu1 %v10507_v0 }
  0xf1   :  { %v383_v54 = vpop.f32.mrf.mxu0  ;;  %v1012_v55 = vpop.f32.mrf.mxu1 }
  0xf2   :  { %v8494_v56 = vadd.f32 %v1012_v55, %v373_v40 }
  0xf3   :  { %v385_v57 = vpop.f32.mrf.mxu0  ;;  %v1014_v58 = vpop.f32.mrf.mxu1 }
  0xf4   :  { %v8502_v61 = vadd.f32 %v1014_v58, %v375_v43 }
  0xf5   :  { %v387_v62 = vpop.f32.mrf.mxu0  ;;  %v1016_v63 = vpop.f32.mrf.mxu1 }
  0xf6   :  { %v8504_v1 = vadd.f32 %v1016_v63, %v377_v48 }
  0xf7   :  { %v391_v2 = vpop.f32.mrf.mxu0  ;;  %v1020_v3 = vpop.f32.mrf.mxu1  ;;  %6991 = vmatmul.mubr.msk.bf16.gmra.mxu0 %vm237_vm1, %v7830_v59  ;;  %7090 = vmatmul.mubr.msk.bf16.gmra.mxu1 %vm237_vm1, %v7831_v60 }
  0xf8   :  { %v8508_v4 = vadd.f32 %v1020_v3, %v381_v51  ;;  %1879 = vmatprep.mubr.bf16.mxu0 %v10507_v0  ;;  %2690 = vmatprep.mubr.bf16.mxu1 %v10507_v0  ;;  %v7837_v51 = vld [vmem:[%s10497_s0 + $0x48] sm:$0xff]  }
  0xf9   :  { %v393_v5 = vpop.f32.mrf.mxu0  ;;  %v1022_v6 = vpop.f32.mrf.mxu1 }
  0xfa   :  { %v8512_v7 = vadd.f32 %v1022_v6, %v383_v54  ;;  %v7838_v6 = vld [vmem:[%s10497_s0 + $0x58] sm:$0xff]  }
  0xfb   :  { %v395_v8 = vpop.f32.mrf.mxu0  ;;  %v1024_v9 = vpop.f32.mrf.mxu1 }
  0xfc   :  { %v8520_v12 = vadd.f32 %v1024_v9, %v385_v57 }
  0xfd   :  { %v397_v13 = vpop.f32.mrf.mxu0  ;;  %v1026_v15 = vpop.f32.mrf.mxu1 }
  0xfe   :  { %v8522_v17 = vadd.f32 %v1026_v15, %v387_v62 }
  0xff   :  { %v401_v19 = vpop.f32.mrf.mxu0  ;;  %v1030_v20 = vpop.f32.mrf.mxu1  ;;  %6992 = vmatmul.mubr.msk.bf16.gmra.mxu0 %vm237_vm1, %v7832_v10  ;;  %7091 = vmatmul.mubr.msk.bf16.gmra.mxu1 %vm237_vm1, %v7833_v11 }
 0x100   :  { %v8526_v21 = vadd.f32 %v1030_v20, %v391_v2  ;;  %1889 = vmatprep.mubr.bf16.mxu0 %v10507_v0  ;;  %2700 = vmatprep.mubr.bf16.mxu1 %v10507_v0 }
 0x101   :  { %v403_v23 = vpop.f32.mrf.mxu0  ;;  %v1032_v24 = vpop.f32.mrf.mxu1 }
 0x102   :  { %v8530_v26 = vadd.f32 %v1032_v24, %v393_v5 }
 0x103   :  { %v405_v27 = vpop.f32.mrf.mxu0  ;;  %v1034_v29 = vpop.f32.mrf.mxu1 }
 0x104   :  { %v8538_v32 = vadd.f32 %v1034_v29, %v395_v8  ;;  %v7839_v8 = vld [vmem:[%s10497_s0 + $0x50] sm:$0xff]  }
 0x105   :  { %v407_v34 = vpop.f32.mrf.mxu0  ;;  %v1036_v35 = vpop.f32.mrf.mxu1 }
 0x106   :  { %v8540_v37 = vadd.f32 %v1036_v35, %v397_v13 }
 0x107   :  { %v411_v38 = vpop.f32.mrf.mxu0  ;;  %v1040_v40 = vpop.f32.mrf.mxu1  ;;  %6993 = vmatmul.mubr.msk.bf16.gmra.mxu0 %vm237_vm1, %v7834_v30  ;;  %7092 = vmatmul.mubr.msk.bf16.gmra.mxu1 %vm237_vm1, %v7835_v31  ;;  %v7840_v31 = vld [vmem:[%s10497_s0 + $0x60] sm:$0xff]  }
 0x108   :  { %v8544_v41 = vadd.f32 %v1040_v40, %v401_v19  ;;  %1899 = vmatprep.mubr.bf16.mxu0 %v10507_v0  ;;  %2710 = vmatprep.mubr.bf16.mxu1 %v10507_v0 }
 0x109   :  { %v413_v43 = vpop.f32.mrf.mxu0  ;;  %v1042_v44 = vpop.f32.mrf.mxu1 }
 0x10a   :  { %v8548_v45 = vadd.f32 %v1042_v44, %v403_v23 }
 0x10b   :  { %v415_v46 = vpop.f32.mrf.mxu0  ;;  %v1044_v48 = vpop.f32.mrf.mxu1 }
 0x10c   :  { %v8556_v52 = vadd.f32 %v1044_v48, %v405_v27 }
 0x10d   :  { %v417_v54 = vpop.f32.mrf.mxu0  ;;  %v1046_v55 = vpop.f32.mrf.mxu1 }
 0x10e   :  { %v8558_v57 = vadd.f32 %v1046_v55, %v407_v34  ;;  %v7841_v34 = vld [vmem:[%s10497_s0 + $0x58] sm:$0xff]  }
 0x10f   :  { %v421_v58 = vpop.f32.mrf.mxu0  ;;  %v1050_v59 = vpop.f32.mrf.mxu1  ;;  %6994 = vmatmul.mubr.msk.bf16.gmra.mxu0 %vm237_vm1, %v7836_v49  ;;  %7093 = vmatmul.mubr.msk.bf16.gmra.mxu1 %vm237_vm1, %v7837_v51 }
 0x110   :  { %v8562_v60 = vadd.f32 %v1050_v59, %v411_v38  ;;  %1909 = vmatprep.mubr.bf16.mxu0 %v10507_v0  ;;  %2720 = vmatprep.mubr.bf16.mxu1 %v10507_v0  ;;  %v7842_v59 = vld [vmem:[%s10497_s0 + $0x68] sm:$0xff]  }
 0x111   :  { %v423_v62 = vpop.f32.mrf.mxu0  ;;  %v1052_v63 = vpop.f32.mrf.mxu1 }
 0x112   :  { %v8566_v2 = vadd.f32 %v1052_v63, %v413_v43 }
 0x113   :  { %v425_v3 = vpop.f32.mrf.mxu0  ;;  %v1054_v5 = vpop.f32.mrf.mxu1 }
 0x114   :  { %v8574_v9 = vadd.f32 %v1054_v5, %v415_v46 }
 0x115   :  { %v427_v10 = vpop.f32.mrf.mxu0  ;;  %v1056_v11 = vpop.f32.mrf.mxu1 }
 0x116   :  { %v8576_v13 = vadd.f32 %v1056_v11, %v417_v54 }
 0x117   :  { %v431_v15 = vpop.f32.mrf.mxu0  ;;  %v1060_v19 = vpop.f32.mrf.mxu1  ;;  %6995 = vmatmul.mubr.msk.bf16.gmra.mxu0 %vm237_vm1, %v7838_v6  ;;  %7094 = vmatmul.mubr.msk.bf16.gmra.mxu1 %vm237_vm1, %v7839_v8 }
 0x118   :  { %v8580_v20 = vadd.f32 %v1060_v19, %v421_v58  ;;  %1919 = vmatprep.mubr.bf16.mxu0 %v10507_v0  ;;  %2730 = vmatprep.mubr.bf16.mxu1 %v10507_v0 }
 0x119   :  { %v433_v23 = vpop.f32.mrf.mxu0  ;;  %v1062_v24 = vpop.f32.mrf.mxu1 }
 0x11a   :  { %v8584_v27 = vadd.f32 %v1062_v24, %v423_v62  ;;  %v7843_v62 = vld [vmem:[%s10497_s0 + $0x60] sm:$0xff]  }
 0x11b   :  { %v435_v29 = vpop.f32.mrf.mxu0  ;;  %v1064_v30 = vpop.f32.mrf.mxu1 }
 0x11c   :  { %v8592_v35 = vadd.f32 %v1064_v30, %v425_v3  ;;  %v7844_v30 = vld [vmem:[%s10497_s0 + $0x70] sm:$0xff]  }
 0x11d   :  { %v437_v38 = vpop.f32.mrf.mxu0  ;;  %v1066_v40 = vpop.f32.mrf.mxu1 }
 0x11e   :  { %v8594_v43 = vadd.f32 %v1066_v40, %v427_v10 }
 0x11f   :  { %v441_v44 = vpop.f32.mrf.mxu0  ;;  %v1070_v46 = vpop.f32.mrf.mxu1  ;;  %6996 = vmatmul.mubr.msk.bf16.gmra.mxu0 %vm237_vm1, %v7840_v31  ;;  %7095 = vmatmul.mubr.msk.bf16.gmra.mxu1 %vm237_vm1, %v7841_v34  ;;  %v7845_v31 = vld [vmem:[%s10497_s0 + $0x68] sm:$0xff]  }
 0x120   :  { %v8598_v48 = vadd.f32 %v1070_v46, %v431_v15  ;;  %1929 = vmatprep.mubr.bf16.mxu0 %v10507_v0  ;;  %2740 = vmatprep.mubr.bf16.mxu1 %v10507_v0 }
 0x121   :  { %v443_v49 = vpop.f32.mrf.mxu0  ;;  %v1072_v51 = vpop.f32.mrf.mxu1 }
 0x122   :  { %v8602_v54 = vadd.f32 %v1072_v51, %v433_v23 }
 0x123   :  { %v445_v55 = vpop.f32.mrf.mxu0  ;;  %v1074_v58 = vpop.f32.mrf.mxu1 }
 0x124   :  { %v8610_v63 = vadd.f32 %v1074_v58, %v435_v29 }
 0x125   :  { %v447_v3 = vpop.f32.mrf.mxu0  ;;  %v1076_v5 = vpop.f32.mrf.mxu1 }
 0x126   :  { %v8612_v6 = vadd.f32 %v1076_v5, %v437_v38 }
 0x127   :  { %v451_v8 = vpop.f32.mrf.mxu0  ;;  %v1080_v10 = vpop.f32.mrf.mxu1  ;;  %6997 = vmatmul.mubr.msk.bf16.gmra.mxu0 %vm237_vm1, %v7842_v59  ;;  %7096 = vmatmul.mubr.msk.bf16.gmra.mxu1 %vm237_vm1, %v7843_v62 }
 0x128   :  { %v8616_v11 = vadd.f32 %v1080_v10, %v441_v44  ;;  %1939 = vmatprep.mubr.bf16.mxu0 %v10507_v0  ;;  %2750 = vmatprep.mubr.bf16.mxu1 %v10507_v0  ;;  %v7850_v10 = vld [vmem:[%s10497_s0 + $0x70] sm:$0xff]  }
 0x129   :  { %v453_v15 = vpop.f32.mrf.mxu0  ;;  %v1082_v19 = vpop.f32.mrf.mxu1 }
 0x12a   :  { %v8620_v23 = vadd.f32 %v1082_v19, %v443_v49 }
 0x12b   :  { %v455_v24 = vpop.f32.mrf.mxu0  ;;  %v1084_v29 = vpop.f32.mrf.mxu1 }
 0x12c   :  { %v8628_v34 = vadd.f32 %v1084_v29, %v445_v55 }
 0x12d   :  { %v457_v38 = vpop.f32.mrf.mxu0  ;;  %v1086_v40 = vpop.f32.mrf.mxu1 }
 0x12e   :  { %v8630_v44 = vadd.f32 %v1086_v40, %v447_v3  ;;  %v7849_v3 = vld [vmem:[%s10497_s0 + $0x78] sm:$0xff]  }
 0x12f   :  { %v461_v46 = vpop.f32.mrf.mxu0  ;;  %v1090_v51 = vpop.f32.mrf.mxu1  ;;  %6998 = vmatmul.mubr.msk.bf16.gmra.mxu0 %vm237_vm1, %v7844_v30  ;;  %7097 = vmatmul.mubr.msk.bf16.gmra.mxu1 %vm237_vm1, %v7845_v31 }
 0x130   :  { %v8634_v49 = vadd.f32 %v1090_v51, %v451_v8  ;;  %1949 = vmatprep.mubr.bf16.mxu0 %v10507_v0  ;;  %2760 = vmatprep.mubr.bf16.mxu1 %v10507_v0 }
 0x131   :  { %v463_v58 = vpop.f32.mrf.mxu0  ;;  %v1092_v59 = vpop.f32.mrf.mxu1 }
 0x132   :  { %v8638_v55 = vadd.f32 %v1092_v59, %v453_v15 }
 0x133   :  { %v465_v62 = vpop.f32.mrf.mxu0  ;;  %v1094_v5 = vpop.f32.mrf.mxu1 }
 0x134   :  { %v8646_v8 = vadd.f32 %v1094_v5, %v455_v24 }
 0x135   :  { %v467_v19 = vpop.f32.mrf.mxu0  ;;  %v1096_v29 = vpop.f32.mrf.mxu1 }
 0x136   :  { %v8648_v30 = vadd.f32 %v1096_v29, %v457_v38  ;;  %v7851_v38 = vld [vmem:[%s10497_s0 + $0x80] sm:$0xff]  }
 0x137   :  { %v471_v31 = vpop.f32.mrf.mxu0  ;;  %v1100_v40 = vpop.f32.mrf.mxu1  ;;  %6999 = vmatmul.mubr.msk.bf16.gmra.mxu0 %vm237_vm1, %v7849_v3  ;;  %7098 = vmatmul.mubr.msk.bf16.gmra.mxu1 %vm237_vm1, %v7850_v10  ;;  %v7852_v3 = vld [vmem:[%s10497_s0 + $0x78] sm:$0xff]  }
 0x138   :  { %v8652_v15 = vadd.f32 %v1100_v40, %v461_v46  ;;  %1959 = vmatprep.mubr.bf16.mxu0 %v10507_v0  ;;  %2770 = vmatprep.mubr.bf16.mxu1 %v10507_v0 }
 0x139   :  { %v473_v51 = vpop.f32.mrf.mxu0  ;;  %v1102_v59 = vpop.f32.mrf.mxu1 }
 0x13a   :  { %v8656_v24 = vadd.f32 %v1102_v59, %v463_v58  ;;  %v10518_v59 = vmov 0  }
 0x13b   :  { %v475_v5 = vpop.f32.mrf.mxu0  ;;  %v1104_v22 = vpop.f32.mrf.mxu1 }
 0x13c   :  { %v8664_v46 = vadd.f32 %v1104_v22, %v465_v62 }
 0x13d   :  { %v477_v10 = vpop.f32.mrf.mxu0  ;;  %v1106_v29 = vpop.f32.mrf.mxu1 }
 0x13e   :  { %10515 = vst [vmem:[#allocation12_spill] sm:$0xff] %v8664_v46  ;;  %v8666_v40 = vadd.f32 %v1106_v29, %v467_v19  ;;  %v7853_v19 = vld [vmem:[%s10497_s0 + $0x88] sm:$0xff]  }
 0x13f   :  { %v481_v0 = vpop.f32.mrf.mxu0  ;;  %v1110_v18 = vpop.f32.mrf.mxu1  ;;  %7000 = vmatmul.mubr.msk.bf16.gmra.mxu0 %vm237_vm1, %v7851_v38  ;;  %7099 = vmatmul.mubr.msk.bf16.gmra.mxu1 %vm237_vm1, %v7852_v3  ;;  %v7854_v38 = vld [vmem:[%s10497_s0 + $0x80] sm:$0xff]  }
 0x140   :  { %10516 = vst [vmem:[#allocation13_spill] sm:$0xff] %v8666_v40  ;;  %v8670_v58 = vadd.f32 %v1110_v18, %v471_v31  ;;  %1969 = vmatprep.mubr.bf16.mxu0 %v10518_v59  ;;  %2780 = vmatprep.mubr.bf16.mxu1 %v10518_v59 }
 0x141   :  { %v483_v16 = vpop.f32.mrf.mxu0  ;;  %v1112_v14 = vpop.f32.mrf.mxu1 }
 0x142   :  { %10517 = vst [vmem:[#allocation14_spill] sm:$0xff] %v8670_v58  ;;  %v8674_v22 = vadd.f32 %v1112_v14, %v473_v51 }
 0x143   :  { %v485_v62 = vpop.f32.mrf.mxu0  ;;  %v1114_v46 = vpop.f32.mrf.mxu1 }
 0x144   :  { %10519 = vst [vmem:[#allocation15_spill] sm:$0xff] %v8674_v22  ;;  %v8682_v18 = vadd.f32 %v1114_v46, %v475_v5 }
 0x145   :  { %v487_v31 = vpop.f32.mrf.mxu0  ;;  %v1116_v3 = vpop.f32.mrf.mxu1 }
 0x146   :  { %10520 = vst [vmem:[#allocation16_spill] sm:$0xff] %v8682_v18  ;;  %v8684_v29 = vadd.f32 %v1116_v3, %v477_v10  ;;  %v7855_v10 = vld [vmem:[%s10497_s0 + $0x90] sm:$0xff]  }
 0x147   :  { %v491_v58 = vpop.f32.mrf.mxu0  ;;  %v1120_v40 = vpop.f32.mrf.mxu1  ;;  %7001 = vmatmul.mubr.msk.bf16.gmra.mxu0 %vm237_vm1, %v7853_v19  ;;  %7100 = vmatmul.mubr.msk.bf16.gmra.mxu1 %vm237_vm1, %v7854_v38  ;;  %v7856_v19 = vld [vmem:[%s10497_s0 + $0x88] sm:$0xff]  }
 0x148   :  { %10521 = vst [vmem:[#allocation17_spill] sm:$0xff] %v8684_v29  ;;  %v8688_v14 = vadd.f32 %v1120_v40, %v481_v0  ;;  %1979 = vmatprep.mubr.bf16.mxu0 %v10518_v59  ;;  %2790 = vmatprep.mubr.bf16.mxu1 %v10518_v59 }
 0x149   :  { %v493_v51 = vpop.f32.mrf.mxu0  ;;  %v1122_v22 = vpop.f32.mrf.mxu1 }
 0x14a   :  { %10522 = vst [vmem:[#allocation18_spill] sm:$0xff] %v8688_v14  ;;  %v8692_v5 = vadd.f32 %v1122_v22, %v483_v16 }
 0x14b   :  { %v495_v46 = vpop.f32.mrf.mxu0  ;;  %v1124_v18 = vpop.f32.mrf.mxu1 }
 0x14c   :  { %10523 = vst [vmem:[#allocation19_spill] sm:$0xff] %v8692_v5  ;;  %v8700_v0 = vadd.f32 %v1124_v18, %v485_v62 }
 0x14d   :  { %v497_v40 = vpop.f32.mrf.mxu0  ;;  %v1126_v38 = vpop.f32.mrf.mxu1 }
 0x14e   :  { %10524 = vst [vmem:[#allocation20_spill] sm:$0xff] %v8700_v0  ;;  %v8702_v3 = vadd.f32 %v1126_v38, %v487_v31  ;;  %v7857_v31 = vld [vmem:[%s10497_s0 + $0x98] sm:$0xff]  }
 0x14f   :  { %v501_v14 = vpop.f32.mrf.mxu0  ;;  %v1130_v29 = vpop.f32.mrf.mxu1  ;;  %7002 = vmatmul.mubr.msk.bf16.gmra.mxu0 %vm237_vm1, %v7855_v10  ;;  %7101 = vmatmul.mubr.msk.bf16.gmra.mxu1 %vm237_vm1, %v7856_v19  ;;  %v7858_v10 = vld [vmem:[%s10497_s0 + $0x90] sm:$0xff]  }
 0x150   :  { %10525 = vst [vmem:[#allocation21_spill] sm:$0xff] %v8702_v3  ;;  %v8706_v16 = vadd.f32 %v1130_v29, %v491_v58  ;;  %1989 = vmatprep.mubr.bf16.mxu0 %v10518_v59  ;;  %2800 = vmatprep.mubr.bf16.mxu1 %v10518_v59 }
 0x151   :  { %v503_v22 = vpop.f32.mrf.mxu0  ;;  %v1132_v5 = vpop.f32.mrf.mxu1 }
 0x152   :  { %10526 = vst [vmem:[#allocation22_spill] sm:$0xff] %v8706_v16  ;;  %v8710_v62 = vadd.f32 %v1132_v5, %v493_v51 }
 0x153   :  { %v505_v18 = vpop.f32.mrf.mxu0  ;;  %v1134_v0 = vpop.f32.mrf.mxu1 }
 0x154   :  { %10527 = vst [vmem:[#allocation23_spill] sm:$0xff] %v8710_v62  ;;  %v8718_v58 = vadd.f32 %v1134_v0, %v495_v46 }
 0x155   :  { %v507_v29 = vpop.f32.mrf.mxu0  ;;  %v1136_v19 = vpop.f32.mrf.mxu1 }
 0x156   :  { %10528 = vst [vmem:[#allocation24_spill] sm:$0xff] %v8718_v58  ;;  %v8720_v38 = vadd.f32 %v1136_v19, %v497_v40  ;;  %v7859_v40 = vld [vmem:[%s10497_s0 + $0xa0] sm:$0xff]  }
 0x157   :  { %v511_v16 = vpop.f32.mrf.mxu0  ;;  %v1140_v3 = vpop.f32.mrf.mxu1  ;;  %7003 = vmatmul.mubr.msk.bf16.gmra.mxu0 %vm237_vm1, %v7857_v31  ;;  %7102 = vmatmul.mubr.msk.bf16.gmra.mxu1 %vm237_vm1, %v7858_v10  ;;  %v7860_v31 = vld [vmem:[%s10497_s0 + $0x98] sm:$0xff]  }
 0x158   :  { %10529 = vst [vmem:[#allocation25_spill] sm:$0xff] %v8720_v38  ;;  %v8724_v51 = vadd.f32 %v1140_v3, %v501_v14  ;;  %1999 = vmatprep.mubr.bf16.mxu0 %v10518_v59  ;;  %2810 = vmatprep.mubr.bf16.mxu1 %v10518_v59 }
 0x159   :  { %v513_v5 = vpop.f32.mrf.mxu0  ;;  %v1142_v62 = vpop.f32.mrf.mxu1 }
 0x15a   :  { %10530 = vst [vmem:[#allocation26_spill] sm:$0xff] %v8724_v51  ;;  %v8728_v46 = vadd.f32 %v1142_v62, %v503_v22 }
 0x15b   :  { %v515_v0 = vpop.f32.mrf.mxu0  ;;  %v1144_v58 = vpop.f32.mrf.mxu1 }
 0x15c   :  { %10531 = vst [vmem:[#allocation27_spill] sm:$0xff] %v8728_v46  ;;  %v8736_v14 = vadd.f32 %v1144_v58, %v505_v18 }
 0x15d   :  { %v517_v3 = vpop.f32.mrf.mxu0  ;;  %v1146_v10 = vpop.f32.mrf.mxu1 }
 0x15e   :  { %10532 = vst [vmem:[#allocation28_spill] sm:$0xff] %v8736_v14  ;;  %v8738_v19 = vadd.f32 %v1146_v10, %v507_v29  ;;  %v7861_v29 = vld [vmem:[%s10497_s0 + $0xa8] sm:$0xff]  }
 0x15f   :  { %v521_v51 = vpop.f32.mrf.mxu0  ;;  %v1150_v38 = vpop.f32.mrf.mxu1  ;;  %7004 = vmatmul.mubr.msk.bf16.gmra.mxu0 %vm237_vm1, %v7859_v40  ;;  %7103 = vmatmul.mubr.msk.bf16.gmra.mxu1 %vm237_vm1, %v7860_v31  ;;  %v7862_v40 = vld [vmem:[%s10497_s0 + $0xa0] sm:$0xff]  }
 0x160   :  { %10533 = vst [vmem:[#allocation29_spill] sm:$0xff] %v8738_v19  ;;  %v8742_v22 = vadd.f32 %v1150_v38, %v511_v16  ;;  %2009 = vmatprep.mubr.bf16.mxu0 %v10518_v59  ;;  %2820 = vmatprep.mubr.bf16.mxu1 %v10518_v59 }
 0x161   :  { %v523_v62 = vpop.f32.mrf.mxu0  ;;  %v1152_v46 = vpop.f32.mrf.mxu1 }
 0x162   :  { %10534 = vst [vmem:[#allocation30_spill] sm:$0xff] %v8742_v22  ;;  %v8746_v18 = vadd.f32 %v1152_v46, %v513_v5 }
 0x163   :  { %v525_v58 = vpop.f32.mrf.mxu0  ;;  %v1154_v14 = vpop.f32.mrf.mxu1 }
 0x164   :  { %10535 = vst [vmem:[#allocation31_spill] sm:$0xff] %v8746_v18  ;;  %v8754_v16 = vadd.f32 %v1154_v14, %v515_v0 }
 0x165   :  { %v527_v38 = vpop.f32.mrf.mxu0  ;;  %v1156_v31 = vpop.f32.mrf.mxu1 }
 0x166   :  { %10536 = vst [vmem:[#allocation32_spill] sm:$0xff] %v8754_v16  ;;  %v8756_v10 = vadd.f32 %v1156_v31, %v517_v3  ;;  %v7863_v3 = vld [vmem:[%s10497_s0 + $0xb0] sm:$0xff]  }
 0x167   :  { %v531_v22 = vpop.f32.mrf.mxu0  ;;  %v1160_v19 = vpop.f32.mrf.mxu1  ;;  %7005 = vmatmul.mubr.msk.bf16.gmra.mxu0 %vm237_vm1, %v7861_v29  ;;  %7104 = vmatmul.mubr.msk.bf16.gmra.mxu1 %vm237_vm1, %v7862_v40  ;;  %v7864_v29 = vld [vmem:[%s10497_s0 + $0xa8] sm:$0xff]  }
 0x168   :  { %10537 = vst [vmem:[#allocation33_spill] sm:$0xff] %v8756_v10  ;;  %v8760_v5 = vadd.f32 %v1160_v19, %v521_v51  ;;  %2019 = vmatprep.mubr.bf16.mxu0 %v10518_v59  ;;  %2830 = vmatprep.mubr.bf16.mxu1 %v10518_v59  ;;  %v7887_v19 = vld [vmem:[%s10500_s3 + $0x74] ss:$8 sps:$4 sm:$0xff]  }
 0x169   :  { %v533_v46 = vpop.f32.mrf.mxu0  ;;  %v1162_v18 = vpop.f32.mrf.mxu1  ;;  %4513 = vmatprep.subr.bf16.mxu1 %v7887_v19  ;;  %v7865_v19 = vld [vmem:[%s10497_s0 + $0xb8] sm:$0xff]  }
 0x16a   :  { %10538 = vst [vmem:[#allocation34_spill] sm:$0xff] %v8760_v5  ;;  %v8764_v0 = vadd.f32 %v1162_v18, %v523_v62  ;;  %v7885_v62 = vld [vmem:[%s10500_s3 + $0x70] ss:$8 sps:$4 sm:$0xff]  }
 0x16b   :  { %v535_v14 = vpop.f32.mrf.mxu0  ;;  %v1164_v16 = vpop.f32.mrf.mxu1  ;;  %4514 = vmatpush1.bf16.msra.mxu1 %v7885_v62 }
 0x16c   :  { %10539 = vst [vmem:[#allocation35_spill] sm:$0xff] %v8764_v0  ;;  %v8772_v51 = vadd.f32 %v1164_v16, %v525_v58 }
 0x16d   :  { %v537_v40 = vpop.f32.mrf.mxu0  ;;  %v1166_v31 = vpop.f32.mrf.mxu1 }
 0x16e   :  { %10540 = vst [vmem:[#allocation36_spill] sm:$0xff] %v8772_v51  ;;  %v8780_v18 = vadd.f32 %v1166_v31, %v527_v38 }
 0x16f   :  { %v541_v0 = vpop.f32.mrf.mxu0  ;;  %v1170_v5 = vpop.f32.mrf.mxu1  ;;  %7006 = vmatmul.mubr.msk.bf16.gmra.mxu0 %vm237_vm1, %v7863_v3  ;;  %7105 = vmatmul.mubr.msk.bf16.gmra.mxu1 %vm237_vm1, %v7864_v29 }
 0x170   :  { %10541 = vst [vmem:[#allocation37_spill] sm:$0xff] %v8780_v18  ;;  %v8784_v58 = vadd.f32 %v1170_v5, %v531_v22  ;;  %2029 = vmatprep.mubr.bf16.mxu0 %v10518_v59  ;;  %2840 = vmatprep.mubr.bf16.mxu1 %v10518_v59  ;;  %v7866_v22 = vld [vmem:[%s10497_s0 + $0xb0] sm:$0xff]  }
 0x171   :  { %v543_v16 = vpop.f32.mrf.mxu0  ;;  %v1172_v51 = vpop.f32.mrf.mxu1 }
 0x172   :  { %10542 = vst [vmem:[#allocation38_spill] sm:$0xff] %v8784_v58  ;;  %v8788_v10 = vadd.f32 %v1172_v51, %v533_v46 }
 0x173   :  { %v545_v38 = vpop.f32.mrf.mxu0  ;;  %v1174_v31 = vpop.f32.mrf.mxu1 }
 0x174   :  { %10543 = vst [vmem:[#allocation39_spill] sm:$0xff] %v8788_v10  ;;  %v8796_v5 = vadd.f32 %v1174_v31, %v535_v14 }
 0x175   :  { %v547_v3 = vpop.f32.mrf.mxu0  ;;  %v1176_v29 = vpop.f32.mrf.mxu1 }
 0x176   :  { %10544 = vst [vmem:[#allocation40_spill] sm:$0xff] %v8796_v5  ;;  %v8798_v58 = vadd.f32 %v1176_v29, %v537_v40  ;;  %v7867_v40 = vld [vmem:[%s10497_s0 + $0xc0] sm:$0xff]  }
 0x177   :  { %v551_v18 = vpop.f32.mrf.mxu0  ;;  %v1180_v62 = vpop.f32.mrf.mxu1  ;;  %7007 = vmatmul.mubr.msk.bf16.gmra.mxu0 %vm237_vm1, %v7865_v19  ;;  %7106 = vmatmul.mubr.msk.bf16.gmra.mxu1 %vm237_vm1, %v7866_v22  ;;  %v7868_v19 = vld [vmem:[%s10497_s0 + $0xb8] sm:$0xff]  }
 0x178   :  { %v8802_v46 = vadd.f32 %v1180_v62, %v541_v0  ;;  %2039 = vmatprep.mubr.bf16.mxu0 %v10518_v59  ;;  %2850 = vmatprep.mubr.bf16.mxu1 %v10518_v59 }
 0x179   :  { %v553_v51 = vpop.f32.mrf.mxu0  ;;  %v1182_v10 = vpop.f32.mrf.mxu1 }
 0x17a   :  { %10545 = vst [vmem:[#allocation41_spill] sm:$0xff] %v8802_v46  ;;  %v8806_v14 = vadd.f32 %v1182_v10, %v543_v16 }
 0x17b   :  { %v555_v31 = vpop.f32.mrf.mxu0  ;;  %v1184_v5 = vpop.f32.mrf.mxu1 }
 0x17c   :  { %10546 = vst [vmem:[#allocation42_spill] sm:$0xff] %v8806_v14  ;;  %v8814_v0 = vadd.f32 %v1184_v5, %v545_v38 }
 0x17d   :  { %v8816_v22 = vpop.f32.mrf.mxu0  ;;  %v1186_v29 = vpop.f32.mrf.mxu1 }
 0x17e   :  { %10547 = vst [vmem:[#allocation43_spill] sm:$0xff] %v8814_v0  ;;  %10548 = vst [vmem:[#allocation44_spill] sm:$0xff] %v8816_v22  ;;  %v8818_v62 = vadd.f32 %v1186_v29, %v547_v3  ;;  %v7869_v3 = vld [vmem:[%s10497_s0 + $0xc8] sm:$0xff]  }
 0x17f   :  { %v561_v46 = vpop.f32.mrf.mxu0  ;;  %v1190_v10 = vpop.f32.mrf.mxu1  ;;  %7008 = vmatmul.mubr.msk.bf16.gmra.mxu0 %vm237_vm1, %v7867_v40  ;;  %7107 = vmatmul.mubr.msk.bf16.gmra.mxu1 %vm237_vm1, %v7868_v19  ;;  %v7870_v40 = vld [vmem:[%s10497_s0 + $0xc0] sm:$0xff]  }
 0x180   :  { %v8822_v16 = vadd.f32 %v1190_v10, %v551_v18  ;;  %2049 = vmatprep.mubr.bf16.mxu0 %v10518_v59  ;;  %2860 = vmatprep.mubr.bf16.mxu1 %v10518_v59  ;;  %v7893_v19 = vld [vmem:[%s10500_s3 + $0x64] ss:$8 sps:$4 sm:$0xff]   ;;  %v7891_v10 = vld [vmem:[%s10500_s3 + $0x60] ss:$8 sps:$4 sm:$0xff]  }
 0x181   :  { %v563_v14 = vpop.f32.mrf.mxu0  ;;  %v1192_v38 = vpop.f32.mrf.mxu1  ;;  %4515 = vmatprep.subr.bf16.mxu1 %v7893_v19  ;;  %v7871_v19 = vld [vmem:[%s10497_s0 + $0xc8] sm:$0xff]  }
 0x182   :  { %10549 = vst [vmem:[#allocation45_spill] sm:$0xff] %v8822_v16  ;;  %v8826_v5 = vadd.f32 %v1192_v38, %v553_v51  ;;  %4516 = vmatpush1.bf16.msra.mxu1 %v7891_v10 }
 0x183   :  { %v565_v22 = vpop.f32.mrf.mxu0  ;;  %v1194_v0 = vpop.f32.mrf.mxu1 }
 0x184   :  { %10550 = vst [vmem:[#allocation46_spill] sm:$0xff] %v8826_v5  ;;  %v8834_v18 = vadd.f32 %v1194_v0, %v555_v31 }
 0x185   :  { %v8839_v29 = vpop.f32.mrf.mxu0  ;;  %v8841_v51 = vpop.f32.mrf.mxu1 }
 0x186   :  { %10551 = vst [vmem:[#allocation47_spill] sm:$0xff] %v8834_v18  ;;  %10552 = vst [vmem:[#allocation48_spill] sm:$0xff] %v8839_v29 }
 0x187   :  { %10553 = vst [vmem:[#allocation49_spill] sm:$0xff] %v8841_v51  ;;  %v571_v38 = vpop.f32.mrf.mxu0  ;;  %v1200_v5 = vpop.f32.mrf.mxu1  ;;  %7009 = vmatmul.mubr.msk.bf16.gmra.mxu0 %vm237_vm1, %v7869_v3  ;;  %7108 = vmatmul.mubr.msk.bf16.gmra.mxu1 %vm237_vm1, %v7870_v40 }
 0x188   :  { %v8848_v31 = vadd.f32 %v1200_v5, %v561_v46  ;;  %2870 = vmatprep.mubr.bf16.mxu1 %v10518_v59  ;;  %3481 = vmatprep.mubr.bf16.mxu0 %v10518_v59  ;;  %v7872_v46 = vld [vmem:[%s10497_s0 + $0x20] sm:$0xff]  }
 0x189   :  { %v573_v0 = vpop.f32.mrf.mxu0  ;;  %v1202_v29 = vpop.f32.mrf.mxu1 }
 0x18a   :  { %10554 = vst [vmem:[#allocation50_spill] sm:$0xff] %v8848_v31  ;;  %v8852_v51 = vadd.f32 %v1202_v29, %v563_v14 }
 0x18b   :  { %v575_v18 = vpop.f32.mrf.mxu0  ;;  %v1204_v16 = vpop.f32.mrf.mxu1 }
 0x18c   :  { %v8860_v5 = vadd.f32 %v1204_v16, %v565_v22 }
 0x18d   :  { %v8862_v3 = vpop.f32.mrf.mxu0  ;;  %v8864_v40 = vpop.f32.mrf.mxu1 }
 0x18e   :  { %10555 = vst [vmem:[#allocation51_spill] sm:$0xff] %v8860_v5  ;;  %10556 = vst [vmem:[#allocation52_spill] sm:$0xff] %v8862_v3 }
 0x18f   :  { %10557 = vst [vmem:[#allocation53_spill] sm:$0xff] %v8864_v40  ;;  %v1210_v31 = vpop.f32.mrf.mxu1  ;;  %v1821_v10 = vpop.f32.mrf.mxu0  ;;  %7109 = vmatmul.mubr.msk.bf16.gmra.mxu1 %vm237_vm1, %v7871_v19  ;;  %7188 = vmatmul.mubr.msk.bf16.vlgmr.msra.gmra.mxu0 %vm237_vm1, %v7872_v46 }
 0x190   :  { %v8868_v14 = vadd.f32 %v1210_v31, %v571_v38  ;;  %v8871_v29 = vadd.f32 %v1821_v10, %v8454_v25  ;;  %2880 = vmatprep.mubr.bf16.mxu1 %v10518_v59  ;;  %3491 = vmatprep.mubr.bf16.mxu0 %v10518_v59  ;;  %v7873_v38 = vld [vmem:[%s10497_s0 + $0xd0] sm:$0xff]   ;;  %v7874_v25 = vld [vmem:[%s10497_s0 + $0x28] sm:$0xff]  }
 0x191   :  { %v1212_v22 = vpop.f32.mrf.mxu1  ;;  %v1823_v16 = vpop.f32.mrf.mxu0 }
 0x192   :  { %v8875_v3 = vadd.f32 %v1212_v22, %v573_v0  ;;  %v8878_v40 = vadd.f32 %v1823_v16, %v8458_v28 }
 0x193   :  { %v1214_v5 = vpop.f32.mrf.mxu1  ;;  %v1825_v19 = vpop.f32.mrf.mxu0 }
 0x194   :  { %10558 = vst [vmem:[#allocation54_spill] sm:$0xff] %v8878_v40  ;;  %v8886_v31 = vadd.f32 %v1214_v5, %v575_v18  ;;  %v8889_v46 = vadd.f32 %v1825_v19, %v8466_v33 }
 0x195   :  { %v8891_v0 = vpop.f32.mrf.mxu1  ;;  %v1827_v10 = vpop.f32.mrf.mxu0 }
 0x196   :  { %10559 = vst [vmem:[#allocation55_spill] sm:$0xff] %v8891_v0  ;;  %v8894_v28 = vadd.f32 %v1827_v10, %v8468_v36  ;;  %v7899_v10 = vld [vmem:[%s10500_s3 + $0x54] ss:$8 sps:$4 sm:$0xff]  }
 0x197   :  { %v8896_v22 = vpop.f32.mrf.mxu1  ;;  %v1831_v16 = vpop.f32.mrf.mxu0  ;;  %7110 = vmatmul.mubr.msk.bf16.gmra.mxu1 %vm237_vm1, %v7873_v38  ;;  %7189 = vmatmul.mubr.msk.bf16.gmra.mxu0 %vm237_vm1, %v7874_v25  ;;  %v7875_v38 = vld [vmem:[%s10497_s0 + $0x30] sm:$0xff]  }
 0x198   :  { %v8901_v40 = vadd.f32 %v1831_v16, %v8472_v39  ;;  %3501 = vmatprep.mubr.bf16.mxu0 %v10518_v59  ;;  %4545 = vmatprep.mubr.bf16.mxu1 %v10518_v59  ;;  %v7897_v25 = vld [vmem:[%s10500_s3 + $0x50] ss:$8 sps:$4 sm:$0xff]  }
 0x199   :  { %v8905_v33 = vpop.f32.mrf.mxu1  ;;  %v1833_v18 = vpop.f32.mrf.mxu0  ;;  %4517 = vmatprep.subr.bf16.mxu1 %v7899_v10  ;;  %v7876_v10 = vld [vmem:[%s10497_s0 + $0x38] sm:$0xff]  }
 0x19a   :  { %v8908_v36 = vadd.f32 %v1833_v18, %v8476_v42  ;;  %4518 = vmatpush1.bf16.msra.mxu1 %v7897_v25 }
 0x19b   :  { %v8910_v5 = vpop.f32.mrf.mxu1  ;;  %v1835_v19 = vpop.f32.mrf.mxu0 }
 0x19c   :  { %10560 = vst [vmem:[#allocation56_spill] sm:$0xff] %v8908_v36  ;;  %v8916_v39 = vadd.f32 %v1835_v19, %v8484_v47 }
 0x19d   :  { %v8924_v42 = vpop.f32.mrf.mxu1  ;;  %v1837_v16 = vpop.f32.mrf.mxu0 }
 0x19e   :  { %10561 = vst [vmem:[#allocation57_spill] sm:$0xff] %v8916_v39  ;;  %10562 = vst [vmem:[#allocation58_spill] sm:$0xff] %v8924_v42  ;;  %v8927_v18 = vadd.f32 %v1837_v16, %v8486_v50 }
 0x19f   :  { %v1841_v0 = vpop.f32.mrf.mxu0  ;;  %v8929_v36 = vpop.f32.mrf.mxu1  ;;  %7190 = vmatmul.mubr.msk.bf16.gmra.mxu0 %vm237_vm1, %v7875_v38 }
 0x1a0   :  { %10563 = vst [vmem:[#allocation59_spill] sm:$0xff] %v8927_v18  ;;  %v8933_v47 = vadd.f32 %v1841_v0, %v8490_v53  ;;  %3511 = vmatprep.mubr.bf16.mxu0 %v10518_v59 }
 0x1a1   :  { %v1843_v19 = vpop.f32.mrf.mxu0  ;;  %v8936_v39 = vpop.f32.mrf.mxu1 }
 0x1a2   :  { %10564 = vst [vmem:[#allocation60_spill] sm:$0xff] %v8933_v47  ;;  %v8939_v42 = vadd.f32 %v1843_v19, %v8494_v56 }
 0x1a3   :  { %v1845_v50 = vpop.f32.mrf.mxu0  ;;  %v8941_v16 = vpop.f32.mrf.mxu1 }
 0x1a4   :  { %10565 = vst [vmem:[#allocation61_spill] sm:$0xff] %v8939_v42  ;;  %v8947_v38 = vadd.f32 %v1845_v50, %v8502_v61 }
 0x1a5   :  { %v1847_v53 = vpop.f32.mrf.mxu0  ;;  %v8949_v0 = vpop.f32.mrf.mxu1 }
 0x1a6   :  { %10566 = vst [vmem:[#allocation62_spill] sm:$0xff] %v8947_v38  ;;  %v8952_v25 = vadd.f32 %v1847_v53, %v8504_v1  ;;  %v7877_v1 = vld [vmem:[%s10497_s0 + $0x40] sm:$0xff]  }
 0x1a7   :  { %v1851_v47 = vpop.f32.mrf.mxu0  ;;  %v8954_v18 = vpop.f32.mrf.mxu1  ;;  %7191 = vmatmul.mubr.msk.bf16.gmra.mxu0 %vm237_vm1, %v7876_v10 }
 0x1a8   :  { %10567 = vst [vmem:[#allocation63_spill] sm:$0xff] %v8952_v25  ;;  %v8958_v56 = vadd.f32 %v1851_v47, %v8508_v4  ;;  %3521 = vmatprep.mubr.bf16.mxu0 %v10518_v59 }
 0x1a9   :  { %v1853_v19 = vpop.f32.mrf.mxu0  ;;  %v8961_v42 = vpop.f32.mrf.mxu1 }
 0x1aa   :  { %10568 = vst [vmem:[#allocation64_spill] sm:$0xff] %v8958_v56  ;;  %v8964_v61 = vadd.f32 %v1853_v19, %v8512_v7 }
 0x1ab   :  { %v1855_v50 = vpop.f32.mrf.mxu0  ;;  %v8966_v38 = vpop.f32.mrf.mxu1 }
 0x1ac   :  { %10569 = vst [vmem:[#allocation65_spill] sm:$0xff] %v8964_v61  ;;  %v8972_v10 = vadd.f32 %v1855_v50, %v8520_v12 }
 0x1ad   :  { %v1857_v4 = vpop.f32.mrf.mxu0  ;;  %v8974_v47 = vpop.f32.mrf.mxu1 }
 0x1ae   :  { %v8977_v53 = vadd.f32 %v1857_v4, %v8522_v17  ;;  %v7878_v17 = vld [vmem:[%s10497_s0 + $0x48] sm:$0xff]  }
 0x1af   :  { %v1861_v56 = vpop.f32.mrf.mxu0  ;;  %v8979_v25 = vpop.f32.mrf.mxu1  ;;  %7192 = vmatmul.mubr.msk.bf16.gmra.mxu0 %vm237_vm1, %v7877_v1 }
 0x1b0   :  { %10570 = vst [vmem:[#allocation66_spill] sm:$0xff] %v8977_v53  ;;  %v8983_v7 = vadd.f32 %v1861_v56, %v8526_v21  ;;  %3531 = vmatprep.mubr.bf16.mxu0 %v10518_v59  ;;  %v7903_v21 = vld [vmem:[%s10500_s3 + $0x40] ss:$8 sps:$4 sm:$0xff]   ;;  %v7905_v56 = vld [vmem:[%s10500_s3 + $0x44] ss:$8 sps:$4 sm:$0xff]  }
 0x1b1   :  { %v1863_v19 = vpop.f32.mrf.mxu0  ;;  %v8986_v61 = vpop.f32.mrf.mxu1  ;;  %4519 = vmatprep.subr.bf16.mxu1 %v7905_v56 }
 0x1b2   :  { %10571 = vst [vmem:[#allocation67_spill] sm:$0xff] %v8983_v7  ;;  %v8989_v12 = vadd.f32 %v1863_v19, %v8530_v26  ;;  %4520 = vmatpush1.bf16.msra.mxu1 %v7903_v21 }
 0x1b3   :  { %v1865_v50 = vpop.f32.mrf.mxu0  ;;  %v9003_v1 = vpop.f32.mrf.mxu1 }
 0x1b4   :  { %10572 = vst [vmem:[#allocation68_spill] sm:$0xff] %v8989_v12  ;;  %v8995_v4 = vadd.f32 %v1865_v50, %v8538_v32 }
 0x1b5   :  { %v1867_v26 = vpop.f32.mrf.mxu0  ;;  %v9013_v50 = vpop.f32.mrf.mxu1 }
 0x1b6   :  { %10573 = vst [vmem:[#allocation69_spill] sm:$0xff] %v8995_v4  ;;  %v9006_v19 = vadd.f32 %v1867_v26, %v8540_v37  ;;  %v7879_v37 = vld [vmem:[%s10497_s0 + $0x50] sm:$0xff]  }
 0x1b7   :  { %v1871_v12 = vpop.f32.mrf.mxu0  ;;  %7193 = vmatmul.mubr.msk.bf16.gmra.mxu0 %vm237_vm1, %v7878_v17  ;;  %v9024_v17 = vpop.f32.mrf.mxu1 }
 0x1b8   :  { %v9010_v32 = vadd.f32 %v1871_v12, %v8544_v41  ;;  %3541 = vmatprep.mubr.bf16.mxu0 %v10518_v59 }
 0x1b9   :  { %v1873_v4 = vpop.f32.mrf.mxu0 }
 0x1ba   :  { %v9016_v7 = vadd.f32 %v1873_v4, %v8548_v45  ;;  %v9034_v4 = vpop.f32.mrf.mxu1 }
 0x1bb   :  { %v1875_v53 = vpop.f32.mrf.mxu0 }
 0x1bc   :  { %v9022_v56 = vadd.f32 %v1875_v53, %v8556_v52 }
 0x1bd   :  { %v1877_v41 = vpop.f32.mrf.mxu0 }
 0x1be   :  { %v9027_v12 = vadd.f32 %v1877_v41, %v8558_v57  ;;  %v7880_v57 = vld [vmem:[%s10497_s0 + $0x58] sm:$0xff]  }
 0x1bf   :  { %v1881_v21 = vpop.f32.mrf.mxu0  ;;  %7194 = vmatmul.mubr.msk.bf16.gmra.mxu0 %vm237_vm1, %v7879_v37  ;;  %v9045_v37 = vpop.f32.mrf.mxu1 }
 0x1c0   :  { %v9031_v45 = vadd.f32 %v1881_v21, %v8562_v60  ;;  %3551 = vmatprep.mubr.bf16.mxu0 %v10518_v59 }
 0x1c1   :  { %v1883_v26 = vpop.f32.mrf.mxu0 }
 0x1c2   :  { %10574 = vst [vmem:[#allocation70_spill] sm:$0xff] %v9031_v45  ;;  %v9037_v52 = vadd.f32 %v1883_v26, %v8566_v2  ;;  %v9055_v26 = vpop.f32.mrf.mxu1 }
 0x1c3   :  { %v1885_v53 = vpop.f32.mrf.mxu0 }
 0x1c4   :  { %10575 = vst [vmem:[#allocation71_spill] sm:$0xff] %v9037_v52  ;;  %v9043_v41 = vadd.f32 %v1885_v53, %v8574_v9 }
 0x1c5   :  { %v1887_v60 = vpop.f32.mrf.mxu0 }
 0x1c6   :  { %v9048_v21 = vadd.f32 %v1887_v60, %v8576_v13  ;;  %v7881_v13 = vld [vmem:[%s10497_s0 + $0x60] sm:$0xff]  }
 0x1c7   :  { %v1891_v45 = vpop.f32.mrf.mxu0  ;;  %7195 = vmatmul.mubr.msk.bf16.gmra.mxu0 %vm237_vm1, %v7880_v57  ;;  %v9072_v57 = vpop.f32.mrf.mxu1 }
 0x1c8   :  { %10576 = vst [vmem:[#allocation72_spill] sm:$0xff] %v9048_v21  ;;  %v9052_v2 = vadd.f32 %v1891_v45, %v8580_v20  ;;  %3561 = vmatprep.mubr.bf16.mxu0 %v10518_v59  ;;  %v7909_v20 = vld [vmem:[%s10500_s3 + $0x30] ss:$8 sps:$4 sm:$0xff]   ;;  %v7911_v45 = vld [vmem:[%s10500_s3 + $0x34] ss:$8 sps:$4 sm:$0xff]  }
 0x1c9   :  { %v1893_v52 = vpop.f32.mrf.mxu0  ;;  %4521 = vmatprep.subr.bf16.mxu1 %v7911_v45 }
 0x1ca   :  { %10577 = vst [vmem:[#allocation73_spill] sm:$0xff] %v9052_v2  ;;  %v9058_v9 = vadd.f32 %v1893_v52, %v8584_v27  ;;  %4522 = vmatpush1.bf16.msra.mxu1 %v7909_v20 }
 0x1cb   :  { %v1895_v53 = vpop.f32.mrf.mxu0 }
 0x1cc   :  { %10578 = vst [vmem:[#allocation74_spill] sm:$0xff] %v9058_v9  ;;  %v9064_v60 = vadd.f32 %v1895_v53, %v8592_v35  ;;  %v9082_v53 = vpop.f32.mrf.mxu1 }
 0x1cd   :  { %v1897_v27 = vpop.f32.mrf.mxu0 }
 0x1ce   :  { %10579 = vst [vmem:[#allocation75_spill] sm:$0xff] %v9064_v60  ;;  %v9075_v52 = vadd.f32 %v1897_v27, %v8594_v43  ;;  %v7882_v43 = vld [vmem:[%s10497_s0 + $0x68] sm:$0xff]  }
 0x1cf   :  { %v1901_v9 = vpop.f32.mrf.mxu0  ;;  %7196 = vmatmul.mubr.msk.bf16.gmra.mxu0 %vm237_vm1, %v7881_v13  ;;  %v9093_v13 = vpop.f32.mrf.mxu1 }
 0x1d0   :  { %10580 = vst [vmem:[#allocation76_spill] sm:$0xff] %v9075_v52  ;;  %v9079_v35 = vadd.f32 %v1901_v9, %v8598_v48  ;;  %3571 = vmatprep.mubr.bf16.mxu0 %v10518_v59 }
 0x1d1   :  { %v1903_v60 = vpop.f32.mrf.mxu0 }
 0x1d2   :  { %10581 = vst [vmem:[#allocation77_spill] sm:$0xff] %v9079_v35  ;;  %v9085_v2 = vadd.f32 %v1903_v60, %v8602_v54  ;;  %v9103_v60 = vpop.f32.mrf.mxu1  ;;  %v7926_v35 = vld [vmem:[%s10500_s3 + $0x1e0] ss:$8 sps:$4 sm:$0xff]  }
 0x1d3   :  { %v1905_v21 = vpop.f32.mrf.mxu0 }
 0x1d4   :  { %10582 = vst [vmem:[#allocation78_spill] sm:$0xff] %v9085_v2  ;;  %v9091_v45 = vadd.f32 %v1905_v21, %v8610_v63  ;;  %v10615_v2 = vld [vmem:[#allocation22_spill] sm:$0xff] }
 0x1d5   :  { %v1907_v48 = vpop.f32.mrf.mxu0 }
 0x1d6   :  { %10583 = vst [vmem:[#allocation79_spill] sm:$0xff] %v9091_v45  ;;  %v9096_v9 = vadd.f32 %v1907_v48, %v8612_v6  ;;  %v7883_v6 = vld [vmem:[%s10497_s0 + $0x70] sm:$0xff]   ;;  %v10609_v45 = vld [vmem:[#allocation19_spill] sm:$0xff] }
 0x1d7   :  { %v1911_v20 = vpop.f32.mrf.mxu0  ;;  %7197 = vmatmul.mubr.msk.bf16.gmra.mxu0 %vm237_vm1, %v7882_v43  ;;  %v9114_v43 = vpop.f32.mrf.mxu1 }
 0x1d8   :  { %10584 = vst [vmem:[#allocation80_spill] sm:$0xff] %v9096_v9  ;;  %v9100_v54 = vadd.f32 %v1911_v20, %v8616_v11  ;;  %3581 = vmatprep.mubr.bf16.mxu0 %v10518_v59  ;;  %v10607_v9 = vld [vmem:[#allocation18_spill] sm:$0xff] }
 0x1d9   :  { %v1913_v27 = vpop.f32.mrf.mxu0 }
 0x1da   :  { %10585 = vst [vmem:[#allocation81_spill] sm:$0xff] %v9100_v54  ;;  %v9106_v63 = vadd.f32 %v1913_v27, %v8620_v23  ;;  %v9124_v27 = vpop.f32.mrf.mxu1 }
 0x1db   :  { %v1915_v21 = vpop.f32.mrf.mxu0 }
 0x1dc   :  { %10586 = vst [vmem:[#allocation82_spill] sm:$0xff] %v9106_v63  ;;  %v9112_v48 = vadd.f32 %v1915_v21, %v8628_v34 }
 0x1dd   :  { %v1917_v11 = vpop.f32.mrf.mxu0 }
 0x1de   :  { %10587 = vst [vmem:[#allocation83_spill] sm:$0xff] %v9112_v48  ;;  %v9117_v20 = vadd.f32 %v1917_v11, %v8630_v44  ;;  %v7884_v44 = vld [vmem:[%s10497_s0 + $0x78] sm:$0xff]   ;;  %v10603_v48 = vld [vmem:[#allocation16_spill] sm:$0xff] }
 0x1df   :  { %v1921_v54 = vpop.f32.mrf.mxu0  ;;  %7198 = vmatmul.mubr.msk.bf16.gmra.mxu0 %vm237_vm1, %v7883_v6  ;;  %v9135_v6 = vpop.f32.mrf.mxu1 }
 0x1e0   :  { %10588 = vst [vmem:[#allocation84_spill] sm:$0xff] %v9117_v20  ;;  %v9121_v23 = vadd.f32 %v1921_v54, %v8634_v49  ;;  %3591 = vmatprep.mubr.bf16.mxu0 %v10518_v59  ;;  %v7914_v54 = vld [vmem:[%s10500_s3 + $0x24] ss:$8 sps:$4 sm:$0xff]  }
 0x1e1   :  { %v1923_v63 = vpop.f32.mrf.mxu0  ;;  %4523 = vmatprep.subr.bf16.mxu1 %v7914_v54 }
 0x1e2   :  { %10589 = vst [vmem:[#allocation85_spill] sm:$0xff] %v9121_v23  ;;  %v9127_v34 = vadd.f32 %v1923_v63, %v8638_v55  ;;  %v7912_v55 = vld [vmem:[%s10500_s3 + $0x20] ss:$8 sps:$4 sm:$0xff]  }
 0x1e3   :  { %v1925_v21 = vpop.f32.mrf.mxu0  ;;  %4524 = vmatpush1.bf16.msra.mxu1 %v7912_v55  ;;  %v10595_v55 = vld [vmem:[#allocation12_spill] sm:$0xff] }
 0x1e4   :  { %10590 = vst [vmem:[#allocation86_spill] sm:$0xff] %v9127_v34  ;;  %v9133_v11 = vadd.f32 %v1925_v21, %v8646_v8  ;;  %v9151_v21 = vpop.f32.mrf.mxu1  ;;  %v7918_v34 = vld [vmem:[%s10500_s3] ss:$8 sps:$4 sm:$0xff]  }
 0x1e5   :  { %v1927_v49 = vpop.f32.mrf.mxu0 }
 0x1e6   :  { %10591 = vst [vmem:[#allocation87_spill] sm:$0xff] %v9133_v11  ;;  %v9141_v23 = vadd.f32 %v1927_v49, %v8648_v30  ;;  %v7917_v30 = vld [vmem:[%s10500_s3 + $0x14] ss:$8 sps:$4 sm:$0xff]  }
 0x1e7   :  { %v1931_v63 = vpop.f32.mrf.mxu0  ;;  %7199 = vmatmul.mubr.msk.bf16.gmra.mxu0 %vm237_vm1, %v7884_v44  ;;  %v7915_v44 = vld [vmem:[%s10500_s3 + $0x10] ss:$8 sps:$4 sm:$0xff]   ;;  %4525 = vmatprep.subr.bf16.mxu1 %v7917_v30 }
 0x1e8   :  { %10592 = vst [vmem:[#allocation88_spill] sm:$0xff] %v9141_v23  ;;  %v9148_v8 = vadd.f32 %v1931_v63, %v8652_v15  ;;  %3601 = vmatprep.mubr.bf16.mxu0 %v10518_v59  ;;  %v7888_v15 = vld [vmem:[%s10497_s0 + $0x80] sm:$0xff]   ;;  %4526 = vmatpush1.bf16.msra.mxu1 %v7915_v44  ;;  %v10599_v30 = vld [vmem:[#allocation14_spill] sm:$0xff] }
 0x1e9   :  { %v1933_v11 = vpop.f32.mrf.mxu0 }
 0x1ea   :  { %10593 = vst [vmem:[#allocation89_spill] sm:$0xff] %v9148_v8  ;;  %v9157_v49 = vadd.f32 %v1933_v11, %v8656_v24  ;;  %v9168_v8 = vpop.f32.mrf.mxu1  ;;  %v7920_v24 = vld [vmem:[%s10500_s3 + $0x4] ss:$8 sps:$4 sm:$0xff]  }
 0x1eb   :  { %v1935_v54 = vpop.f32.mrf.mxu0  ;;  %v10597_v11 = vld [vmem:[#allocation13_spill] sm:$0xff]  ;;  %4527 = vmatprep.subr.bf16.mxu1 %v7920_v24 }
 0x1ec   :  { %10594 = vst [vmem:[#allocation90_spill] sm:$0xff] %v9157_v49  ;;  %v9166_v63 = vadd.f32 %v1935_v54, %v10595_v55  ;;  %4528 = vmatpush1.bf16.msra.mxu1 %v7918_v34  ;;  %v9184_v54 = vpop.f32.mrf.mxu1 }
 0x1ed   :  { %v1937_v23 = vpop.f32.mrf.mxu0 }
 0x1ee   :  { %10596 = vst [vmem:[#allocation12_spill] sm:$0xff] %v9166_v63  ;;  %v9174_v49 = vadd.f32 %v1937_v23, %v10597_v11  ;;  %v10601_v63 = vld [vmem:[#allocation15_spill] sm:$0xff]  ;;  %v9195_v24 = vpop.f32.mrf.mxu1 }
 0x1ef   :  { %v1941_v20 = vpop.f32.mrf.mxu0  ;;  %7200 = vmatmul.mubr.msk.bf16.gmra.mxu0 %vm237_vm1, %v7888_v15 }
 0x1f0   :  { %10598 = vst [vmem:[#allocation13_spill] sm:$0xff] %v9174_v49  ;;  %v9181_v44 = vadd.f32 %v1941_v20, %v10599_v30  ;;  %3611 = vmatprep.mubr.bf16.mxu0 %v10518_v59  ;;  %v7889_v49 = vld [vmem:[%s10497_s0 + $0x88] sm:$0xff]  }
 0x1f1   :  { %v1943_v55 = vpop.f32.mrf.mxu0  ;;  %v10605_v30 = vld [vmem:[#allocation17_spill] sm:$0xff] }
 0x1f2   :  { %10600 = vst [vmem:[#allocation14_spill] sm:$0xff] %v9181_v44  ;;  %v9187_v23 = vadd.f32 %v1943_v55, %v10601_v63  ;;  %v9205_v55 = vpop.f32.mrf.mxu1 }
 0x1f3   :  { %v1945_v11 = vpop.f32.mrf.mxu0 }
 0x1f4   :  { %10602 = vst [vmem:[#allocation15_spill] sm:$0xff] %v9187_v23  ;;  %v9193_v15 = vadd.f32 %v1945_v11, %v10603_v48 }
 0x1f5   :  { %v1947_v20 = vpop.f32.mrf.mxu0 }
 0x1f6   :  { %10604 = vst [vmem:[#allocation16_spill] sm:$0xff] %v9193_v15  ;;  %v9198_v44 = vadd.f32 %v1947_v20, %v10605_v30  ;;  %v7890_v20 = vld [vmem:[%s10497_s0 + $0x90] sm:$0xff]   ;;  %v10611_v30 = vld [vmem:[#allocation20_spill] sm:$0xff] }
 0x1f7   :  { %v1951_v34 = vpop.f32.mrf.mxu0  ;;  %7201 = vmatmul.mubr.msk.bf16.gmra.mxu0 %vm237_vm1, %v7889_v49  ;;  %v9216_v49 = vpop.f32.mrf.mxu1 }
 0x1f8   :  { %10606 = vst [vmem:[#allocation17_spill] sm:$0xff] %v9198_v44  ;;  %v9202_v63 = vadd.f32 %v1951_v34, %v10607_v9  ;;  %3621 = vmatprep.mubr.bf16.mxu0 %v10518_v59  ;;  %v10613_v34 = vld [vmem:[#allocation21_spill] sm:$0xff] }
 0x1f9   :  { %v1953_v23 = vpop.f32.mrf.mxu0 }
 0x1fa   :  { %10608 = vst [vmem:[#allocation18_spill] sm:$0xff] %v9202_v63  ;;  %v9208_v48 = vadd.f32 %v1953_v23, %v10609_v45  ;;  %v9226_v23 = vpop.f32.mrf.mxu1 }
 0x1fb   :  { %v1955_v11 = vpop.f32.mrf.mxu0 }
 0x1fc   :  { %10610 = vst [vmem:[#allocation19_spill] sm:$0xff] %v9208_v48  ;;  %v9214_v44 = vadd.f32 %v1955_v11, %v10611_v30  ;;  %v7925_v11 = vld [vmem:[%s10500_s3 + $0x1f4] ss:$8 sps:$4 sm:$0xff]  }
 0x1fd   :  { %v1957_v9 = vpop.f32.mrf.mxu0  ;;  %v10617_v30 = vld [vmem:[#allocation23_spill] sm:$0xff]  ;;  %5562 = vmatprep.subr.bf16.mxu0 %v7925_v11  ;;  %v10624_v11 = vld [vmem:[#allocation26_spill] sm:$0xff] }
 0x1fe   :  { %10612 = vst [vmem:[#allocation20_spill] sm:$0xff] %v9214_v44  ;;  %v9219_v63 = vadd.f32 %v1957_v9, %v10613_v34  ;;  %v7923_v9 = vld [vmem:[%s10500_s3 + $0x1f0] ss:$8 sps:$4 sm:$0xff]  }
 0x1ff   :  { %v1961_v15 = vpop.f32.mrf.mxu0  ;;  %7202 = vmatmul.mubr.msk.bf16.gmra.mxu0 %vm237_vm1, %v7890_v20 }
 0x200   :  { %10614 = vst [vmem:[#allocation21_spill] sm:$0xff] %v9219_v63  ;;  %v9223_v45 = vadd.f32 %v1961_v15, %v10615_v2  ;;  %3631 = vmatprep.mubr.bf16.mxu0 %v10518_v59  ;;  %v7894_v2 = vld [vmem:[%s10497_s0 + $0x98] sm:$0xff]   ;;  %v10619_v15 = vld [vmem:[#allocation24_spill] sm:$0xff]  ;;  %5563 = vmatpush1.bf16.msra.mxu0 %v7923_v9 }
 0x201   :  { %v1963_v48 = vpop.f32.mrf.mxu0 }
 0x202   :  { %10616 = vst [vmem:[#allocation22_spill] sm:$0xff] %v9223_v45  ;;  %v9232_v44 = vadd.f32 %v1963_v48, %v10617_v30  ;;  %v9243_v45 = vpop.f32.mrf.mxu1  ;;  %v7928_v48 = vld [vmem:[%s10500_s3 + $0x1e4] ss:$8 sps:$4 sm:$0xff]  }
 0x203   :  { %v1965_v20 = vpop.f32.mrf.mxu0  ;;  %10621 = vst [vmem:[#allocation91_spill] sm:$0xff] %v9243_v45  ;;  %v10622_v30 = vld [vmem:[#allocation25_spill] sm:$0xff]  ;;  %5564 = vmatprep.subr.bf16.mxu0 %v7928_v48 }
 0x204   :  { %10618 = vst [vmem:[#allocation23_spill] sm:$0xff] %v9232_v44  ;;  %v9241_v34 = vadd.f32 %v1965_v20, %v10619_v15  ;;  %5565 = vmatpush1.bf16.msra.mxu0 %v7926_v35  ;;  %v9259_v20 = vpop.f32.mrf.mxu1  ;;  %v10629_v35 = vld [vmem:[#allocation28_spill] sm:$0xff] }
 0x205   :  { %v1967_v63 = vpop.f32.mrf.mxu0  ;;  %10626 = vst [vmem:[#allocation92_spill] sm:$0xff] %v9259_v20  ;;  %v7932_v20 = vld [vmem:[%s10500_s3 + $0x1c0] ss:$8 sps:$4 sm:$0xff]  }
 0x206   :  { %10620 = vst [vmem:[#allocation24_spill] sm:$0xff] %v9241_v34  ;;  %v9249_v44 = vadd.f32 %v1967_v63, %v10622_v30  ;;  %v7931_v63 = vld [vmem:[%s10500_s3 + $0x1d4] ss:$8 sps:$4 sm:$0xff]  }
 0x207   :  { %v1971_v52 = vpop.f32.mrf.mxu0  ;;  %7203 = vmatmul.mubr.msk.bf16.gmra.mxu0 %vm237_vm1, %v7894_v2  ;;  %v10627_v30 = vld [vmem:[#allocation27_spill] sm:$0xff]  ;;  %5566 = vmatprep.subr.bf16.mxu0 %v7931_v63  ;;  %v10634_v63 = vld [vmem:[#allocation30_spill] sm:$0xff] }
 0x208   :  { %10623 = vst [vmem:[#allocation25_spill] sm:$0xff] %v9249_v44  ;;  %v9256_v9 = vadd.f32 %v1971_v52, %v10624_v11  ;;  %3641 = vmatprep.mubr.bf16.mxu0 %v10518_v59  ;;  %v7929_v2 = vld [vmem:[%s10500_s3 + $0x1d0] ss:$8 sps:$4 sm:$0xff]   ;;  %v7895_v52 = vld [vmem:[%s10497_s0 + $0xa0] sm:$0xff]  }
 0x209   :  { %v1973_v15 = vpop.f32.mrf.mxu0  ;;  %5567 = vmatpush1.bf16.msra.mxu0 %v7929_v2 }
 0x20a   :  { %10625 = vst [vmem:[#allocation26_spill] sm:$0xff] %v9256_v9  ;;  %v9265_v44 = vadd.f32 %v1973_v15, %v10627_v30  ;;  %v9276_v9 = vpop.f32.mrf.mxu1  ;;  %v7934_v15 = vld [vmem:[%s10500_s3 + $0x1c4] ss:$8 sps:$4 sm:$0xff]  }
 0x20b   :  { %v1975_v48 = vpop.f32.mrf.mxu0  ;;  %10631 = vst [vmem:[#allocation93_spill] sm:$0xff] %v9276_v9  ;;  %v10632_v30 = vld [vmem:[#allocation29_spill] sm:$0xff]  ;;  %5568 = vmatprep.subr.bf16.mxu0 %v7934_v15 }
 0x20c   :  { %10628 = vst [vmem:[#allocation27_spill] sm:$0xff] %v9265_v44  ;;  %v9274_v11 = vadd.f32 %v1975_v48, %v10629_v35  ;;  %v9292_v48 = vpop.f32.mrf.mxu1 }
 0x20d   :  { %v1977_v34 = vpop.f32.mrf.mxu0  ;;  %5569 = vmatpush1.bf16.msra.mxu0 %v7932_v20  ;;  %10636 = vst [vmem:[#allocation94_spill] sm:$0xff] %v9292_v48  ;;  %v10639_v20 = vld [vmem:[#allocation32_spill] sm:$0xff] }
 0x20e   :  { %10630 = vst [vmem:[#allocation28_spill] sm:$0xff] %v9274_v11  ;;  %v9282_v44 = vadd.f32 %v1977_v34, %v10632_v30  ;;  %v7938_v34 = vld [vmem:[%s10500_s3 + $0x1b4] ss:$8 sps:$4 sm:$0xff]   ;;  %v7939_v48 = vld [vmem:[%s10500_s3 + $0x1a0] ss:$8 sps:$4 sm:$0xff]  }
 0x20f   :  { %v1981_v45 = vpop.f32.mrf.mxu0  ;;  %7204 = vmatmul.mubr.msk.bf16.gmra.mxu0 %vm237_vm1, %v7895_v52  ;;  %v10637_v30 = vld [vmem:[#allocation31_spill] sm:$0xff]  ;;  %5570 = vmatprep.subr.bf16.mxu0 %v7938_v34  ;;  %v10644_v34 = vld [vmem:[#allocation34_spill] sm:$0xff] }
 0x210   :  { %10633 = vst [vmem:[#allocation29_spill] sm:$0xff] %v9282_v44  ;;  %v9289_v2 = vadd.f32 %v1981_v45, %v10634_v63  ;;  %3651 = vmatprep.mubr.bf16.mxu0 %v10518_v59  ;;  %v7936_v52 = vld [vmem:[%s10500_s3 + $0x1b0] ss:$8 sps:$4 sm:$0xff]   ;;  %v7896_v45 = vld [vmem:[%s10497_s0 + $0xa8] sm:$0xff]  }
 0x211   :  { %v1983_v35 = vpop.f32.mrf.mxu0  ;;  %5571 = vmatpush1.bf16.msra.mxu0 %v7936_v52 }
 0x212   :  { %10635 = vst [vmem:[#allocation30_spill] sm:$0xff] %v9289_v2  ;;  %v9298_v44 = vadd.f32 %v1983_v35, %v10637_v30  ;;  %v9309_v2 = vpop.f32.mrf.mxu1  ;;  %v7941_v35 = vld [vmem:[%s10500_s3 + $0x1a4] ss:$8 sps:$4 sm:$0xff]  }
 0x213   :  { %v1985_v15 = vpop.f32.mrf.mxu0  ;;  %10641 = vst [vmem:[#allocation95_spill] sm:$0xff] %v9309_v2  ;;  %v10642_v30 = vld [vmem:[#allocation33_spill] sm:$0xff]  ;;  %5572 = vmatprep.subr.bf16.mxu0 %v7941_v35 }
 0x214   :  { %10638 = vst [vmem:[#allocation31_spill] sm:$0xff] %v9298_v44  ;;  %v9307_v63 = vadd.f32 %v1985_v15, %v10639_v20  ;;  %v9325_v15 = vpop.f32.mrf.mxu1 }
 0x215   :  { %v1987_v11 = vpop.f32.mrf.mxu0  ;;  %5573 = vmatpush1.bf16.msra.mxu0 %v7939_v48  ;;  %10646 = vst [vmem:[#allocation96_spill] sm:$0xff] %v9325_v15  ;;  %v10649_v48 = vld [vmem:[#allocation36_spill] sm:$0xff] }
 0x216   :  { %10640 = vst [vmem:[#allocation32_spill] sm:$0xff] %v9307_v63  ;;  %v9315_v44 = vadd.f32 %v1987_v11, %v10642_v30  ;;  %v7944_v11 = vld [vmem:[%s10500_s3 + $0x194] ss:$8 sps:$4 sm:$0xff]   ;;  %v7945_v15 = vld [vmem:[%s10500_s3 + $0x180] ss:$8 sps:$4 sm:$0xff]  }
 0x217   :  { %v1991_v9 = vpop.f32.mrf.mxu0  ;;  %7205 = vmatmul.mubr.msk.bf16.gmra.mxu0 %vm237_vm1, %v7896_v45  ;;  %v10647_v30 = vld [vmem:[#allocation35_spill] sm:$0xff]  ;;  %5574 = vmatprep.subr.bf16.mxu0 %v7944_v11  ;;  %v10654_v11 = vld [vmem:[#allocation38_spill] sm:$0xff] }
 0x218   :  { %10643 = vst [vmem:[#allocation33_spill] sm:$0xff] %v9315_v44  ;;  %v9322_v52 = vadd.f32 %v1991_v9, %v10644_v34  ;;  %3661 = vmatprep.mubr.bf16.mxu0 %v10518_v59  ;;  %v7942_v45 = vld [vmem:[%s10500_s3 + $0x190] ss:$8 sps:$4 sm:$0xff]  }
 0x219   :  { %v1993_v20 = vpop.f32.mrf.mxu0  ;;  %v7900_v9 = vld [vmem:[%s10497_s0 + $0xb0] sm:$0xff]   ;;  %5575 = vmatpush1.bf16.msra.mxu0 %v7942_v45 }
 0x21a   :  { %10645 = vst [vmem:[#allocation34_spill] sm:$0xff] %v9322_v52  ;;  %v9331_v44 = vadd.f32 %v1993_v20, %v10647_v30  ;;  %v9342_v52 = vpop.f32.mrf.mxu1  ;;  %v7947_v20 = vld [vmem:[%s10500_s3 + $0x184] ss:$8 sps:$4 sm:$0xff]  }
 0x21b   :  { %v1995_v35 = vpop.f32.mrf.mxu0  ;;  %10651 = vst [vmem:[#allocation97_spill] sm:$0xff] %v9342_v52  ;;  %v10652_v30 = vld [vmem:[#allocation37_spill] sm:$0xff]  ;;  %5576 = vmatprep.subr.bf16.mxu0 %v7947_v20  ;;  %v10659_v52 = vld [vmem:[#allocation40_spill] sm:$0xff] }
 0x21c   :  { %10648 = vst [vmem:[#allocation35_spill] sm:$0xff] %v9331_v44  ;;  %v9340_v34 = vadd.f32 %v1995_v35, %v10649_v48  ;;  %v9358_v35 = vpop.f32.mrf.mxu1 }
 0x21d   :  { %v1997_v63 = vpop.f32.mrf.mxu0  ;;  %5577 = vmatpush1.bf16.msra.mxu0 %v7945_v15  ;;  %10656 = vst [vmem:[#allocation98_spill] sm:$0xff] %v9358_v35  ;;  %v10665_v35 = vld [vmem:[#allocation42_spill] sm:$0xff] }
 0x21e   :  { %10650 = vst [vmem:[#allocation36_spill] sm:$0xff] %v9340_v34  ;;  %v9348_v44 = vadd.f32 %v1997_v63, %v10652_v30  ;;  %v10657_v34 = vld [vmem:[#allocation39_spill] sm:$0xff]  ;;  %v9369_v20 = vpop.f32.mrf.mxu1 }
 0x21f   :  { %v2001_v2 = vpop.f32.mrf.mxu0  ;;  %7206 = vmatmul.mubr.msk.bf16.gmra.mxu0 %vm237_vm1, %v7900_v9 }
 0x220   :  { %10653 = vst [vmem:[#allocation37_spill] sm:$0xff] %v9348_v44  ;;  %v9355_v45 = vadd.f32 %v2001_v2, %v10654_v11  ;;  %3671 = vmatprep.mubr.bf16.mxu0 %v10518_v59  ;;  %v7901_v44 = vld [vmem:[%s10497_s0 + $0xb8] sm:$0xff]  }
 0x221   :  { %v2003_v48 = vpop.f32.mrf.mxu0 }
 0x222   :  { %10655 = vst [vmem:[#allocation38_spill] sm:$0xff] %v9355_v45  ;;  %v9361_v63 = vadd.f32 %v2003_v48, %v10657_v34  ;;  %v10662_v45 = vld [vmem:[#allocation41_spill] sm:$0xff]  ;;  %v9379_v48 = vpop.f32.mrf.mxu1 }
 0x223   :  { %v2005_v30 = vpop.f32.mrf.mxu0  ;;  %10664 = vst [vmem:[#allocation100_spill] sm:$0xff] %v9379_v48  ;;  %v10673_v48 = vld [vmem:[#allocation46_spill] sm:$0xff] }
 0x224   :  { %10658 = vst [vmem:[#allocation39_spill] sm:$0xff] %v9361_v63  ;;  %v9367_v9 = vadd.f32 %v2005_v30, %v10659_v52 }
 0x225   :  { %v2007_v2 = vpop.f32.mrf.mxu0 }
 0x226   :  { %10660 = vst [vmem:[#allocation40_spill] sm:$0xff] %v9367_v9  ;;  %v9372_v11 = vadd.f32 %v2007_v2, %v8798_v58  ;;  %v7902_v58 = vld [vmem:[%s10497_s0 + $0xc0] sm:$0xff]   ;;  %v10667_v2 = vld [vmem:[#allocation43_spill] sm:$0xff]  ;;  %v10670_v9 = vld [vmem:[#allocation45_spill] sm:$0xff] }
 0x227   :  { %v2011_v15 = vpop.f32.mrf.mxu0  ;;  %7207 = vmatmul.mubr.msk.bf16.gmra.mxu0 %vm237_vm1, %v7901_v44  ;;  %v9390_v44 = vpop.f32.mrf.mxu1 }
 0x228   :  { %10661 = vst [vmem:[#allocation99_spill] sm:$0xff] %v9372_v11  ;;  %v9376_v34 = vadd.f32 %v2011_v15, %v10662_v45  ;;  %3681 = vmatprep.mubr.bf16.mxu0 %v10518_v59 }
 0x229   :  { %v2013_v63 = vpop.f32.mrf.mxu0 }
 0x22a   :  { %10663 = vst [vmem:[#allocation41_spill] sm:$0xff] %v9376_v34  ;;  %v9382_v52 = vadd.f32 %v2013_v63, %v10665_v35  ;;  %v9400_v63 = vpop.f32.mrf.mxu1 }
 0x22b   :  { %v2015_v30 = vpop.f32.mrf.mxu0  ;;  %10672 = vst [vmem:[#allocation102_spill] sm:$0xff] %v9400_v63 }
 0x22c   :  { %10666 = vst [vmem:[#allocation42_spill] sm:$0xff] %v9382_v52  ;;  %v9388_v11 = vadd.f32 %v2015_v30, %v10667_v2  ;;  %v7952_v2 = vld [vmem:[%s10500_s3 + $0xf4] ss:$8 sps:$4 sm:$0xff]  }
 0x22d   :  { %v2017_v45 = vpop.f32.mrf.mxu0  ;;  %4820 = vmatprep.subr.bf16.mxu1 %v7952_v2  ;;  %v7907_v2 = vld [vmem:[%s10497_s0 + $0xd0] sm:$0xff]  }
 0x22e   :  { %10668 = vst [vmem:[#allocation43_spill] sm:$0xff] %v9388_v11  ;;  %v9393_v15 = vadd.f32 %v2017_v45, %v8818_v62  ;;  %v10675_v45 = vld [vmem:[#allocation47_spill] sm:$0xff] }
 0x22f   :  { %v2021_v34 = vpop.f32.mrf.mxu0  ;;  %7208 = vmatmul.mubr.msk.bf16.gmra.mxu0 %vm237_vm1, %v7902_v58  ;;  %v7906_v58 = vld [vmem:[%s10497_s0 + $0xc8] sm:$0xff]  }
 0x230   :  { %10669 = vst [vmem:[#allocation101_spill] sm:$0xff] %v9393_v15  ;;  %v9397_v35 = vadd.f32 %v2021_v34, %v10670_v9  ;;  %3691 = vmatprep.mubr.bf16.mxu0 %v10518_v59  ;;  %v9414_v34 = vpop.f32.mrf.mxu1 }
 0x231   :  { %v2023_v52 = vpop.f32.mrf.mxu0 }
 0x232   :  { %10671 = vst [vmem:[#allocation45_spill] sm:$0xff] %v9397_v35  ;;  %v9403_v30 = vadd.f32 %v2023_v52, %v10673_v48  ;;  %v10678_v48 = vld [vmem:[#allocation50_spill] sm:$0xff] }
 0x233   :  { %v2025_v62 = vpop.f32.mrf.mxu0 }
 0x234   :  { %10674 = vst [vmem:[#allocation46_spill] sm:$0xff] %v9403_v30  ;;  %v9412_v9 = vadd.f32 %v2025_v62, %v10675_v45  ;;  %v9423_v30 = vpop.f32.mrf.mxu1  ;;  %v10681_v45 = vld [vmem:[#allocation51_spill] sm:$0xff] }
 0x235   :  { %v9416_v35 = vpop.f32.mrf.mxu0 }
 0x236   :  { %10676 = vst [vmem:[#allocation47_spill] sm:$0xff] %v9412_v9  ;;  %10677 = vst [vmem:[#allocation103_spill] sm:$0xff] %v9416_v35 }
 0x237   :  { %v2031_v15 = vpop.f32.mrf.mxu0  ;;  %7209 = vmatmul.mubr.msk.bf16.gmra.mxu0 %vm237_vm1, %v7906_v58  ;;  %v9434_v58 = vpop.f32.mrf.mxu1 }
 0x238   :  { %v9420_v52 = vadd.f32 %v2031_v15, %v10678_v48  ;;  %3701 = vmatprep.mubr.bf16.mxu0 %v10518_v59 }
 0x239   :  { %v2033_v11 = vpop.f32.mrf.mxu0 }
 0x23a   :  { %10679 = vst [vmem:[#allocation50_spill] sm:$0xff] %v9420_v52  ;;  %v9426_v63 = vadd.f32 %v2033_v11, %v8852_v51  ;;  %v9443_v51 = vpop.f32.mrf.mxu1 }
 0x23b   :  { %v2035_v62 = vpop.f32.mrf.mxu0 }
 0x23c   :  { %10680 = vst [vmem:[#allocation104_spill] sm:$0xff] %v9426_v63  ;;  %v9432_v9 = vadd.f32 %v2035_v62, %v10681_v45  ;;  %v7908_v45 = vld [vmem:[%s10497_s0 + $0xd8] sm:$0xff]  }
 0x23d   :  { %v9436_v15 = vpop.f32.mrf.mxu0 }
 0x23e   :  { %10682 = vst [vmem:[#allocation51_spill] sm:$0xff] %v9432_v9  ;;  %10683 = vst [vmem:[#allocation105_spill] sm:$0xff] %v9436_v15 }
 0x23f   :  { %v2041_v48 = vpop.f32.mrf.mxu0  ;;  %7210 = vmatmul.mubr.msk.bf16.gmra.mxu0 %vm237_vm1, %v7907_v2  ;;  %v9454_v2 = vpop.f32.mrf.mxu1 }
 0x240   :  { %v9440_v52 = vadd.f32 %v2041_v48, %v8868_v14  ;;  %3711 = vmatprep.mubr.bf16.mxu0 %v10518_v59  ;;  %10687 = vst [vmem:[#allocation109_spill] sm:$0xff] %v9454_v2  ;;  %v10689_v48 = vld [vmem:[#allocation8_spill] sm:$0xff] }
 0x241   :  { %v2043_v11 = vpop.f32.mrf.mxu0  ;;  %v9466_v35 = vpop.f32.mrf.mxu1 }
 0x242   :  { %10684 = vst [vmem:[#allocation106_spill] sm:$0xff] %v9440_v52  ;;  %v9446_v63 = vadd.f32 %v2043_v11, %v8875_v3  ;;  %v1417_v52 = vadd.f32 %v8896_v22, %v10689_v48  ;;  %v10690_v3 = vld [vmem:[#allocation9_spill] sm:$0xff] }
 0x243   :  { %v2045_v62 = vpop.f32.mrf.mxu0  ;;  %v1418_v11 = vadd.f32 %v8905_v33, %v10690_v3  ;;  %10692 = vst [vmem:[#allocation9_spill] sm:$0xff] %v9466_v35  ;;  %v9474_v48 = vpop.f32.mrf.mxu1 }
 0x244   :  { %10685 = vst [vmem:[#allocation107_spill] sm:$0xff] %v9446_v63  ;;  %v9452_v9 = vadd.f32 %v2045_v62, %v8886_v31  ;;  %v10693_v62 = vld [vmem:[#allocation10_spill] sm:$0xff] }
 0x245   :  { %v9456_v14 = vpop.f32.mrf.mxu0 }
 0x246   :  { %10686 = vst [vmem:[#allocation108_spill] sm:$0xff] %v9452_v9  ;;  %10688 = vst [vmem:[#allocation110_spill] sm:$0xff] %v9456_v14  ;;  %v1419_v9 = vadd.f32 %v8910_v5, %v10693_v62 }
 0x247   :  { %v2051_v15 = vpop.f32.mrf.mxu0  ;;  %7211 = vmatmul.mubr.msk.bf16.gmra.mxu0 %vm237_vm1, %v7908_v45 }
 0x248   :  { %v9463_v63 = vadd.f32 %v2051_v15, %v1417_v52  ;;  %5594 = vmatprep.mubr.bf16.mxu0 %v10518_v59  ;;  %v2987_v52 = vadd.f32 %v8929_v36, %v8871_v29  ;;  %v10697_v15 = vld [vmem:[#allocation54_spill] sm:$0xff] }
 0x249   :  { %v2053_v31 = vpop.f32.mrf.mxu0  ;;  %v2988_v3 = vadd.f32 %v8936_v39, %v10697_v15  ;;  %v2991_v39 = vadd.f32 %v8954_v18, %v8901_v40  ;;  %v10698_v15 = vld [vmem:[#allocation56_spill] sm:$0xff] }
 0x24a   :  { %10691 = vst [vmem:[#allocation8_spill] sm:$0xff] %v9463_v63  ;;  %v9470_v14 = vadd.f32 %v2053_v31, %v1418_v11  ;;  %v9482_v63 = vpop.f32.mrf.mxu1 }
 0x24b   :  { %v2055_v2 = vpop.f32.mrf.mxu0 }
 0x24c   :  { %10694 = vst [vmem:[#allocation10_spill] sm:$0xff] %v9470_v14  ;;  %v9472_v22 = vadd.f32 %v2055_v2, %v1419_v9  ;;  %v2989_v9 = vadd.f32 %v8941_v16, %v8889_v46  ;;  %v2990_v2 = vadd.f32 %v8949_v0, %v8894_v28  ;;  %v10699_v0 = vld [vmem:[#allocation57_spill] sm:$0xff] }
 0x24d   :  { %v9476_v45 = vpop.f32.mrf.mxu0 }
 0x24e   :  { %10695 = vst [vmem:[#allocation111_spill] sm:$0xff] %v9472_v22  ;;  %10696 = vst [vmem:[#allocation112_spill] sm:$0xff] %v9476_v45  ;;  %v9488_v22 = vpop.f32.mrf.mxu1 }
 0x24f   :  { %v3483_v33 = vpop.f32.mrf.mxu0 }
 0x250   :  { %v3818_v5 = vadd.f32 %v3483_v33, %v2987_v52  ;;  %v9494_v52 = vpop.f32.mrf.mxu1 }
 0x251   :  { %v3485_v35 = vpop.f32.mrf.mxu0 }
 0x252   :  { %v3819_v11 = vadd.f32 %v3485_v35, %v2988_v3  ;;  %v2992_v35 = vadd.f32 %v8961_v42, %v10698_v15 }
 0x253   :  { %v3487_v31 = vpop.f32.mrf.mxu0 }
 0x254   :  { %v4106_v62 = vmax.f32 %v3818_v5, %v3819_v11  ;;  %v3820_v29 = vadd.f32 %v3487_v31, %v2989_v9  ;;  %v2993_v5 = vadd.f32 %v8966_v38, %v10699_v0  ;;  %v10700_v11 = vld [vmem:[#allocation59_spill] sm:$0xff]  ;;  %v9500_v9 = vpop.f32.mrf.mxu1  ;;  %v10702_v38 = vld [vmem:[#allocation61_spill] sm:$0xff] }
 0x255   :  { %v3489_v45 = vpop.f32.mrf.mxu0  ;;  %v2996_v15 = vadd.f32 %v8986_v61, %v10702_v38 }
 0x256   :  { %v3821_v36 = vadd.f32 %v3489_v45, %v2990_v2  ;;  %v2994_v45 = vadd.f32 %v8974_v47, %v10700_v11 }
 0x257   :  { %v3493_v14 = vpop.f32.mrf.mxu0 }
 0x258   :  { %v4107_v33 = vmax.f32 %v3820_v29, %v3821_v36  ;;  %v3822_v16 = vadd.f32 %v3493_v14, %v2991_v39  ;;  %v9505_v29 = vld [vmem:[%s10499_s2] ss:$0 sm:$0xff] }
 0x259   :  { %v3495_v46 = vpop.f32.mrf.mxu0  ;;  %v10701_v36 = vld [vmem:[#allocation60_spill] sm:$0xff] }
 0x25a   :  { %v3823_v3 = vadd.f32 %v3495_v46, %v2992_v35  ;;  %v2995_v39 = vadd.f32 %v8979_v25, %v10701_v36  ;;  %v9511_v35 = vpop.f32.mrf.mxu1 }
 0x25b   :  { %v3497_v28 = vpop.f32.mrf.mxu0 }
 0x25c   :  { %v4108_v31 = vmax.f32 %v3822_v16, %v3823_v3  ;;  %v3824_v2 = vadd.f32 %v3497_v28, %v2993_v5  ;;  %v10703_v5 = vld [vmem:[#allocation62_spill] sm:$0xff]  ;;  %v9519_v61 = vpop.f32.mrf.mxu1 }
 0x25d   :  { %v3499_v40 = vpop.f32.mrf.mxu0  ;;  %v2997_v11 = vadd.f32 %v9003_v1, %v10703_v5 }
 0x25e   :  { %v4154_v18 = vmax.f32 %v4106_v62, %v4108_v31  ;;  %v3825_v42 = vadd.f32 %v3499_v40, %v2994_v45  ;;  %v10704_v45 = vld [vmem:[#allocation63_spill] sm:$0xff] }
 0x25f   :  { %v3503_v14 = vpop.f32.mrf.mxu0  ;;  %v2998_v31 = vadd.f32 %v9013_v50, %v10704_v45  ;;  %v9525_v50 = vpop.f32.mrf.mxu1 }
 0x260   :  { %v4109_v47 = vmax.f32 %v3824_v2, %v3825_v42  ;;  %v4185_v62 = vadd.f32 %v9505_v29, %v4154_v18  ;;  %v3826_v3 = vadd.f32 %v3503_v14, %v2995_v39  ;;  %v10705_v14 = vld [vmem:[#allocation64_spill] sm:$0xff] }
 0x261   :  { %v3505_v46 = vpop.f32.mrf.mxu0  ;;  %v2999_v39 = vadd.f32 %v9024_v17, %v10705_v14  ;;  %v9531_v17 = vpop.f32.mrf.mxu1 }
 0x262   :  { %v4155_v16 = vmax.f32 %v4107_v33, %v4109_v47  ;;  %v3827_v28 = vadd.f32 %v3505_v46, %v2996_v15  ;;  %v4209_v42 = vmax.f32 %v4185_v62, 0.0  ;;  %v10706_v15 = vld [vmem:[#allocation65_spill] sm:$0xff]  ;;  %v3001_v62 = vadd.f32 %v9045_v37, %v8972_v10  ;;  %v7950_v10 = vld [vmem:[%s10500_s3 + $0xf0] ss:$8 sps:$4 sm:$0xff]  }
 0x263   :  { %v3507_v0 = vpop.f32.mrf.mxu0  ;;  %v3000_v1 = vadd.f32 %v9034_v4, %v10706_v15  ;;  %v7956_v37 = vld [vmem:[%s10500_s3 + $0xe4] ss:$8 sps:$4 sm:$0xff]  }
 0x264   :  { %v4186_v25 = vadd.f32 %v9505_v29, %v4155_v16  ;;  %v4110_v40 = vmax.f32 %v3826_v3, %v3827_v28  ;;  %v3828_v38 = vadd.f32 %v3507_v0, %v2997_v11  ;;  %v10707_v0 = vld [vmem:[#allocation66_spill] sm:$0xff] }
 0x265   :  { %v3509_v2 = vpop.f32.mrf.mxu0  ;;  %v3002_v11 = vadd.f32 %v9055_v26, %v10707_v0  ;;  %v9543_v26 = vpop.f32.mrf.mxu1 }
 0x266   :  { %v4210_v36 = vmax.f32 %v4186_v25, 0.0  ;;  %v3829_v18 = vadd.f32 %v3509_v2, %v2998_v31 }
 0x267   :  { %v3513_v33 = vpop.f32.mrf.mxu0  ;;  %v9555_v0 = vpop.f32.mrf.mxu1 }
 0x268   :  { %v7536_v47 = vpack.c.bf16 %v4210_v36, %v4209_v42  ;;  %v4111_v46 = vmax.f32 %v3828_v38, %v3829_v18  ;;  %v3830_v3 = vadd.f32 %v3513_v33, %v2999_v39  ;;  %v10708_v36 = vld [vmem:[#allocation67_spill] sm:$0xff]  ;;  %v10709_v18 = vld [vmem:[#allocation68_spill] sm:$0xff] }
 0x269   :  { %v3515_v16 = vpop.f32.mrf.mxu0  ;;  %v3003_v38 = vadd.f32 %v9072_v57, %v10708_v36  ;;  %v3004_v33 = vadd.f32 %v9082_v53, %v10709_v18  ;;  %v9567_v18 = vpop.f32.mrf.mxu1 }
 0x26a   :  { %7537 = vst [vmem:[#allocation4] sm:$0xff] %v7536_v47   ;;  %v3831_v28 = vadd.f32 %v3515_v16, %v3000_v1  ;;  %v10710_v16 = vld [vmem:[#allocation69_spill] sm:$0xff] }
 0x26b   :  { %v3517_v5 = vpop.f32.mrf.mxu0  ;;  %v3005_v53 = vadd.f32 %v9093_v13, %v10710_v16  ;;  %v7960_v13 = vld [vmem:[%s10500_s3 + $0xd4] ss:$8 sps:$4 sm:$0xff]  }
 0x26c   :  { %v4112_v45 = vmax.f32 %v3830_v3, %v3831_v28  ;;  %v3832_v25 = vadd.f32 %v3517_v5, %v3001_v62  ;;  %v3006_v28 = vadd.f32 %v9103_v60, %v9006_v19  ;;  %v10711_v16 = vld [vmem:[#allocation70_spill] sm:$0xff] }
 0x26d   :  { %v3519_v31 = vpop.f32.mrf.mxu0 }
 0x26e   :  { %v4156_v4 = vmax.f32 %v4110_v40, %v4112_v45  ;;  %v3833_v2 = vadd.f32 %v3519_v31, %v3002_v11 }
 0x26f   :  { %v3523_v42 = vpop.f32.mrf.mxu0 }
 0x270   :  { %v4113_v14 = vmax.f32 %v3832_v25, %v3833_v2  ;;  %v4187_v15 = vadd.f32 %v9505_v29, %v4156_v4  ;;  %v3834_v57 = vadd.f32 %v3523_v42, %v3003_v38  ;;  %v3007_v25 = vadd.f32 %v9114_v43, %v9010_v32  ;;  %v7958_v38 = vld [vmem:[%s10500_s3 + $0xd0] ss:$8 sps:$4 sm:$0xff]  }
 0x271   :  { %v3525_v40 = vpop.f32.mrf.mxu0  ;;  %v7921_v39 = vld [vmem:[#allocation4] sm:$0xff]   ;;  %v3008_v2 = vadd.f32 %v9124_v27, %v9016_v7  ;;  %v3009_v7 = vadd.f32 %v9135_v6, %v9022_v56  ;;  %v3010_v27 = vadd.f32 %v9151_v21, %v9027_v12  ;;  %v3011_v12 = vadd.f32 %v9168_v8, %v10711_v16  ;;  %v10712_v21 = vld [vmem:[#allocation71_spill] sm:$0xff] }
 0x272   :  { %v4157_v1 = vmax.f32 %v4111_v46, %v4113_v14  ;;  %v3835_v47 = vadd.f32 %v3525_v40, %v3004_v33  ;;  %4546 = vmatmul.mubr.bf16.vlgmr.msra.gmra.mxu1 %v7921_v39  ;;  %v7954_v46 = vld [vmem:[%s10500_s3 + $0xe0] ss:$8 sps:$4 sm:$0xff]   ;;  %v4211_v45 = vmax.f32 %v4187_v15, 0.0  ;;  %v7964_v14 = vld [vmem:[%s10500_s3 + $0xc4] ss:$8 sps:$4 sm:$0xff]   ;;  %v9579_v39 = vpop.f32.mrf.mxu1  ;;  %v10717_v16 = vld [vmem:[#allocation91_spill] sm:$0xff] }
 0x273   :  { %v3527_v3 = vpop.f32.mrf.mxu0  ;;  %4555 = vmatprep.mubr.bf16.mxu1 %v10518_v59  ;;  %4821 = vmatpush1.bf16.msra.mxu1 %v7950_v10  ;;  %v7962_v40 = vld [vmem:[%s10500_s3 + $0xc0] ss:$8 sps:$4 sm:$0xff]  }
 0x274   :  { %v4188_v5 = vadd.f32 %v9505_v29, %v4157_v1  ;;  %v4114_v62 = vmax.f32 %v3834_v57, %v3835_v47  ;;  %4822 = vmatprep.subr.bf16.mxu1 %v7956_v37  ;;  %v3836_v60 = vadd.f32 %v3527_v3, %v3005_v53  ;;  %v7968_v1 = vld [vmem:[%s10500_s3 + $0xb4] ss:$8 sps:$4 sm:$0xff]   ;;  %v3012_v53 = vadd.f32 %v9184_v54, %v10712_v21  ;;  %v10718_v21 = vld [vmem:[#allocation76_spill] sm:$0xff] }
 0x275   :  { %v3529_v11 = vpop.f32.mrf.mxu0 }
 0x276   :  { %v4212_v19 = vmax.f32 %v4188_v5, 0.0  ;;  %v3837_v31 = vadd.f32 %v3529_v11, %v3006_v28  ;;  %v7966_v28 = vld [vmem:[%s10500_s3 + $0xb0] ss:$8 sps:$4 sm:$0xff]   ;;  %v7972_v5 = vld [vmem:[%s10500_s3 + $0xa4] ss:$8 sps:$4 sm:$0xff]  }
 0x277   :  { %v3533_v4 = vpop.f32.mrf.mxu0  ;;  %4823 = vmatpush1.bf16.msra.mxu1 %v7954_v46 }
 0x278   :  { %v7541_v42 = vpack.c.bf16 %v4212_v19, %v4211_v45  ;;  %v4115_v36 = vmax.f32 %v3836_v60, %v3837_v31  ;;  %4824 = vmatprep.subr.bf16.mxu1 %v7960_v13  ;;  %v3838_v32 = vadd.f32 %v3533_v4, %v3007_v25  ;;  %v3013_v19 = vadd.f32 %v9195_v24, %v9043_v41  ;;  %v10713_v31 = vld [vmem:[#allocation72_spill] sm:$0xff]  ;;  %v7976_v41 = vld [vmem:[%s10500_s3 + $0x94] ss:$8 sps:$4 sm:$0xff]  }
 0x279   :  { %v3535_v33 = vpop.f32.mrf.mxu0  ;;  %v3014_v4 = vadd.f32 %v9205_v55, %v10713_v31  ;;  %v10721_v31 = vld [vmem:[#allocation93_spill] sm:$0xff] }
 0x27a   :  { %7593 = vst [vmem:[#allocation4 + $0x8] sm:$0xff] %v7541_v42   ;;  %v3839_v43 = vadd.f32 %v3535_v33, %v3008_v2  ;;  %v7970_v42 = vld [vmem:[%s10500_s3 + $0xa0] ss:$8 sps:$4 sm:$0xff]  }
 0x27b   :  { %v3537_v10 = vpop.f32.mrf.mxu0  ;;  %4825 = vmatpush1.bf16.msra.mxu1 %v7958_v38 }
 0x27c   :  { %v4116_v37 = vmax.f32 %v3838_v32, %v3839_v43  ;;  %4826 = vmatprep.subr.bf16.mxu1 %v7964_v14  ;;  %v3840_v47 = vadd.f32 %v3537_v10, %v3009_v7  ;;  %v10714_v43 = vld [vmem:[#allocation73_spill] sm:$0xff]  ;;  %v10715_v7 = vld [vmem:[#allocation74_spill] sm:$0xff] }
 0x27d   :  { %v3539_v15 = vpop.f32.mrf.mxu0  ;;  %v3015_v10 = vadd.f32 %v9216_v49, %v10714_v43 }
 0x27e   :  { %v4158_v57 = vmax.f32 %v4114_v62, %v4116_v37  ;;  %v3841_v56 = vadd.f32 %v3539_v15, %v3010_v27  ;;  %v9594_v62 = vpop.f32.mrf.mxu1  ;;  %v3016_v27 = vadd.f32 %v9226_v23, %v10715_v7  ;;  %v7974_v15 = vld [vmem:[%s10500_s3 + $0x90] ss:$8 sps:$4 sm:$0xff]  }
 0x27f   :  { %v3543_v6 = vpop.f32.mrf.mxu0  ;;  %4827 = vmatpush1.bf16.msra.mxu1 %v7962_v40  ;;  %v10716_v23 = vld [vmem:[#allocation75_spill] sm:$0xff] }
 0x280   :  { %v4117_v3 = vmax.f32 %v3840_v47, %v3841_v56  ;;  %4828 = vmatprep.subr.bf16.mxu1 %v7968_v1  ;;  %v4189_v8 = vadd.f32 %v9505_v29, %v4158_v57  ;;  %v3842_v45 = vadd.f32 %v3543_v6, %v3011_v12  ;;  %v7980_v47 = vld [vmem:[%s10500_s3 + $0x84] ss:$8 sps:$4 sm:$0xff]   ;;  %v3017_v12 = vadd.f32 %v10717_v16, %v10716_v23  ;;  %v10724_v7 = vld [vmem:[#allocation79_spill] sm:$0xff] }
 0x281   :  { %v3545_v46 = vpop.f32.mrf.mxu0  ;;  %v7922_v11 = vld [vmem:[#allocation4 + $0x8] sm:$0xff]  }
 0x282   :  { %v4159_v13 = vmax.f32 %v4115_v36, %v4117_v3  ;;  %v3843_v54 = vadd.f32 %v3545_v46, %v3012_v53  ;;  %4556 = vmatmul.mubr.bf16.gmra.mxu1 %v7922_v11  ;;  %v9606_v36 = vpop.f32.mrf.mxu1  ;;  %v4213_v24 = vmax.f32 %v4189_v8, 0.0  ;;  %v10719_v53 = vld [vmem:[#allocation92_spill] sm:$0xff]  ;;  %v7985_v8 = vld [vmem:[%s10500_s3 + $0x174] ss:$8 sps:$4 sm:$0xff]  }
 0x283   :  { %v3547_v60 = vpop.f32.mrf.mxu0  ;;  %4565 = vmatprep.mubr.bf16.mxu1 %v10518_v59  ;;  %4829 = vmatpush1.bf16.msra.mxu1 %v7966_v28  ;;  %v3018_v3 = vadd.f32 %v10719_v53, %v10718_v21 }
 0x284   :  { %v4190_v25 = vadd.f32 %v9505_v29, %v4159_v13  ;;  %v4118_v2 = vmax.f32 %v3842_v45, %v3843_v54  ;;  %4830 = vmatprep.subr.bf16.mxu1 %v7972_v5  ;;  %v3844_v33 = vadd.f32 %v3547_v60, %v3013_v19  ;;  %v9618_v1 = vpop.f32.mrf.mxu1  ;;  %v7978_v5 = vld [vmem:[%s10500_s3 + $0x80] ss:$8 sps:$4 sm:$0xff]  }
 0x285   :  { %v3549_v38 = vpop.f32.mrf.mxu0  ;;  %v10720_v60 = vld [vmem:[#allocation77_spill] sm:$0xff] }
 0x286   :  { %v4214_v55 = vmax.f32 %v4190_v25, 0.0  ;;  %v3845_v14 = vadd.f32 %v3549_v38, %v3014_v4  ;;  %v9630_v46 = vpop.f32.mrf.mxu1  ;;  %v3019_v4 = vadd.f32 %v10721_v31, %v10720_v60  ;;  %v10722_v25 = vld [vmem:[#allocation78_spill] sm:$0xff] }
 0x287   :  { %v3553_v32 = vpop.f32.mrf.mxu0  ;;  %4831 = vmatpush1.bf16.msra.mxu1 %v7970_v42  ;;  %v10723_v42 = vld [vmem:[#allocation94_spill] sm:$0xff] }
 0x288   :  { %v7546_v37 = vpack.c.bf16 %v4214_v55, %v4213_v24  ;;  %v4119_v40 = vmax.f32 %v3844_v33, %v3845_v14  ;;  %4832 = vmatprep.subr.bf16.mxu1 %v7976_v41  ;;  %v3846_v49 = vadd.f32 %v3553_v32, %v3015_v10  ;;  %v3020_v38 = vadd.f32 %v10723_v42, %v10722_v25  ;;  %v9639_v24 = vpop.f32.mrf.mxu1  ;;  %v10732_v42 = vld [vmem:[#allocation83_spill] sm:$0xff] }
 0x289   :  { %v3555_v57 = vpop.f32.mrf.mxu0 }
 0x28a   :  { %7594 = vst [vmem:[#allocation4 + $0x10] sm:$0xff] %v7546_v37   ;;  %v3847_v56 = vadd.f32 %v3555_v57, %v3016_v27  ;;  %v10725_v27 = vld [vmem:[#allocation95_spill] sm:$0xff]  ;;  %v10727_v57 = vld [vmem:[#allocation96_spill] sm:$0xff] }
 0x28b   :  { %v3557_v6 = vpop.f32.mrf.mxu0  ;;  %4833 = vmatpush1.bf16.msra.mxu1 %v7974_v15  ;;  %v3021_v37 = vadd.f32 %v10725_v27, %v10724_v7  ;;  %v10726_v15 = vld [vmem:[#allocation80_spill] sm:$0xff] }
 0x28c   :  { %v4120_v28 = vmax.f32 %v3846_v49, %v3847_v56  ;;  %4834 = vmatprep.subr.bf16.mxu1 %v7980_v47  ;;  %v3848_v45 = vadd.f32 %v3557_v6, %v3017_v12  ;;  %v3022_v47 = vadd.f32 %v10727_v57, %v10726_v15  ;;  %v9648_v6 = vpop.f32.mrf.mxu1  ;;  %v10736_v57 = vld [vmem:[#allocation86_spill] sm:$0xff] }
 0x28d   :  { %v3559_v11 = vpop.f32.mrf.mxu0 }
 0x28e   :  { %v4160_v13 = vmax.f32 %v4118_v2, %v4120_v28  ;;  %v3849_v54 = vadd.f32 %v3559_v11, %v3018_v3  ;;  %v10728_v3 = vld [vmem:[#allocation81_spill] sm:$0xff]  ;;  %v10730_v11 = vld [vmem:[#allocation82_spill] sm:$0xff] }
 0x28f   :  { %v3563_v19 = vpop.f32.mrf.mxu0  ;;  %4835 = vmatpush1.bf16.msra.mxu1 %v7978_v5  ;;  %v10729_v28 = vld [vmem:[#allocation97_spill] sm:$0xff] }
 0x290   :  { %v4121_v41 = vmax.f32 %v3848_v45, %v3849_v54  ;;  %5191 = vmatprep.subr.bf16.mxu1 %v7985_v8  ;;  %v4191_v14 = vadd.f32 %v9505_v29, %v4160_v13  ;;  %v3850_v2 = vadd.f32 %v3563_v19, %v3019_v4  ;;  %v3023_v5 = vadd.f32 %v10729_v28, %v10728_v3  ;;  %v10731_v8 = vld [vmem:[#allocation98_spill] sm:$0xff]  ;;  %v9654_v19 = vpop.f32.mrf.mxu1  ;;  %v10738_v28 = vld [vmem:[#allocation87_spill] sm:$0xff] }
 0x291   :  { %v3565_v55 = vpop.f32.mrf.mxu0  ;;  %v7935_v33 = vld [vmem:[#allocation4 + $0x10] sm:$0xff]   ;;  %v3024_v13 = vadd.f32 %v10731_v8, %v10730_v11 }
 0x292   :  { %v4161_v32 = vmax.f32 %v4119_v40, %v4121_v41  ;;  %v3851_v43 = vadd.f32 %v3565_v55, %v3020_v38  ;;  %4566 = vmatmul.mubr.bf16.gmra.mxu1 %v7935_v33  ;;  %v4215_v16 = vmax.f32 %v4191_v14, 0.0  ;;  %v3025_v38 = vadd.f32 %v9369_v20, %v10732_v42  ;;  %v10733_v41 = vld [vmem:[#allocation84_spill] sm:$0xff] }
 0x293   :  { %v3567_v10 = vpop.f32.mrf.mxu0  ;;  %4575 = vmatprep.mubr.bf16.mxu1 %v10518_v59  ;;  %v10734_v55 = vld [vmem:[#allocation100_spill] sm:$0xff] }
 0x294   :  { %v4192_v49 = vadd.f32 %v9505_v29, %v4161_v32  ;;  %v4122_v56 = vmax.f32 %v3850_v2, %v3851_v43  ;;  %v3852_v12 = vadd.f32 %v3567_v10, %v3021_v37  ;;  %v3026_v33 = vadd.f32 %v10734_v55, %v10733_v41  ;;  %v9660_v32 = vpop.f32.mrf.mxu1  ;;  %v10735_v37 = vld [vmem:[#allocation85_spill] sm:$0xff] }
 0x295   :  { %v3569_v23 = vpop.f32.mrf.mxu0  ;;  %v3027_v15 = vadd.f32 %v9390_v44, %v10735_v37  ;;  %v10739_v44 = vld [vmem:[#allocation88_spill] sm:$0xff] }
 0x296   :  { %v4216_v40 = vmax.f32 %v4192_v49, 0.0  ;;  %v3853_v21 = vadd.f32 %v3569_v23, %v3022_v47  ;;  %v10737_v47 = vld [vmem:[#allocation102_spill] sm:$0xff]  ;;  %v3030_v8 = vadd.f32 %v9423_v30, %v10739_v44  ;;  %v10742_v37 = vld [vmem:[#allocation12_spill] sm:$0xff] }
 0x297   :  { %v3573_v53 = vpop.f32.mrf.mxu0  ;;  %v3028_v49 = vadd.f32 %v10737_v47, %v10736_v57  ;;  %v10741_v30 = vld [vmem:[#allocation90_spill] sm:$0xff]  ;;  %v10744_v47 = vld [vmem:[#allocation13_spill] sm:$0xff] }
 0x298   :  { %v7551_v45 = vpack.c.bf16 %v4216_v40, %v4215_v16  ;;  %v4123_v54 = vmax.f32 %v3852_v12, %v3853_v21  ;;  %v3854_v31 = vadd.f32 %v3573_v53, %v3023_v5  ;;  %v9666_v16 = vpop.f32.mrf.mxu1  ;;  %v3029_v5 = vadd.f32 %v9414_v34, %v10738_v28  ;;  %v10747_v28 = vld [vmem:[#allocation15_spill] sm:$0xff] }
 0x299   :  { %v3575_v60 = vpop.f32.mrf.mxu0  ;;  %v3032_v55 = vadd.f32 %v9443_v51, %v10741_v30 }
 0x29a   :  { %7595 = vst [vmem:[#allocation4 + $0x18] sm:$0xff] %v7551_v45   ;;  %v3855_v4 = vadd.f32 %v3575_v60, %v3024_v13  ;;  %v9675_v60 = vpop.f32.mrf.mxu1 }
 0x29b   :  { %v3577_v25 = vpop.f32.mrf.mxu0 }
 0x29c   :  { %v4124_v14 = vmax.f32 %v3854_v31, %v3855_v4  ;;  %v3856_v10 = vadd.f32 %v3577_v25, %v3025_v38  ;;  %v10740_v38 = vld [vmem:[#allocation89_spill] sm:$0xff] }
 0x29d   :  { %v3579_v2 = vpop.f32.mrf.mxu0  ;;  %v3031_v41 = vadd.f32 %v9434_v58, %v10740_v38 }
 0x29e   :  { %v4162_v43 = vmax.f32 %v4122_v56, %v4124_v14  ;;  %v3857_v7 = vadd.f32 %v3579_v2, %v3026_v33  ;;  %v9682_v2 = vpop.f32.mrf.mxu1 }
 0x29f   :  { %v3583_v27 = vpop.f32.mrf.mxu0 }
 0x2a0   :  { %v4125_v23 = vmax.f32 %v3856_v10, %v3857_v7  ;;  %v4193_v12 = vadd.f32 %v9505_v29, %v4162_v43  ;;  %v3858_v53 = vadd.f32 %v3583_v27, %v3027_v15  ;;  %v10743_v15 = vld [vmem:[#allocation109_spill] sm:$0xff]  ;;  %v9688_v58 = vpop.f32.mrf.mxu1 }
 0x2a1   :  { %v3585_v20 = vpop.f32.mrf.mxu0  ;;  %v7948_v40 = vld [vmem:[#allocation4 + $0x18] sm:$0xff]   ;;  %v3033_v57 = vadd.f32 %v10743_v15, %v10742_v37 }
 0x2a2   :  { %v4163_v21 = vmax.f32 %v4123_v54, %v4125_v23  ;;  %v3859_v3 = vadd.f32 %v3585_v20, %v3028_v49  ;;  %v7949_v56 = vld [vmem:[#allocation4 + $0x18] sm:$0xff]   ;;  %4576 = vmatmul.mubr.bf16.gmra.mxu1 %v7948_v40  ;;  %v4217_v31 = vmax.f32 %v4193_v12, 0.0  ;;  %v10745_v49 = vld [vmem:[#allocation9_spill] sm:$0xff]  ;;  %v9694_v44 = vpop.f32.mrf.mxu1 }
 0x2a3   :  { %v3587_v11 = vpop.f32.mrf.mxu0  ;;  %5595 = vmatmul.mubr.bf16.vlgmr.msra.gmra.mxu0 %v7949_v56  ;;  %4585 = vmatprep.mubr.bf16.mxu1 %v10518_v59  ;;  %v3034_v23 = vadd.f32 %v10745_v49, %v10744_v47 }
 0x2a4   :  { %v4194_v13 = vadd.f32 %v9505_v29, %v4163_v21  ;;  %v4126_v45 = vmax.f32 %v3858_v53, %v3859_v3  ;;  %5604 = vmatprep.mubr.bf16.mxu0 %v10518_v59  ;;  %v3860_v25 = vadd.f32 %v3587_v11, %v3029_v5  ;;  %v10746_v3 = vld [vmem:[#allocation14_spill] sm:$0xff]  ;;  %v3036_v5 = vadd.f32 %v9482_v63, %v10747_v28 }
 0x2a5   :  { %v3589_v54 = vpop.f32.mrf.mxu0  ;;  %v3035_v56 = vadd.f32 %v9474_v48, %v10746_v3  ;;  %v10749_v48 = vld [vmem:[#allocation17_spill] sm:$0xff] }
 0x2a6   :  { %v4218_v4 = vmax.f32 %v4194_v13, 0.0  ;;  %v3861_v34 = vadd.f32 %v3589_v54, %v3030_v8 }
 0x2a7   :  { %v3593_v42 = vpop.f32.mrf.mxu0 }
 0x2a8   :  { %v7556_v33 = vpack.c.bf16 %v4218_v4, %v4217_v31  ;;  %v4127_v14 = vmax.f32 %v3860_v25, %v3861_v34  ;;  %v3862_v10 = vadd.f32 %v3593_v42, %v3031_v41  ;;  %v10748_v34 = vld [vmem:[#allocation16_spill] sm:$0xff]  ;;  %v3038_v41 = vadd.f32 %v9494_v52, %v10749_v48  ;;  %v10751_v52 = vld [vmem:[#allocation19_spill] sm:$0xff] }
 0x2a9   :  { %v3595_v43 = vpop.f32.mrf.mxu0  ;;  %v3037_v42 = vadd.f32 %v9488_v22, %v10748_v34  ;;  %v3040_v15 = vadd.f32 %v9511_v35, %v10751_v52 }
 0x2aa   :  { %7596 = vst [vmem:[#allocation4 + $0x20] sm:$0xff] %v7556_v33   ;;  %v3863_v7 = vadd.f32 %v3595_v43, %v3032_v55  ;;  %v9703_v55 = vpop.f32.mrf.mxu1 }
 0x2ab   :  { %v3597_v27 = vpop.f32.mrf.mxu0 }
 0x2ac   :  { %v4128_v20 = vmax.f32 %v3862_v10, %v3863_v7  ;;  %v3864_v12 = vadd.f32 %v3597_v27, %v3033_v57  ;;  %v10750_v27 = vld [vmem:[#allocation18_spill] sm:$0xff]  ;;  %v9710_v49 = vpop.f32.mrf.mxu1 }
 0x2ad   :  { %v3599_v40 = vpop.f32.mrf.mxu0  ;;  %v3039_v37 = vadd.f32 %v9500_v9, %v10750_v27 }
 0x2ae   :  { %v4164_v51 = vmax.f32 %v4126_v45, %v4128_v20  ;;  %v3865_v21 = vadd.f32 %v3599_v40, %v3034_v23  ;;  %v9716_v9 = vpop.f32.mrf.mxu1 }
 0x2af   :  { %v3603_v53 = vpop.f32.mrf.mxu0 }
 0x2b0   :  { %v4129_v11 = vmax.f32 %v3864_v12, %v3865_v21  ;;  %v4195_v54 = vadd.f32 %v9505_v29, %v4164_v51  ;;  %v3866_v4 = vadd.f32 %v3603_v53, %v3035_v56  ;;  %v10752_v12 = vld [vmem:[#allocation20_spill] sm:$0xff]  ;;  %v10753_v53 = vld [vmem:[#allocation21_spill] sm:$0xff] }
 0x2b1   :  { %v3605_v8 = vpop.f32.mrf.mxu0  ;;  %v7953_v13 = vld [vmem:[#allocation4 + $0x20] sm:$0xff]   ;;  %v3041_v21 = vadd.f32 %v9519_v61, %v10752_v12  ;;  %v3042_v3 = vadd.f32 %v9525_v50, %v10753_v53 }
 0x2b2   :  { %v4165_v31 = vmax.f32 %v4127_v14, %v4129_v11  ;;  %v3867_v25 = vadd.f32 %v3605_v8, %v3036_v5  ;;  %v7957_v45 = vld [vmem:[#allocation4 + $0x20] sm:$0xff]   ;;  %4586 = vmatmul.mubr.bf16.gmra.mxu1 %v7953_v13  ;;  %v4219_v14 = vmax.f32 %v4195_v54, 0.0  ;;  %v10754_v13 = vld [vmem:[#allocation22_spill] sm:$0xff] }
 0x2b3   :  { %v3607_v38 = vpop.f32.mrf.mxu0  ;;  %5605 = vmatmul.mubr.bf16.gmra.mxu0 %v7957_v45  ;;  %4595 = vmatprep.mubr.bf16.mxu1 %v10518_v59  ;;  %v3043_v54 = vadd.f32 %v9531_v17, %v10754_v13  ;;  %v9722_v45 = vpop.f32.mrf.mxu1  ;;  %v10757_v17 = vld [vmem:[#allocation25_spill] sm:$0xff] }
 0x2b4   :  { %v4196_v63 = vadd.f32 %v9505_v29, %v4165_v31  ;;  %v4130_v30 = vmax.f32 %v3866_v4, %v3867_v25  ;;  %5614 = vmatprep.mubr.bf16.mxu0 %v10518_v59  ;;  %v3868_v10 = vadd.f32 %v3607_v38, %v3037_v42  ;;  %v10755_v31 = vld [vmem:[#allocation23_spill] sm:$0xff] }
 0x2b5   :  { %v3609_v33 = vpop.f32.mrf.mxu0  ;;  %v3044_v4 = vadd.f32 %v9543_v26, %v10755_v31  ;;  %v10762_v31 = vld [vmem:[#allocation30_spill] sm:$0xff] }
 0x2b6   :  { %v4220_v43 = vmax.f32 %v4196_v63, 0.0  ;;  %v3869_v22 = vadd.f32 %v3609_v33, %v3038_v41  ;;  %v10756_v63 = vld [vmem:[#allocation24_spill] sm:$0xff] }
 0x2b7   :  { %v3613_v7 = vpop.f32.mrf.mxu0 }
 0x2b8   :  { %v7561_v57 = vpack.c.bf16 %v4220_v43, %v4219_v14  ;;  %v4131_v47 = vmax.f32 %v3868_v10, %v3869_v22  ;;  %v3870_v20 = vadd.f32 %v3613_v7, %v3039_v37  ;;  %v3046_v14 = vadd.f32 %v9567_v18, %v10757_v17  ;;  %v9731_v10 = vpop.f32.mrf.mxu1  ;;  %v10759_v18 = vld [vmem:[#allocation27_spill] sm:$0xff] }
 0x2b9   :  { %v3615_v23 = vpop.f32.mrf.mxu0 }
 0x2ba   :  { %7597 = vst [vmem:[#allocation4 + $0x28] sm:$0xff] %v7561_v57   ;;  %v3871_v40 = vadd.f32 %v3615_v23, %v3040_v15  ;;  %v10758_v15 = vld [vmem:[#allocation26_spill] sm:$0xff] }
 0x2bb   :  { %v3617_v51 = vpop.f32.mrf.mxu0  ;;  %v3047_v57 = vadd.f32 %v9579_v39, %v10758_v15 }
 0x2bc   :  { %v4132_v56 = vmax.f32 %v3870_v20, %v3871_v40  ;;  %v3872_v5 = vadd.f32 %v3617_v51, %v3041_v21  ;;  %v9738_v40 = vpop.f32.mrf.mxu1 }
 0x2bd   :  { %v3619_v28 = vpop.f32.mrf.mxu0 }
 0x2be   :  { %v4166_v35 = vmax.f32 %v4130_v30, %v4132_v56  ;;  %v3873_v11 = vadd.f32 %v3619_v28, %v3042_v3  ;;  %v3045_v30 = vadd.f32 %v9555_v0, %v10756_v63  ;;  %v10760_v3 = vld [vmem:[#allocation28_spill] sm:$0xff]  ;;  %v10761_v28 = vld [vmem:[#allocation29_spill] sm:$0xff]  ;;  %v9744_v39 = vpop.f32.mrf.mxu1 }
 0x2bf   :  { %v3623_v8 = vpop.f32.mrf.mxu0  ;;  %v3049_v56 = vadd.f32 %v9606_v36, %v10760_v3 }
 0x2c0   :  { %v4133_v25 = vmax.f32 %v3872_v5, %v3873_v11  ;;  %v4197_v50 = vadd.f32 %v9505_v29, %v4166_v35  ;;  %v3874_v38 = vadd.f32 %v3623_v8, %v3043_v54  ;;  %v3050_v35 = vadd.f32 %v9618_v1, %v10761_v28 }
 0x2c1   :  { %v3625_v61 = vpop.f32.mrf.mxu0  ;;  %v7961_v34 = vld [vmem:[#allocation4 + $0x28] sm:$0xff]  }
 0x2c2   :  { %v4167_v42 = vmax.f32 %v4131_v47, %v4133_v25  ;;  %v3875_v48 = vadd.f32 %v3625_v61, %v3044_v4  ;;  %v7965_v41 = vld [vmem:[#allocation4 + $0x28] sm:$0xff]   ;;  %4596 = vmatmul.mubr.bf16.gmra.mxu1 %v7961_v34  ;;  %v4221_v7 = vmax.f32 %v4197_v50, 0.0  ;;  %v3048_v47 = vadd.f32 %v9594_v62, %v10759_v18  ;;  %v10763_v25 = vld [vmem:[#allocation31_spill] sm:$0xff]  ;;  %v9750_v50 = vpop.f32.mrf.mxu1 }
 0x2c3   :  { %v3627_v33 = vpop.f32.mrf.mxu0  ;;  %5615 = vmatmul.mubr.bf16.gmra.mxu0 %v7965_v41  ;;  %4605 = vmatprep.mubr.bf16.mxu1 %v10518_v59  ;;  %v3051_v4 = vadd.f32 %v9630_v46, %v10762_v31  ;;  %v3052_v61 = vadd.f32 %v9639_v24, %v10763_v25  ;;  %v10765_v46 = vld [vmem:[#allocation33_spill] sm:$0xff]  ;;  %v10771_v31 = vld [vmem:[#allocation39_spill] sm:$0xff] }
 0x2c4   :  { %v4198_v26 = vadd.f32 %v9505_v29, %v4167_v42  ;;  %v4134_v43 = vmax.f32 %v3874_v38, %v3875_v48  ;;  %5624 = vmatprep.mubr.bf16.mxu0 %v10518_v59  ;;  %v3876_v37 = vadd.f32 %v3627_v33, %v3045_v30  ;;  %v10764_v30 = vld [vmem:[#allocation32_spill] sm:$0xff] }
 0x2c5   :  { %v3629_v22 = vpop.f32.mrf.mxu0  ;;  %v3053_v33 = vadd.f32 %v9648_v6, %v10764_v30 }
 0x2c6   :  { %v4222_v27 = vmax.f32 %v4198_v26, 0.0  ;;  %v3877_v0 = vadd.f32 %v3629_v22, %v3046_v14  ;;  %v3054_v14 = vadd.f32 %v9654_v19, %v10765_v46  ;;  %v10767_v19 = vld [vmem:[#allocation35_spill] sm:$0xff] }
 0x2c7   :  { %v3633_v52 = vpop.f32.mrf.mxu0 }
 0x2c8   :  { %v7566_v23 = vpack.c.bf16 %v4222_v27, %v4221_v7  ;;  %v4135_v20 = vmax.f32 %v3876_v37, %v3877_v0  ;;  %v3878_v12 = vadd.f32 %v3633_v52, %v3047_v57  ;;  %v10766_v52 = vld [vmem:[#allocation34_spill] sm:$0xff]  ;;  %v3056_v57 = vadd.f32 %v9666_v16, %v10767_v19  ;;  %v7982_v19 = vld [vmem:[#allocation4 + $0x8] sm:$0xff]  }
 0x2c9   :  { %v3635_v51 = vpop.f32.mrf.mxu0  ;;  %v3055_v15 = vadd.f32 %v9660_v32, %v10766_v52 }
 0x2ca   :  { %7598 = vst [vmem:[#allocation4 + $0x30] sm:$0xff] %v7566_v23   ;;  %v3879_v21 = vadd.f32 %v3635_v51, %v3048_v47 }
 0x2cb   :  { %v3637_v53 = vpop.f32.mrf.mxu0 }
 0x2cc   :  { %v4136_v5 = vmax.f32 %v3878_v12, %v3879_v21  ;;  %v3880_v8 = vadd.f32 %v3637_v53, %v3049_v56  ;;  %v10768_v53 = vld [vmem:[#allocation36_spill] sm:$0xff]  ;;  %v10769_v56 = vld [vmem:[#allocation37_spill] sm:$0xff] }
 0x2cd   :  { %v3639_v11 = vpop.f32.mrf.mxu0  ;;  %v3057_v3 = vadd.f32 %v9675_v60, %v10768_v53  ;;  %v3058_v28 = vadd.f32 %v9682_v2, %v10769_v56  ;;  %v7987_v53 = vld [vmem:[%s10500_s3 + $0x160] ss:$8 sps:$4 sm:$0xff]  }
 0x2ce   :  { %v4168_v62 = vmax.f32 %v4134_v43, %v4136_v5  ;;  %v3881_v13 = vadd.f32 %v3639_v11, %v3050_v35  ;;  %v9759_v43 = vpop.f32.mrf.mxu1 }
 0x2cf   :  { %v3643_v54 = vpop.f32.mrf.mxu0 }
 0x2d0   :  { %v4137_v34 = vmax.f32 %v3880_v8, %v3881_v13  ;;  %v4199_v1 = vadd.f32 %v9505_v29, %v4168_v62  ;;  %v3882_v48 = vadd.f32 %v3643_v54, %v3051_v4  ;;  %v9766_v23 = vpop.f32.mrf.mxu1  ;;  %v10770_v13 = vld [vmem:[#allocation38_spill] sm:$0xff]  ;;  %v3060_v4 = vadd.f32 %v9694_v44, %v10771_v31 }
 0x2d1   :  { %v3645_v36 = vpop.f32.mrf.mxu0  ;;  %v7969_v42 = vld [vmem:[#allocation4 + $0x30] sm:$0xff]   ;;  %v3059_v54 = vadd.f32 %v9688_v58, %v10770_v13  ;;  %v10773_v58 = vld [vmem:[#allocation99_spill] sm:$0xff] }
 0x2d2   :  { %v4169_v38 = vmax.f32 %v4135_v20, %v4137_v34  ;;  %v3883_v41 = vadd.f32 %v3645_v36, %v3052_v61  ;;  %v7973_v63 = vld [vmem:[#allocation4 + $0x30] sm:$0xff]   ;;  %4606 = vmatmul.mubr.bf16.gmra.mxu1 %v7969_v42  ;;  %v4223_v7 = vmax.f32 %v4199_v1, 0.0  ;;  %v9772_v32 = vpop.f32.mrf.mxu1  ;;  %v3062_v30 = vadd.f32 %v9710_v49, %v10773_v58  ;;  %v10783_v58 = vld [vmem:[#allocation47_spill] sm:$0xff] }
 0x2d3   :  { %v3647_v17 = vpop.f32.mrf.mxu0  ;;  %5625 = vmatmul.mubr.bf16.gmra.mxu0 %v7973_v63  ;;  %4615 = vmatprep.mubr.bf16.mxu1 %v10518_v59  ;;  %v10775_v49 = vld [vmem:[#allocation42_spill] sm:$0xff] }
 0x2d4   :  { %v4200_v24 = vadd.f32 %v9505_v29, %v4169_v38  ;;  %v4138_v26 = vmax.f32 %v3882_v48, %v3883_v41  ;;  %5634 = vmatprep.mubr.bf16.mxu0 %v10518_v59  ;;  %v3884_v37 = vadd.f32 %v3647_v17, %v3053_v33  ;;  %v9778_v61 = vpop.f32.mrf.mxu1  ;;  %v10772_v48 = vld [vmem:[#allocation40_spill] sm:$0xff] }
 0x2d5   :  { %v3649_v22 = vpop.f32.mrf.mxu0  ;;  %v3061_v41 = vadd.f32 %v9703_v55, %v10772_v48 }
 0x2d6   :  { %v4224_v27 = vmax.f32 %v4200_v24, 0.0  ;;  %v3885_v6 = vadd.f32 %v3649_v22, %v3054_v14  ;;  %v9787_v17 = vpop.f32.mrf.mxu1 }
 0x2d7   :  { %v3653_v0 = vpop.f32.mrf.mxu0 }
 0x2d8   :  { %v7571_v18 = vpack.c.bf16 %v4224_v27, %v4223_v7  ;;  %v4139_v47 = vmax.f32 %v3884_v37, %v3885_v6  ;;  %v3886_v51 = vadd.f32 %v3653_v0, %v3055_v15  ;;  %v10774_v7 = vld [vmem:[#allocation41_spill] sm:$0xff]  ;;  %v7983_v0 = vld [vmem:[%s10500_s3 + $0x170] ss:$8 sps:$4 sm:$0xff]   ;;  %v9797_v52 = vpop.f32.mrf.mxu1 }
 0x2d9   :  { %v3655_v20 = vpop.f32.mrf.mxu0  ;;  %v3063_v27 = vadd.f32 %v9716_v9, %v10774_v7 }
 0x2da   :  { %7599 = vst [vmem:[#allocation4 + $0x38] sm:$0xff] %v7571_v18   ;;  %v3887_v12 = vadd.f32 %v3655_v20, %v3056_v57  ;;  %v7989_v57 = vld [vmem:[%s10500_s3 + $0x164] ss:$8 sps:$4 sm:$0xff]  }
 0x2db   :  { %v3657_v21 = vpop.f32.mrf.mxu0 }
 0x2dc   :  { %v4140_v35 = vmax.f32 %v3886_v51, %v3887_v12  ;;  %v3888_v11 = vadd.f32 %v3657_v21, %v3057_v3  ;;  %v10777_v51 = vld [vmem:[#allocation101_spill] sm:$0xff]  ;;  %v9810_v3 = vpop.f32.mrf.mxu1 }
 0x2dd   :  { %v3659_v5 = vpop.f32.mrf.mxu0  ;;  %v3066_v12 = vadd.f32 %v9738_v40, %v10777_v51  ;;  %v10778_v40 = vld [vmem:[#allocation44_spill] sm:$0xff]  ;;  %v7991_v51 = vld [vmem:[#allocation4 + $0x18] sm:$0xff]  }
 0x2de   :  { %v4170_v16 = vmax.f32 %v4138_v26, %v4140_v35  ;;  %v3889_v62 = vadd.f32 %v3659_v5, %v3058_v28  ;;  %v7994_v28 = vld [vmem:[%s10500_s3 + $0x154] ss:$8 sps:$4 sm:$0xff]  }
 0x2df   :  { %v3663_v8 = vpop.f32.mrf.mxu0 }
 0x2e0   :  { %v4141_v25 = vmax.f32 %v3888_v11, %v3889_v62  ;;  %v4201_v2 = vadd.f32 %v9505_v29, %v4170_v16  ;;  %v3890_v42 = vadd.f32 %v3663_v8, %v3059_v54  ;;  %v10779_v16 = vld [vmem:[#allocation49_spill] sm:$0xff]  ;;  %v10781_v54 = vld [vmem:[#allocation46_spill] sm:$0xff] }
 0x2e1   :  { %v3665_v60 = vpop.f32.mrf.mxu0  ;;  %v7977_v34 = vld [vmem:[#allocation4 + $0x38] sm:$0xff]   ;;  %v1408_v11 = vadd.f32 %v10779_v16, %v10778_v40  ;;  %v10780_v8 = vld [vmem:[#allocation45_spill] sm:$0xff]  ;;  %v3068_v31 = vadd.f32 %v9750_v50, %v10781_v54  ;;  %v9833_v50 = vld [vmem:[%s10499_s2] ss:$0 sm:$0xff] }
 0x2e2   :  { %v4171_v36 = vmax.f32 %v4139_v47, %v4141_v25  ;;  %v3891_v1 = vadd.f32 %v3665_v60, %v3060_v4  ;;  %v7981_v38 = vld [vmem:[#allocation4 + $0x38] sm:$0xff]   ;;  %4616 = vmatmul.mubr.bf16.gmra.mxu1 %v7977_v34  ;;  %v4225_v14 = vmax.f32 %v4201_v2, 0.0  ;;  %v3067_v13 = vadd.f32 %v9744_v39, %v10780_v8  ;;  %v7986_v25 = vld [vmem:[#allocation4 + $0x10] sm:$0xff]   ;;  %v7998_v34 = vld [vmem:[%s10500_s3 + $0x144] ss:$8 sps:$4 sm:$0xff]  }
 0x2e3   :  { %v3667_v63 = vpop.f32.mrf.mxu0  ;;  %5635 = vmatmul.mubr.bf16.gmra.mxu0 %v7981_v38  ;;  %4852 = vmatprep.mubr.bf16.mxu1 %v10518_v59  ;;  %v7992_v60 = vld [vmem:[%s10500_s3 + $0x150] ss:$8 sps:$4 sm:$0xff]   ;;  %v8005_v40 = vld [vmem:[%s10500_s3 + $0x120] ss:$8 sps:$4 sm:$0xff]  }
 0x2e4   :  { %v4202_v44 = vadd.f32 %v9505_v29, %v4171_v36  ;;  %v4142_v33 = vmax.f32 %v3890_v42, %v3891_v1  ;;  %5644 = vmatprep.mubr.bf16.mxu0 %v10518_v59  ;;  %v3892_v26 = vadd.f32 %v3667_v63, %v3061_v41  ;;  %v3064_v29 = vadd.f32 %v9722_v45, %v10775_v49  ;;  %v10776_v45 = vld [vmem:[#allocation43_spill] sm:$0xff]  ;;  %v9828_v42 = vpop.f32.mrf.mxu1  ;;  %v10784_v49 = vld [vmem:[#allocation48_spill] sm:$0xff] }
 0x2e5   :  { %v3669_v46 = vpop.f32.mrf.mxu0  ;;  %v3065_v20 = vadd.f32 %v9731_v10, %v10776_v45  ;;  %v10782_v2 = vld [vmem:[#allocation103_spill] sm:$0xff]  ;;  %v10790_v54 = vld [vmem:[#allocation52_spill] sm:$0xff] }
 0x2e6   :  { %v4226_v24 = vmax.f32 %v4202_v44, 0.0  ;;  %v3893_v55 = vadd.f32 %v3669_v46, %v3062_v30  ;;  %v2239_v36 = vadd.f32 %v10782_v2, %v1408_v11  ;;  %v3069_v30 = vadd.f32 %v9759_v43, %v10783_v58  ;;  %v8003_v43 = vld [vmem:[%s10500_s3 + $0x134] ss:$8 sps:$4 sm:$0xff]  }
 0x2e7   :  { %v3673_v22 = vpop.f32.mrf.mxu0 }
 0x2e8   :  { %v7576_v37 = vpack.c.bf16 %v4226_v24, %v4225_v14  ;;  %v4143_v6 = vmax.f32 %v3892_v26, %v3893_v55  ;;  %v3894_v18 = vadd.f32 %v3673_v22, %v3063_v27  ;;  %v7996_v24 = vld [vmem:[%s10500_s3 + $0x140] ss:$8 sps:$4 sm:$0xff]   ;;  %v2876_v26 = vpop.f32.mrf.mxu1 }
 0x2e9   :  { %v3675_v15 = vpop.f32.mrf.mxu0 }
 0x2ea   :  { %7600 = vst [vmem:[#allocation4 + $0x40] sm:$0xff] %v7576_v37   ;;  %v3895_v9 = vadd.f32 %v3675_v15, %v3064_v29  ;;  %4853 = vmatmul.mubr.bf16.vlgmr.msra.gmra.mxu1 %v7982_v19  ;;  %v10785_v29 = vld [vmem:[#allocation53_spill] sm:$0xff]  ;;  %v10787_v19 = vld [vmem:[#allocation104_spill] sm:$0xff]  ;;  %v2878_v45 = vpop.f32.mrf.mxu1 }
 0x2eb   :  { %v3677_v47 = vpop.f32.mrf.mxu0  ;;  %5192 = vmatpush1.bf16.msra.mxu1 %v7983_v0  ;;  %4862 = vmatprep.mubr.bf16.mxu1 %v10518_v59  ;;  %v1412_v37 = vadd.f32 %v10785_v29, %v10784_v49  ;;  %v10786_v0 = vld [vmem:[#allocation50_spill] sm:$0xff] }
 0x2ec   :  { %v4144_v21 = vmax.f32 %v3894_v18, %v3895_v9  ;;  %5193 = vmatprep.subr.bf16.mxu1 %v7989_v57  ;;  %v3896_v35 = vadd.f32 %v3677_v47, %v3065_v20  ;;  %v3071_v15 = vadd.f32 %v9772_v32, %v10786_v0  ;;  %v3072_v57 = vadd.f32 %v9778_v61, %v10787_v19  ;;  %v8001_v47 = vld [vmem:[%s10500_s3 + $0x130] ss:$8 sps:$4 sm:$0xff]   ;;  %v2882_v16 = vpop.f32.mrf.mxu1 }
 0x2ed   :  { %v3679_v56 = vpop.f32.mrf.mxu0  ;;  %v10796_v0 = vld [vmem:[#allocation11_spill] sm:$0xff] }
 0x2ee   :  { %v4172_v10 = vmax.f32 %v4142_v33, %v4144_v21  ;;  %v3897_v5 = vadd.f32 %v3679_v56, %v3066_v12  ;;  %v3070_v33 = vadd.f32 %v9766_v23, %v2239_v36  ;;  %v8007_v12 = vld [vmem:[%s10500_s3 + $0x124] ss:$8 sps:$4 sm:$0xff]  }
 0x2ef   :  { %v3683_v62 = vpop.f32.mrf.mxu0  ;;  %5194 = vmatpush1.bf16.msra.mxu1 %v7987_v53  ;;  %v10788_v21 = vld [vmem:[#allocation105_spill] sm:$0xff] }
 0x2f0   :  { %v4145_v4 = vmax.f32 %v3896_v35, %v3897_v5  ;;  %5195 = vmatprep.subr.bf16.mxu1 %v7994_v28  ;;  %v4203_v38 = vadd.f32 %v9833_v50, %v4172_v10  ;;  %v3898_v41 = vadd.f32 %v3683_v62, %v3067_v13  ;;  %v2243_v32 = vadd.f32 %v10788_v21, %v1412_v37  ;;  %v10789_v28 = vld [vmem:[#allocation51_spill] sm:$0xff] }
 0x2f1   :  { %v3685_v1 = vpop.f32.mrf.mxu0  ;;  %v7990_v39 = vld [vmem:[#allocation4 + $0x40] sm:$0xff]   ;;  %v3073_v10 = vadd.f32 %v9787_v17, %v10789_v28  ;;  %v8012_v62 = vld [vmem:[%s10500_s3 + $0x114] ss:$8 sps:$4 sm:$0xff]  }
 0x2f2   :  { %v4173_v48 = vmax.f32 %v4143_v6, %v4145_v4  ;;  %v3899_v63 = vadd.f32 %v3685_v1, %v3068_v31  ;;  %4863 = vmatmul.mubr.bf16.gmra.mxu1 %v7986_v25  ;;  %5645 = vmatmul.mubr.bf16.gmra.mxu0 %v7990_v39  ;;  %v4227_v23 = vmax.f32 %v4203_v38, 0.0  ;;  %v3074_v35 = vadd.f32 %v9797_v52, %v2243_v32  ;;  %v10791_v52 = vld [vmem:[#allocation55_spill] sm:$0xff]  ;;  %v10792_v25 = vld [vmem:[#allocation106_spill] sm:$0xff]  ;;  %v7995_v1 = vld [vmem:[#allocation4 + $0x20] sm:$0xff]  }
 0x2f3   :  { %v3687_v44 = vpop.f32.mrf.mxu0  ;;  %4872 = vmatprep.mubr.bf16.mxu1 %v10518_v59  ;;  %5196 = vmatpush1.bf16.msra.mxu1 %v7992_v60  ;;  %v1416_v31 = vadd.f32 %v10791_v52, %v10790_v54  ;;  %v3075_v60 = vadd.f32 %v9810_v3, %v10792_v25  ;;  %v8010_v39 = vld [vmem:[%s10500_s3 + $0x110] ss:$8 sps:$4 sm:$0xff]   ;;  %v8000_v32 = vld [vmem:[#allocation4 + $0x28] sm:$0xff]  }
 0x2f4   :  { %v4204_v46 = vadd.f32 %v9833_v50, %v4173_v48  ;;  %v4146_v14 = vmax.f32 %v3898_v41, %v3899_v63  ;;  %5654 = vmatprep.mubr.bf16.mxu0 %v10518_v59  ;;  %5197 = vmatprep.subr.bf16.mxu1 %v7998_v34  ;;  %v3900_v7 = vadd.f32 %v3687_v44, %v3069_v30  ;;  %v10793_v34 = vld [vmem:[#allocation107_spill] sm:$0xff]  ;;  %v10794_v38 = vld [vmem:[#allocation110_spill] sm:$0xff]  ;;  %v2884_v41 = vpop.f32.mrf.mxu1 }
 0x2f5   :  { %v3689_v55 = vpop.f32.mrf.mxu0  ;;  %v3076_v2 = vadd.f32 %v9828_v42, %v10793_v34  ;;  %v2247_v48 = vadd.f32 %v10794_v38, %v1416_v31  ;;  %v8016_v42 = vld [vmem:[%s10500_s3 + $0x104] ss:$8 sps:$4 sm:$0xff]   ;;  %v8004_v54 = vld [vmem:[#allocation4 + $0x30] sm:$0xff]  }
 0x2f6   :  { %v4228_v22 = vmax.f32 %v4204_v46, 0.0  ;;  %v3901_v27 = vadd.f32 %v3689_v55, %v3070_v33  ;;  %v10795_v46 = vld [vmem:[#allocation108_spill] sm:$0xff]  ;;  %v8017_v38 = vld [vmem:[#allocation4 + $0x10] sm:$0xff]  }
 0x2f7   :  { %v3693_v6 = vpop.f32.mrf.mxu0  ;;  %5198 = vmatpush1.bf16.msra.mxu1 %v7996_v24  ;;  %v3078_v55 = vadd.f32 %v2878_v45, %v2247_v48  ;;  %v8022_v48 = vld [vmem:[%s10500_s3 + $0x260] ss:$8 sps:$4 sm:$0xff]  }
 0x2f8   :  { %v7581_v18 = vpack.c.bf16 %v4228_v22, %v4227_v23  ;;  %v4147_v9 = vmax.f32 %v3900_v7, %v3901_v27  ;;  %5199 = vmatprep.subr.bf16.mxu1 %v8003_v43  ;;  %v3902_v53 = vadd.f32 %v3693_v6, %v3071_v15  ;;  %v2886_v22 = vpop.f32.mrf.mxu1  ;;  %v8014_v27 = vld [vmem:[%s10500_s3 + $0x100] ss:$8 sps:$4 sm:$0xff]   ;;  %v8020_v6 = vld [vmem:[%s10500_s3 + $0x274] ss:$8 sps:$4 sm:$0xff]  }
 0x2f9   :  { %v3695_v20 = vpop.f32.mrf.mxu0  ;;  %v10797_v15 = vld [vmem:[#allocation58_spill] sm:$0xff] }
 0x2fa   :  { %7601 = vst [vmem:[#allocation4 + $0x48] sm:$0xff] %v7581_v18   ;;  %v3903_v61 = vadd.f32 %v3695_v20, %v3072_v57  ;;  %4873 = vmatmul.mubr.bf16.gmra.mxu1 %v7991_v51  ;;  %v1420_v19 = vadd.f32 %v10797_v15, %v10796_v0  ;;  %v10798_v18 = vld [vmem:[#allocation8_spill] sm:$0xff] }
 0x2fb   :  { %v3697_v56 = vpop.f32.mrf.mxu0  ;;  %4882 = vmatprep.mubr.bf16.mxu1 %v10518_v59  ;;  %5200 = vmatpush1.bf16.msra.mxu1 %v8001_v47  ;;  %v10799_v47 = vld [vmem:[#allocation10_spill] sm:$0xff] }
 0x2fc   :  { %v4148_v5 = vmax.f32 %v3902_v53, %v3903_v61  ;;  %5201 = vmatprep.subr.bf16.mxu1 %v8007_v12  ;;  %v3904_v13 = vadd.f32 %v3697_v56, %v3073_v10  ;;  %v3080_v45 = vadd.f32 %v2884_v41, %v10799_v47  ;;  %v2888_v12 = vpop.f32.mrf.mxu1  ;;  %v10800_v53 = vld [vmem:[#allocation112_spill] sm:$0xff]  ;;  %v8028_v41 = vld [vmem:[%s10500_s3 + $0x254] ss:$8 sps:$4 sm:$0xff]  }
 0x2fd   :  { %v3699_v11 = vpop.f32.mrf.mxu0  ;;  %v2251_v61 = vadd.f32 %v10800_v53, %v1420_v19  ;;  %v8041_v19 = vld [vmem:[#allocation4 + $0x40] sm:$0xff]  }
 0x2fe   :  { %v4174_v8 = vmax.f32 %v4146_v14, %v4148_v5  ;;  %v3905_v17 = vadd.f32 %v3699_v11, %v3074_v35  ;;  %v3077_v14 = vadd.f32 %v2876_v26, %v10795_v46  ;;  %v10801_v35 = vld [vmem:[#allocation111_spill] sm:$0xff]  ;;  %v8040_v46 = vld [vmem:[%s10500_s3 + $0x224] ss:$8 sps:$4 sm:$0xff]  }
 0x2ff   :  { %v3703_v4 = vpop.f32.mrf.mxu0  ;;  %5202 = vmatpush1.bf16.msra.mxu1 %v8005_v40  ;;  %v3081_v5 = vadd.f32 %v2886_v22, %v10801_v35  ;;  %v3082_v40 = vadd.f32 %v2888_v12, %v2251_v61  ;;  %v8048_v22 = vld [vmem:[%s10500_s3 + $0x204] ss:$8 sps:$4 sm:$0xff]  }
 0x300   :  { %v4149_v36 = vmax.f32 %v3904_v13, %v3905_v17  ;;  %5203 = vmatprep.subr.bf16.mxu1 %v8012_v62  ;;  %v4205_v30 = vadd.f32 %v9833_v50, %v4174_v8  ;;  %v3906_v3 = vadd.f32 %v3703_v4, %v3075_v60 }
 0x301   :  { %v3705_v63 = vpop.f32.mrf.mxu0  ;;  %v7999_v58 = vld [vmem:[#allocation4 + $0x48] sm:$0xff]  }
 0x302   :  { %v4175_v44 = vmax.f32 %v4147_v9, %v4149_v36  ;;  %v3907_v33 = vadd.f32 %v3705_v63, %v3076_v2  ;;  %4883 = vmatmul.mubr.bf16.gmra.mxu1 %v7995_v1  ;;  %5655 = vmatmul.mubr.bf16.gmra.mxu0 %v7999_v58  ;;  %v4229_v49 = vmax.f32 %v4205_v30, 0.0  ;;  %v3079_v9 = vadd.f32 %v2882_v16, %v10798_v18  ;;  %v8009_v36 = vld [vmem:[#allocation4 + $0x38] sm:$0xff]   ;;  %v8013_v1 = vld [vmem:[#allocation4 + $0x40] sm:$0xff]   ;;  %v8045_v47 = vld [vmem:[#allocation4 + $0x48] sm:$0xff]  }
 0x303   :  { %v3707_v24 = vpop.f32.mrf.mxu0  ;;  %4892 = vmatprep.mubr.bf16.mxu1 %v10518_v59  ;;  %5664 = vmatprep.mubr.bf16.mxu0 %v10518_v59  ;;  %v8026_v63 = vld [vmem:[%s10500_s3 + $0x250] ss:$8 sps:$4 sm:$0xff]   ;;  %v8032_v30 = vld [vmem:[%s10500_s3 + $0x244] ss:$8 sps:$4 sm:$0xff]  }
 0x304   :  { %v4206_v43 = vadd.f32 %v9833_v50, %v4175_v44  ;;  %v4150_v23 = vmax.f32 %v3906_v3, %v3907_v33  ;;  %5204 = vmatpush1.bf16.msra.mxu1 %v8010_v39  ;;  %v3908_v29 = vadd.f32 %v3707_v24, %v3077_v14  ;;  %v8018_v39 = vld [vmem:[%s10500_s3 + $0x270] ss:$8 sps:$4 sm:$0xff]   ;;  %v8030_v44 = vld [vmem:[%s10500_s3 + $0x240] ss:$8 sps:$4 sm:$0xff]   ;;  %v8036_v3 = vld [vmem:[%s10500_s3 + $0x234] ss:$8 sps:$4 sm:$0xff]  }
 0x305   :  { %v3709_v7 = vpop.f32.mrf.mxu0  ;;  %5205 = vmatprep.subr.bf16.mxu1 %v8016_v42  ;;  %v8021_v58 = vld [vmem:[#allocation4 + $0x18] sm:$0xff]   ;;  %v8025_v42 = vld [vmem:[#allocation4 + $0x20] sm:$0xff]  }
 0x306   :  { %v4230_v26 = vmax.f32 %v4206_v43, 0.0  ;;  %v3909_v37 = vadd.f32 %v3709_v7, %v3078_v55  ;;  %v8034_v33 = vld [vmem:[%s10500_s3 + $0x230] ss:$8 sps:$4 sm:$0xff]   ;;  %v8038_v14 = vld [vmem:[%s10500_s3 + $0x220] ss:$8 sps:$4 sm:$0xff]  }
 0x307   :  { %v3713_v57 = vpop.f32.mrf.mxu0  ;;  %v8044_v24 = vld [vmem:[%s10500_s3 + $0x214] ss:$8 sps:$4 sm:$0xff]   ;;  %v8042_v55 = vld [vmem:[%s10500_s3 + $0x210] ss:$8 sps:$4 sm:$0xff]   ;;  %v8046_v7 = vld [vmem:[%s10500_s3 + $0x200] ss:$8 sps:$4 sm:$0xff]  }
 0x308   :  { %v7586_v20 = vpack.c.bf16 %v4230_v26, %v4229_v49  ;;  %v4151_v51 = vmax.f32 %v3908_v29, %v3909_v37  ;;  %5206 = vmatpush1.bf16.msra.mxu1 %v8014_v27  ;;  %v3910_v56 = vadd.f32 %v3713_v57, %v3079_v9  ;;  %v8033_v26 = vld [vmem:[#allocation4 + $0x30] sm:$0xff]  }
 0x309   :  { %v3715_v21 = vpop.f32.mrf.mxu0  ;;  %5933 = vmatprep.subr.bf16.mxu1 %v8020_v6  ;;  %v8037_v6 = vld [vmem:[#allocation4 + $0x38] sm:$0xff]  }
 0x30a   :  { %7602 = vst [vmem:[#allocation4 + $0x50] sm:$0xff] %v7586_v20   ;;  %v3911_v28 = vadd.f32 %v3715_v21, %v3080_v45  ;;  %4893 = vmatmul.mubr.bf16.gmra.mxu1 %v8000_v32  ;;  %v8050_v32 = vld [vmem:[#allocation4 + $0x28] sm:$0xff]  }
 0x30b   :  { %v3717_v10 = vpop.f32.mrf.mxu0  ;;  %4902 = vmatprep.mubr.bf16.mxu1 %v10518_v59 }
 0x30c   :  { %v4152_v16 = vmax.f32 %v3910_v56, %v3911_v28  ;;  %v3912_v8 = vadd.f32 %v3717_v10, %v3081_v5  ;;  %v8051_v28 = vld [vmem:[#allocation4 + $0x30] sm:$0xff]   ;;  %v8052_v5 = vld [vmem:[#allocation4 + $0x38] sm:$0xff]  }
 0x30d   :  { %v3719_v11 = vpop.f32.mrf.mxu0 }
 0x30e   :  { %v4176_v62 = vmax.f32 %v4150_v23, %v4152_v16  ;;  %v3913_v13 = vadd.f32 %v3719_v11, %v3082_v40  ;;  %v8029_v23 = vld [vmem:[#allocation4 + $0x28] sm:$0xff]   ;;  %v8053_v11 = vld [vmem:[#allocation4 + $0x40] sm:$0xff]  }
 0x310   :  { %v4153_v17 = vmax.f32 %v3912_v8, %v3913_v13  ;;  %v4207_v31 = vadd.f32 %v9833_v50, %v4176_v62  ;;  %v8054_v13 = vld [vmem:[#allocation4 + $0x48] sm:$0xff]  }
 0x311   :  { %v8008_v52 = vld [vmem:[#allocation4 + $0x50] sm:$0xff]  }
 0x312   :  { %v4177_v4 = vmax.f32 %v4151_v51, %v4153_v17  ;;  %4903 = vmatmul.mubr.bf16.gmra.mxu1 %v8004_v54  ;;  %5665 = vmatmul.mubr.bf16.gmra.mxu0 %v8008_v52  ;;  %v4231_v60 = vmax.f32 %v4207_v31, 0.0  ;;  %v8049_v51 = vld [vmem:[#allocation4 + $0x20] sm:$0xff]   ;;  %v10509_v52 = vmov 0.0   ;;  %v8057_v31 = vld [vmem:[%s10502_s5 + $0x78] sm:$0xff]  }
 0x313   :  { %4912 = vmatprep.mubr.bf16.mxu1 %v10518_v59  ;;  %7645 = vmatprep.subr.bf16.mxu0 %v10509_v52 }
 0x314   :  { %v4208_v25 = vadd.f32 %v9833_v50, %v4177_v4  ;;  %v8024_v50 = vld [vmem:[%s10500_s3 + $0x264] ss:$8 sps:$4 sm:$0xff]   ;;  %7646 = vmatpush3.bf16.msra.mxu0 %v8057_v31  ;;  %7661 = vmatprep.mubr.msk.bf16.mxu0 %vm8121_vm2, %v10509_v52 }
 0x315   :  { %7647 = vmatprep.subr.bf16.mxu0 %v10509_v52 }
 0x316   :  { %v4232_v34 = vmax.f32 %v4208_v25, 0.0  ;;  %v8055_v25 = vld [vmem:[#allocation4 + $0x50] sm:$0xff]  }
 0x318   :  { %v7591_v2 = vpack.c.bf16 %v4232_v34, %v4231_v60  ;;  %v8058_v60 = vld [vmem:[%s10502_s5 + $0x38] sm:$0xff]  }
 0x31a   :  { %7603 = vst [vmem:[#allocation4 + $0x58] sm:$0xff] %v7591_v2   ;;  %4913 = vmatmul.mubr.bf16.gmra.mxu1 %v8009_v36  ;;  %v8059_v2 = vld [vmem:[%s10502_s5 + $0x70] sm:$0xff]  }
 0x31b   :  { %4922 = vmatprep.mubr.bf16.mxu1 %v10518_v59  ;;  %7648 = vmatpush3.bf16.msra.mxu0 %v8059_v2  ;;  %v8071_v2 = vld [vmem:[%s10502_s5 + $0x48] sm:$0xff]  }
 0x31c   :  { %7649 = vmatprep.subr.bf16.mxu0 %v10509_v52 }
 0x322   :  { %4923 = vmatmul.mubr.bf16.gmra.mxu1 %v8013_v1  ;;  %v8056_v1 = vld [vmem:[#allocation4 + $0x58] sm:$0xff]  }
 0x323   :  { %5223 = vmatprep.mubr.bf16.mxu1 %v10518_v59 }
 0x32a   :  { %5224 = vmatmul.mubr.bf16.vlgmr.msra.gmra.mxu1 %v8017_v38 }
 0x32b   :  { %5934 = vmatpush1.bf16.msra.mxu1 %v8018_v39  ;;  %5233 = vmatprep.mubr.bf16.mxu1 %v10518_v59  ;;  %v8060_v39 = vld [vmem:[%s10502_s5 + $0x30] sm:$0xff]  }
 0x32c   :  { %5935 = vmatprep.subr.bf16.mxu1 %v8024_v50 }
 0x32f   :  { %5936 = vmatpush1.bf16.msra.mxu1 %v8022_v48  ;;  %v8061_v48 = vld [vmem:[%s10502_s5 + $0x68] sm:$0xff]  }
 0x330   :  { %5937 = vmatprep.subr.bf16.mxu1 %v8028_v41  ;;  %7650 = vmatpush3.bf16.msra.mxu0 %v8061_v48 }
 0x331   :  { %7651 = vmatprep.subr.bf16.mxu0 %v10509_v52 }
 0x332   :  { %5234 = vmatmul.mubr.bf16.gmra.mxu1 %v8021_v58  ;;  %v9949_v43 = vpop.f32.mrf.mxu1 }
 0x333   :  { %5243 = vmatprep.mubr.bf16.mxu1 %v10518_v59  ;;  %5938 = vmatpush1.bf16.msra.mxu1 %v8026_v63  ;;  %v8062_v63 = vld [vmem:[%s10502_s5 + $0x28] sm:$0xff]  }
 0x334   :  { %5939 = vmatprep.subr.bf16.mxu1 %v8032_v30  ;;  %v9958_v27 = vpop.f32.mrf.mxu1 }
 0x336   :  { %v9960_v49 = vpop.f32.mrf.mxu1 }
 0x337   :  { %5940 = vmatpush1.bf16.msra.mxu1 %v8030_v44 }
 0x338   :  { %5941 = vmatprep.subr.bf16.mxu1 %v8036_v3  ;;  %v9963_v29 = vpop.f32.mrf.mxu1  ;;  %v8063_v3 = vld [vmem:[%s10502_s5 + $0x60] sm:$0xff]  }
 0x339   :  { %7652 = vmatpush3.bf16.msra.mxu0 %v8063_v3 }
 0x33a   :  { %5244 = vmatmul.mubr.bf16.gmra.mxu1 %v8025_v42  ;;  %7653 = vmatprep.subr.bf16.mxu0 %v10509_v52 }
 0x33b   :  { %5253 = vmatprep.mubr.bf16.mxu1 %v10518_v59  ;;  %5942 = vmatpush1.bf16.msra.mxu1 %v8034_v33 }
 0x33c   :  { %5943 = vmatprep.subr.bf16.mxu1 %v8040_v46  ;;  %v8064_v46 = vld [vmem:[%s10502_s5 + $0x20] sm:$0xff]  }
 0x33f   :  { %5944 = vmatpush1.bf16.msra.mxu1 %v8038_v14 }
 0x340   :  { %5945 = vmatprep.subr.bf16.mxu1 %v8044_v24 }
 0x342   :  { %5254 = vmatmul.mubr.bf16.gmra.mxu1 %v8029_v23  ;;  %v9965_v37 = vpop.f32.mrf.mxu1  ;;  %v8066_v23 = vld [vmem:[%s10502_s5 + $0x18] sm:$0xff]  }
 0x343   :  { %5263 = vmatprep.mubr.bf16.mxu1 %v10518_v59  ;;  %5946 = vmatpush1.bf16.msra.mxu1 %v8042_v55 }
 0x344   :  { %5947 = vmatprep.subr.bf16.mxu1 %v8048_v22  ;;  %v9967_v0 = vpop.f32.mrf.mxu1 }
 0x346   :  { %v9970_v15 = vpop.f32.mrf.mxu1 }
 0x347   :  { %5948 = vmatpush1.bf16.msra.mxu1 %v8046_v7 }
 0x348   :  { %v9972_v57 = vpop.f32.mrf.mxu1  ;;  %7665 = vmatprep.subr.bf16.mxu1 %v10509_v52 }
 0x349   :  { %10802 = vst [vmem:[#allocation54_spill] sm:$0xff] %v9972_v57 }
 0x34a   :  { %5264 = vmatmul.mubr.bf16.gmra.mxu1 %v8033_v26  ;;  %v8065_v26 = vld [vmem:[%s10502_s5 + $0x58] sm:$0xff]  }
 0x34b   :  { %5273 = vmatprep.mubr.bf16.mxu1 %v10518_v59  ;;  %7654 = vmatpush3.bf16.msra.mxu0 %v8065_v26 }
 0x34c   :  { %7655 = vmatprep.subr.bf16.mxu0 %v10509_v52 }
 0x352   :  { %5274 = vmatmul.mubr.bf16.gmra.mxu1 %v8037_v6  ;;  %v9975_v18 = vpop.f32.mrf.mxu1  ;;  %v8067_v6 = vld [vmem:[%s10502_s5 + $0x10] sm:$0xff]  }
 0x353   :  { %5283 = vmatprep.mubr.bf16.mxu1 %v10518_v59 }
 0x354   :  { %v9977_v9 = vpop.f32.mrf.mxu1 }
 0x356   :  { %v9980_v45 = vpop.f32.mrf.mxu1 }
 0x358   :  { %v9982_v20 = vpop.f32.mrf.mxu1 }
 0x35a   :  { %5284 = vmatmul.mubr.bf16.gmra.mxu1 %v8041_v19 }
 0x35b   :  { %5293 = vmatprep.mubr.bf16.mxu1 %v10518_v59 }
 0x362   :  { %5294 = vmatmul.mubr.bf16.gmra.mxu1 %v8045_v47  ;;  %v9984_v12 = vpop.f32.mrf.mxu1 }
 0x363   :  { %5965 = vmatprep.mubr.bf16.mxu1 %v10518_v59 }
 0x364   :  { %v9987_v21 = vpop.f32.mrf.mxu1 }
 0x366   :  { %v9989_v53 = vpop.f32.mrf.mxu1 }
 0x367   :  { %10803 = vst [vmem:[#allocation56_spill] sm:$0xff] %v9989_v53 }
 0x368   :  { %v9992_v61 = vpop.f32.mrf.mxu1 }
 0x369   :  { %10804 = vst [vmem:[#allocation57_spill] sm:$0xff] %v9992_v61 }
 0x36a   :  { %5966 = vmatmul.mubr.bf16.vlgmr.msra.gmra.mxu1 %v8049_v51  ;;  %v8069_v51 = vld [vmem:[%s10502_s5 + $0x8] sm:$0xff]  }
 0x36b   :  { %5975 = vmatprep.mubr.bf16.mxu1 %v10518_v59  ;;  %7666 = vmatpush3.bf16.msra.mxu1 %v8058_v60 }
 0x36c   :  { %7667 = vmatprep.subr.bf16.mxu1 %v10509_v52 }
 0x36f   :  { %7668 = vmatpush3.bf16.msra.mxu1 %v8060_v39 }
 0x370   :  { %7669 = vmatprep.subr.bf16.mxu1 %v10509_v52 }
 0x372   :  { %5976 = vmatmul.mubr.bf16.gmra.mxu1 %v8050_v32  ;;  %v9994_v56 = vpop.f32.mrf.mxu1 }
 0x373   :  { %5985 = vmatprep.mubr.bf16.mxu1 %v10518_v59  ;;  %7670 = vmatpush3.bf16.msra.mxu1 %v8062_v63  ;;  %v8072_v63 = vld [vmem:[%s10502_s5 + $0x40] sm:$0xff]  }
 0x374   :  { %v9997_v10 = vpop.f32.mrf.mxu1  ;;  %7671 = vmatprep.subr.bf16.mxu1 %v10509_v52 }
 0x376   :  { %v9999_v35 = vpop.f32.mrf.mxu1 }
 0x377   :  { %7672 = vmatpush3.bf16.msra.mxu1 %v8064_v46 }
 0x378   :  { %v10002_v40 = vpop.f32.mrf.mxu1  ;;  %7673 = vmatprep.subr.bf16.mxu1 %v10509_v52 }
 0x37a   :  { %5986 = vmatmul.mubr.bf16.gmra.mxu1 %v8051_v28  ;;  %v8068_v28 = vld [vmem:[%s10502_s5 + $0x50] sm:$0xff]  }
 0x37b   :  { %5995 = vmatprep.mubr.bf16.mxu1 %v10518_v59  ;;  %7674 = vmatpush3.bf16.msra.mxu1 %v8066_v23 }
 0x37c   :  { %7675 = vmatprep.subr.bf16.mxu1 %v10509_v52  ;;  %7656 = vmatpush3.bf16.msra.mxu0 %v8068_v28 }
 0x37d   :  { %7657 = vmatprep.subr.bf16.mxu0 %v10509_v52 }
 0x37f   :  { %7676 = vmatpush3.bf16.msra.mxu1 %v8067_v6 }
 0x380   :  { %7677 = vmatprep.subr.bf16.mxu1 %v10509_v52  ;;  %7658 = vmatpush3.bf16.msra.mxu0 %v8071_v2 }
 0x381   :  { %7659 = vmatprep.subr.bf16.mxu0 %v10509_v52 }
 0x382   :  { %5996 = vmatmul.mubr.bf16.gmra.mxu1 %v8052_v5  ;;  %v10004_v16 = vpop.f32.mrf.mxu1  ;;  %v8070_v5 = vld [vmem:[%s10502_s5] sm:$0xff]  }
 0x383   :  { %6005 = vmatprep.mubr.bf16.mxu1 %v10518_v59  ;;  %7678 = vmatpush3.bf16.msra.mxu1 %v8069_v51 }
 0x384   :  { %v10006_v62 = vpop.f32.mrf.mxu1  ;;  %7679 = vmatprep.subr.bf16.mxu1 %v10509_v52  ;;  %7660 = vmatpush3.bf16.msra.mxu0 %v8072_v63 }
 0x385   :  { %7685 = vmatprep.subr.bf16.mxu0 %v10509_v52 }
 0x386   :  { %v10009_v8 = vpop.f32.mrf.mxu1 }
 0x387   :  { %7680 = vmatpush3.bf16.msra.mxu1 %v8070_v5 }
 0x388   :  { %v10011_v17 = vpop.f32.mrf.mxu1  ;;  %7705 = vmatprep.subr.bf16.mxu1 %v10509_v52 }
 0x38a   :  { %6006 = vmatmul.mubr.bf16.gmra.mxu1 %v8053_v11 }
 0x38b   :  { %6015 = vmatprep.mubr.bf16.mxu1 %v10518_v59 }
 0x392   :  { %6016 = vmatmul.mubr.bf16.gmra.mxu1 %v8054_v13  ;;  %v10014_v54 = vpop.f32.mrf.mxu1 }
 0x393   :  { %6025 = vmatprep.mubr.bf16.mxu1 %v10518_v59 }
 0x394   :  { %v10021_v4 = vpop.f32.mrf.mxu1 }
 0x396   :  { %v10028_v34 = vpop.f32.mrf.mxu1 }
 0x398   :  { %v10034_v36 = vpop.f32.mrf.mxu1 }
 0x39a   :  { %6026 = vmatmul.mubr.bf16.gmra.mxu1 %v8055_v25 }
 0x39b   :  { %6035 = vmatprep.mubr.bf16.mxu1 %v10518_v59 }
 0x3a2   :  { %v10039_v38 = vpop.f32.mrf.mxu1  ;;  %6036 = vmatmul.mubr.bf16.gmra.mxu1 %v8056_v1 }
 0x3a3   :  { %7681 = vmatprep.mubr.msk.bf16.mxu1 %vm8121_vm2, %v10509_v52 }
 0x3a4   :  { %v10042_v59 = vpop.f32.mrf.mxu1 }
 0x3a6   :  { %v10045_v50 = vpop.f32.mrf.mxu1 }
 0x3a8   :  { %v10050_v41 = vpop.f32.mrf.mxu1 }
 0x3aa   :  { %v10055_v58 = vpop.f32.mrf.mxu1 }
 0x3ac   :  { %v10058_v30 = vpop.f32.mrf.mxu1 }
 0x3ae   :  { %v10061_v44 = vpop.f32.mrf.mxu1 }
 0x3b0   :  { %v10066_v33 = vpop.f32.mrf.mxu1 }
 0x3b2   :  { %v10068_v42 = vpop.f32.mrf.mxu1 }
 0x3b4   :  { %v10074_v14 = vpop.f32.mrf.mxu1 }
 0x3b6   :  { %v10076_v24 = vpop.f32.mrf.mxu1 }
 0x3b8   :  { %v10079_v55 = vpop.f32.mrf.mxu1 }
 0x3b9   :  { %10805 = vst [vmem:[#allocation59_spill] sm:$0xff] %v10079_v55  ;;  %v4965_v55 = vadd.f32 %v10055_v58, %v9949_v43 }
 0x3ba   :  { %v10084_v22 = vpop.f32.mrf.mxu1 }
 0x3bc   :  { %v10086_v7 = vpop.f32.mrf.mxu1 }
 0x3be   :  { %v10095_v19 = vpop.f32.mrf.mxu1 }
 0x3c0   :  { %v10097_v47 = vpop.f32.mrf.mxu1 }
 0x3c2   :  { %v10104_v32 = vpop.f32.mrf.mxu1 }
 0x3c4   :  { %v10112_v11 = vpop.f32.mrf.mxu1 }
 0x3c6   :  { %v10115_v13 = vpop.f32.mrf.mxu1 }
 0x3c7   :  { %10806 = vst [vmem:[#allocation60_spill] sm:$0xff] %v10115_v13 }
 0x3c8   :  { %v10118_v31 = vpop.f32.mrf.mxu1 }
 0x3c9   :  { %10807 = vst [vmem:[#allocation61_spill] sm:$0xff] %v10118_v31 }
 0x3ca   :  { %v10125_v25 = vpop.f32.mrf.mxu1 }
 0x3cc   :  { %v10127_v60 = vpop.f32.mrf.mxu1 }
 0x3ce   :  { %v10132_v1 = vpop.f32.mrf.mxu1 }
 0x3d0   :  { %v10134_v39 = vpop.f32.mrf.mxu1 }
 0x3d2   :  { %v10137_v48 = vpop.f32.mrf.mxu1 }
 0x3d4   :  { %v10142_v3 = vpop.f32.mrf.mxu1 }
 0x3d6   :  { %v10144_v46 = vpop.f32.mrf.mxu1 }
 0x3d8   :  { %v10147_v23 = vpop.f32.mrf.mxu1 }
 0x3da   :  { %v10149_v26 = vpop.f32.mrf.mxu1 }
 0x3dc   :  { %v10151_v6 = vpop.f32.mrf.mxu1 }
 0x3de   :  { %v10153_v51 = vpop.f32.mrf.mxu1 }
 0x3e0   :  { %v4920_v28 = vpop.f32.mrf.mxu1 }
 0x3e1   :  { %v10156_v5 = vadd.f32 %v4920_v28, %v10034_v36 }
 0x3e2   :  { %v4924_v2 = vpop.f32.mrf.mxu1 }
 0x3e3   :  { %v10159_v31 = vadd.f32 %v4924_v2, %v10039_v38  ;;  %v4966_v38 = vadd.f32 %v10058_v30, %v9958_v27  ;;  %v4970_v30 = vadd.f32 %v10074_v14, %v9967_v0 }
 0x3e4   :  { %v4926_v63 = vpop.f32.mrf.mxu1 }
 0x3e5   :  { %v10162_v61 = vadd.f32 %v4926_v63, %v10042_v59  ;;  %v4967_v59 = vadd.f32 %v10061_v44, %v9960_v49 }
 0x3e6   :  { %v4928_v52 = vpop.f32.mrf.mxu1 }
 0x3e7   :  { %v10165_v13 = vadd.f32 %v4928_v52, %v10045_v50  ;;  %v4968_v50 = vadd.f32 %v10066_v33, %v9963_v29  ;;  %v10196_v29 = vpop.f32.mrf.mxu0 }
 0x3e8   :  { %v4930_v53 = vpop.f32.mrf.mxu1 }
 0x3e9   :  { %v10170_v57 = vadd.f32 %v4930_v53, %v10050_v41  ;;  %v4969_v41 = vadd.f32 %v10068_v42, %v9965_v37  ;;  %v4973_v37 = vadd.f32 %v10084_v22, %v9975_v18  ;;  %v10206_v0 = vpop.f32.mrf.mxu0 }
 0x3ea   :  { %v5225_v36 = vpop.f32.mrf.mxu1 }
 0x3eb   :  { %v10174_v28 = vadd.f32 %v5225_v36, %v4965_v55  ;;  %v10216_v18 = vpop.f32.mrf.mxu0 }
 0x3ec   :  { %v5227_v2 = vpop.f32.mrf.mxu1 }
 0x3ed   :  { %v10178_v63 = vadd.f32 %v5227_v2, %v4966_v38  ;;  %v4974_v38 = vadd.f32 %v10086_v7, %v9977_v9  ;;  %v4977_v9 = vadd.f32 %v10104_v32, %v9984_v12  ;;  %v4981_v12 = vadd.f32 %v10125_v25, %v9994_v56 }
 0x3ee   :  { %v5229_v52 = vpop.f32.mrf.mxu1  ;;  %v4984_v56 = vadd.f32 %v10134_v39, %v10002_v40  ;;  %v4987_v40 = vadd.f32 %v10144_v46, %v10009_v8  ;;  %v4990_v8 = vadd.f32 %v10151_v6, %v10021_v4 }
 0x3ef   :  { %v10182_v43 = vadd.f32 %v5229_v52, %v4967_v59  ;;  %v4975_v59 = vadd.f32 %v10095_v19, %v9980_v45  ;;  %v4978_v45 = vadd.f32 %v10112_v11, %v9987_v21  ;;  %v4982_v21 = vadd.f32 %v10127_v60, %v9997_v10 }
 0x3f0   :  { %v5231_v53 = vpop.f32.mrf.mxu1  ;;  %v4985_v10 = vadd.f32 %v10137_v48, %v10004_v16  ;;  %v4988_v16 = vadd.f32 %v10147_v23, %v10011_v17  ;;  %v4991_v17 = vadd.f32 %v10153_v51, %v10028_v34 }
 0x3f1   :  { %v10186_v58 = vadd.f32 %v5231_v53, %v4968_v50  ;;  %v4976_v53 = vadd.f32 %v10097_v47, %v9982_v20 }
 0x3f2   :  { %v5235_v27 = vpop.f32.mrf.mxu1 }
 0x3f3   :  { %v10190_v55 = vadd.f32 %v5235_v27, %v4969_v41 }
 0x3f4   :  { %v5237_v49 = vpop.f32.mrf.mxu1 }
 0x3f5   :  { %v10192_v44 = vadd.f32 %v5237_v49, %v4970_v30  ;;  %v10226_v30 = vpop.f32.mrf.mxu0 }
 0x3f6   :  { %v10194_v36 = vpop.f32.mrf.mxu1 }
 0x3f7   :  { %v10230_v47 = vpop.f32.mrf.mxu0 }
 0x3f8   :  { %v10198_v33 = vpop.f32.mrf.mxu1 }
 0x3f9   :  { %v10238_v32 = vpop.f32.mrf.mxu0 }
 0x3fa   :  { %v5245_v42 = vpop.f32.mrf.mxu1 }
 0x3fb   :  { %v10204_v2 = vadd.f32 %v5245_v42, %v4973_v37 }
 0x3fc   :  { %v5247_v14 = vpop.f32.mrf.mxu1 }
 0x3fd   :  { %v10210_v52 = vadd.f32 %v5247_v14, %v4974_v38 }
 0x3fe   :  { %v5249_v50 = vpop.f32.mrf.mxu1 }
 0x3ff   :  { %v10214_v41 = vadd.f32 %v5249_v50, %v4975_v59  ;;  %v4983_v59 = vadd.f32 %v10132_v1, %v9999_v35  ;;  %v4986_v35 = vadd.f32 %v10142_v3, %v10006_v62  ;;  %v4989_v62 = vadd.f32 %v10149_v26, %v10014_v54 }
 0x400   :  { %v5251_v22 = vpop.f32.mrf.mxu1 }
 0x401   :  { %v10220_v7 = vadd.f32 %v5251_v22, %v4976_v53  ;;  %v10248_v53 = vpop.f32.mrf.mxu0 }
 0x402   :  { %v5255_v27 = vpop.f32.mrf.mxu1 }
 0x403   :  { %v10224_v19 = vadd.f32 %v5255_v27, %v4977_v9  ;;  %v10258_v27 = vpop.f32.mrf.mxu0 }
 0x404   :  { %v5257_v49 = vpop.f32.mrf.mxu1 }
 0x405   :  { %v10228_v20 = vadd.f32 %v5257_v49, %v4978_v45  ;;  %v10264_v49 = vpop.f32.mrf.mxu0 }
 0x406   :  { %v10232_v37 = vpop.f32.mrf.mxu1 }
 0x408   :  { %v10234_v42 = vpop.f32.mrf.mxu1 }
 0x40a   :  { %v5265_v38 = vpop.f32.mrf.mxu1 }
 0x40b   :  { %v10242_v11 = vadd.f32 %v5265_v38, %v4981_v12 }
 0x40c   :  { %v5267_v14 = vpop.f32.mrf.mxu1 }
 0x40d   :  { %v10246_v50 = vadd.f32 %v5267_v14, %v4982_v21  ;;  %v10274_v21 = vpop.f32.mrf.mxu0 }
 0x40e   :  { %v5269_v22 = vpop.f32.mrf.mxu1 }
 0x40f   :  { %v10252_v25 = vadd.f32 %v5269_v22, %v4983_v59  ;;  %v10284_v22 = vpop.f32.mrf.mxu0 }
 0x410   :  { %v5271_v9 = vpop.f32.mrf.mxu1 }
 0x411   :  { %v10256_v60 = vadd.f32 %v5271_v9, %v4984_v56  ;;  %v10292_v54 = vpop.f32.mrf.mxu0 }
 0x412   :  { %v5275_v45 = vpop.f32.mrf.mxu1 }
 0x413   :  { %v10262_v1 = vadd.f32 %v5275_v45, %v4985_v10  ;;  %v10297_v4 = vpop.f32.mrf.mxu0 }
 0x414   :  { %v5277_v12 = vpop.f32.mrf.mxu1 }
 0x415   :  { %v10268_v39 = vadd.f32 %v5277_v12, %v4986_v35  ;;  %v10305_v51 = vpop.f32.mrf.mxu0 }
 0x416   :  { %v5279_v38 = vpop.f32.mrf.mxu1 }
 0x417   :  { %v10272_v48 = vadd.f32 %v5279_v38, %v4987_v40 }
 0x418   :  { %v5281_v14 = vpop.f32.mrf.mxu1 }
 0x419   :  { %v10278_v3 = vadd.f32 %v5281_v14, %v4988_v16  ;;  %v10311_v16 = vpop.f32.mrf.mxu0  ;;  %v5707_v14 = vadd.f32 %v10196_v29, %v10174_v28  ;;  %v4971_v28 = vadd.f32 %v10076_v24, %v9970_v15  ;;  %v10809_v29 = vld [vmem:[#allocation59_spill] sm:$0xff] }
 0x41a   :  { %v5285_v59 = vpop.f32.mrf.mxu1 }
 0x41b   :  { %v10282_v46 = vadd.f32 %v5285_v59, %v4989_v62 }
 0x41c   :  { %v5287_v56 = vpop.f32.mrf.mxu1 }
 0x41d   :  { %v10288_v23 = vadd.f32 %v5287_v56, %v4990_v8 }
 0x41e   :  { %v5289_v9 = vpop.f32.mrf.mxu1 }
 0x41f   :  { %v10290_v10 = vadd.f32 %v5289_v9, %v4991_v17  ;;  %v5709_v9 = vadd.f32 %v10216_v18, %v10182_v43  ;;  %v5342_v43 = vadd.f32 %v10194_v36, %v4971_v28 }
 0x420   :  { %v5291_v26 = vpop.f32.mrf.mxu1 }
 0x421   :  { %v10295_v45 = vadd.f32 %v5291_v26, %v10156_v5  ;;  %v5710_v26 = vadd.f32 %v10226_v30, %v10186_v58  ;;  %v5712_v30 = vadd.f32 %v10238_v32, %v10192_v44  ;;  %v10344_v44 = vld [vmem:[%s10501_s4] ss:$0 sm:$0xff] }
 0x422   :  { %v5295_v6 = vpop.f32.mrf.mxu1 }
 0x423   :  { %v10300_v35 = vadd.f32 %v5295_v6, %v10159_v31  ;;  %v5708_v31 = vadd.f32 %v10206_v0, %v10178_v63  ;;  %v10808_v63 = vld [vmem:[#allocation54_spill] sm:$0xff] }
 0x424   :  { %v5297_v12 = vpop.f32.mrf.mxu1  ;;  %v4972_v0 = vadd.f32 %v10809_v29, %v10808_v63  ;;  %v5715_v29 = vadd.f32 %v10264_v49, %v10204_v2  ;;  %v5717_v2 = vadd.f32 %v10284_v22, %v10214_v41  ;;  %v10810_v49 = vld [vmem:[#allocation56_spill] sm:$0xff]  ;;  %v5719_v41 = vadd.f32 %v10297_v4, %v10224_v19  ;;  %v8076_v19 = vld [vmem:[%s10502_s5 + $0xf0] sm:$0xff]  }
 0x425   :  { %v10303_v34 = vadd.f32 %v5297_v12, %v10162_v61  ;;  %v10317_v61 = vpop.f32.mrf.mxu0  ;;  %v10814_v4 = vmov 0.0  }
 0x426   :  { %v10307_v40 = vpop.f32.mrf.mxu1  ;;  %v5343_v18 = vadd.f32 %v10198_v33, %v4972_v0 }
 0x427   :  { %v10323_v6 = vpop.f32.mrf.mxu0 }
 0x428   :  { %v10309_v38 = vpop.f32.mrf.mxu1 }
 0x42a   :  { %v5967_v5 = vpop.f32.mrf.mxu1 }
 0x42b   :  { %v6078_v59 = vadd.f32 %v5967_v5, %v5707_v14 }
 0x42c   :  { %v5969_v62 = vpop.f32.mrf.mxu1 }
 0x42d   :  { %v6079_v8 = vadd.f32 %v5969_v62, %v5708_v31  ;;  %v5711_v31 = vadd.f32 %v10230_v47, %v10190_v55  ;;  %v5714_v55 = vadd.f32 %v10258_v27, %v5343_v18 }
 0x42e   :  { %v5971_v56 = vpop.f32.mrf.mxu1 }
 0x42f   :  { %v6174_v17 = vmax.f32 %v6078_v59, %v6079_v8  ;;  %v6080_v5 = vadd.f32 %v5971_v56, %v5709_v9  ;;  %v10335_v59 = vpop.f32.mrf.mxu0  ;;  %v5713_v9 = vadd.f32 %v10248_v53, %v5342_v43  ;;  %v5716_v53 = vadd.f32 %v10274_v21, %v10210_v52  ;;  %v10811_v21 = vld [vmem:[#allocation60_spill] sm:$0xff] }
 0x430   :  { %v5973_v12 = vpop.f32.mrf.mxu1  ;;  %v5718_v52 = vadd.f32 %v10292_v54, %v10220_v7  ;;  %v8074_v7 = vld [vmem:[%s10502_s5 + $0xf8] sm:$0xff]  }
 0x431   :  { %v6081_v14 = vadd.f32 %v5973_v12, %v5710_v26  ;;  %v10339_v47 = vpop.f32.mrf.mxu0 }
 0x432   :  { %v5977_v62 = vpop.f32.mrf.mxu1 }
 0x433   :  { %v6175_v58 = vmax.f32 %v6080_v5, %v6081_v14  ;;  %v6082_v24 = vadd.f32 %v5977_v62, %v5711_v31  ;;  %v10350_v27 = vpop.f32.mrf.mxu0 }
 0x434   :  { %v5979_v15 = vpop.f32.mrf.mxu1 }
 0x435   :  { %v6083_v8 = vadd.f32 %v5979_v15, %v5712_v30  ;;  %v10353_v62 = vpop.f32.mrf.mxu0  ;;  %v4979_v15 = vadd.f32 %v10811_v21, %v10810_v49  ;;  %v5723_v21 = vadd.f32 %v10323_v6, %v10242_v11 }
 0x436   :  { %v5981_v63 = vpop.f32.mrf.mxu1 }
 0x437   :  { %v6176_v56 = vmax.f32 %v6082_v24, %v6083_v8  ;;  %v6084_v33 = vadd.f32 %v5981_v63, %v5713_v9  ;;  %v10812_v24 = vld [vmem:[#allocation57_spill] sm:$0xff] }
 0x438   :  { %v5983_v36 = vpop.f32.mrf.mxu1  ;;  %v10813_v8 = vld [vmem:[#allocation61_spill] sm:$0xff] }
 0x439   :  { %v6190_v26 = vmax.f32 %v6174_v17, %v6176_v56  ;;  %v6085_v12 = vadd.f32 %v5983_v36, %v5714_v55 }
 0x43a   :  { %v5987_v32 = vpop.f32.mrf.mxu1 }
 0x43b   :  { %v6177_v28 = vmax.f32 %v6084_v33, %v6085_v12  ;;  %v6205_v17 = vadd.f32 %v10344_v44, %v6190_v26  ;;  %v6086_v14 = vadd.f32 %v5987_v32, %v5715_v29  ;;  %v5648_v26 = vpop.f32.mrf.mxu0  ;;  %v5350_v33 = vadd.f32 %v10232_v37, %v4979_v15 }
 0x43c   :  { %v5989_v0 = vpop.f32.mrf.mxu1 }
 0x43d   :  { %v6191_v5 = vmax.f32 %v6175_v58, %v6177_v28  ;;  %v6087_v31 = vadd.f32 %v5989_v0, %v5716_v53  ;;  %v4980_v58 = vadd.f32 %v10813_v8, %v10812_v24  ;;  %v6213_v56 = vmax.f32 %v6205_v17, 0.0  ;;  %v5650_v37 = vpop.f32.mrf.mxu0 }
 0x43e   :  { %v5991_v43 = vpop.f32.mrf.mxu1  ;;  %v5720_v28 = vadd.f32 %v10305_v51, %v10228_v20 }
 0x43f   :  { %v6206_v18 = vadd.f32 %v10344_v44, %v6191_v5  ;;  %v6178_v30 = vmax.f32 %v6086_v14, %v6087_v31  ;;  %v6088_v55 = vadd.f32 %v5991_v43, %v5717_v2  ;;  %v5351_v54 = vadd.f32 %v10234_v42, %v4980_v58 }
 0x440   :  { %v5993_v63 = vpop.f32.mrf.mxu1  ;;  %v5721_v5 = vadd.f32 %v10311_v16, %v5350_v33  ;;  %v5724_v16 = vadd.f32 %v10335_v59, %v10246_v50  ;;  %v5725_v50 = vadd.f32 %v10339_v47, %v10252_v25  ;;  %v5726_v59 = vadd.f32 %v10350_v27, %v10256_v60  ;;  %v8082_v25 = vld [vmem:[%s10502_s5 + $0xd8] sm:$0xff]  }
 0x441   :  { %v6214_v9 = vmax.f32 %v6206_v18, 0.0  ;;  %v6089_v36 = vadd.f32 %v5993_v63, %v5718_v52  ;;  %v5722_v14 = vadd.f32 %v10317_v61, %v5351_v54  ;;  %v5652_v18 = vpop.f32.mrf.mxu0  ;;  %v8078_v52 = vld [vmem:[%s10502_s5 + $0xe8] sm:$0xff]   ;;  %v8073_v54 = vld [vmem:[%s10502_s5 + $0xb8] sm:$0xff]   ;;  %v5727_v27 = vadd.f32 %v10353_v62, %v10262_v1  ;;  %v8084_v1 = vld [vmem:[%s10502_s5 + $0xd0] sm:$0xff]  }
 0x442   :  { %v5997_v22 = vpop.f32.mrf.mxu1 }
 0x443   :  { %v6221_v12 = vpack.c.bf16 %v6214_v9, %v6213_v56  ;;  %v6179_v32 = vmax.f32 %v6088_v55, %v6089_v36  ;;  %v6090_v53 = vadd.f32 %v5997_v22, %v5719_v41  ;;  %v5656_v61 = vpop.f32.mrf.mxu0  ;;  %v8080_v56 = vld [vmem:[%s10502_s5 + $0xe0] sm:$0xff]  }
 0x444   :  { %v5999_v29 = vpop.f32.mrf.mxu1 }
 0x445   :  { %v6091_v0 = vadd.f32 %v5999_v29, %v5720_v28  ;;  %7682 = vmatmul.mubr.bf16.vlgmr.msra.gmra.mxu1 %v6221_v12  ;;  %v5658_v9 = vpop.f32.mrf.mxu0  ;;  %v5728_v12 = vadd.f32 %v5648_v26, %v10268_v39  ;;  %v5729_v39 = vadd.f32 %v5650_v37, %v10272_v48  ;;  %v5730_v26 = vadd.f32 %v5652_v18, %v10278_v3  ;;  %v8077_v48 = vld [vmem:[%s10502_s5 + $0xa8] sm:$0xff]  }
 0x446   :  { %v6001_v17 = vpop.f32.mrf.mxu1  ;;  %7706 = vmatpush3.bf16.msra.mxu1 %v8074_v7  ;;  %7721 = vmatprep.mubr.msk.bf16.mxu1 %vm8121_vm2, %v10814_v4  ;;  %v8086_v3 = vld [vmem:[%s10502_s5 + $0xc8] sm:$0xff]   ;;  %v5732_v18 = vadd.f32 %v5658_v9, %v10288_v23  ;;  %v8088_v23 = vld [vmem:[%s10502_s5 + $0xc0] sm:$0xff]  }
 0x447   :  { %v6180_v42 = vmax.f32 %v6090_v53, %v6091_v0  ;;  %7707 = vmatprep.subr.bf16.mxu1 %v10814_v4  ;;  %v6092_v31 = vadd.f32 %v6001_v17, %v5721_v5  ;;  %v8075_v17 = vld [vmem:[%s10502_s5 + $0xb0] sm:$0xff]  }
 0x448   :  { %v6003_v20 = vpop.f32.mrf.mxu1 }
 0x449   :  { %v6192_v51 = vmax.f32 %v6178_v30, %v6180_v42  ;;  %v6093_v43 = vadd.f32 %v6003_v20, %v5722_v14 }
 0x44a   :  { %v6007_v2 = vpop.f32.mrf.mxu1  ;;  %7708 = vmatpush3.bf16.msra.mxu1 %v8076_v19 }
 0x44b   :  { %v6181_v49 = vmax.f32 %v6092_v31, %v6093_v43  ;;  %7709 = vmatprep.subr.bf16.mxu1 %v10814_v4  ;;  %v6207_v15 = vadd.f32 %v10344_v44, %v6192_v51  ;;  %v6094_v8 = vadd.f32 %v6007_v2, %v5723_v21  ;;  %v5731_v43 = vadd.f32 %v5656_v61, %v10282_v46  ;;  %v8079_v46 = vld [vmem:[%s10502_s5 + $0xa0] sm:$0xff]  }
 0x44c   :  { %v6009_v30 = vpop.f32.mrf.mxu1 }
 0x44d   :  { %v6193_v24 = vmax.f32 %v6179_v32, %v6181_v49  ;;  %v6095_v58 = vadd.f32 %v6009_v30, %v5724_v16  ;;  %v6215_v36 = vmax.f32 %v6207_v15, 0.0  ;;  %v5660_v32 = vpop.f32.mrf.mxu0 }
 0x44e   :  { %v6011_v63 = vpop.f32.mrf.mxu1  ;;  %7710 = vmatpush3.bf16.msra.mxu1 %v8078_v52  ;;  %v5733_v15 = vadd.f32 %v5660_v32, %v10290_v10  ;;  %v8085_v32 = vld [vmem:[%s10502_s5 + $0x88] sm:$0xff]  }
 0x44f   :  { %v6208_v11 = vadd.f32 %v10344_v44, %v6193_v24  ;;  %v6182_v6 = vmax.f32 %v6094_v8, %v6095_v58  ;;  %7711 = vmatprep.subr.bf16.mxu1 %v10814_v4  ;;  %v6096_v41 = vadd.f32 %v6011_v63, %v5725_v50  ;;  %v5662_v19 = vpop.f32.mrf.mxu0 }
 0x450   :  { %v6013_v55 = vpop.f32.mrf.mxu1  ;;  %v5734_v58 = vadd.f32 %v5662_v19, %v10295_v45  ;;  %v8081_v45 = vld [vmem:[%s10502_s5 + $0x98] sm:$0xff]   ;;  %v8091_v19 = vld [vmem:[%s10504_s7 + $0x8] sm:$0xff]  }
 0x451   :  { %v6216_v33 = vmax.f32 %v6208_v11, 0.0  ;;  %v6097_v22 = vadd.f32 %v6013_v55, %v5726_v59  ;;  %v5666_v51 = vpop.f32.mrf.mxu0  ;;  %v5366_v59 = vadd.f32 %v10307_v40, %v10165_v13 }
 0x452   :  { %v6017_v7 = vpop.f32.mrf.mxu1  ;;  %7712 = vmatpush3.bf16.msra.mxu1 %v8080_v56  ;;  %v5735_v9 = vadd.f32 %v5666_v51, %v10300_v35 }
 0x453   :  { %v6222_v47 = vpack.c.bf16 %v6216_v33, %v6215_v36  ;;  %v6183_v60 = vmax.f32 %v6096_v41, %v6097_v22  ;;  %7713 = vmatprep.subr.bf16.mxu1 %v10814_v4  ;;  %v6098_v29 = vadd.f32 %v6017_v7, %v5727_v27  ;;  %v5668_v30 = vpop.f32.mrf.mxu0  ;;  %v5367_v36 = vadd.f32 %v10309_v38, %v10170_v57 }
 0x454   :  { %v6019_v28 = vpop.f32.mrf.mxu1  ;;  %v5736_v22 = vadd.f32 %v5668_v30, %v10303_v34  ;;  %v7502_v30 = vld [vmem:[%s10503_s6] ss:$0 sm:$0xff] }
 0x455   :  { %v6099_v53 = vadd.f32 %v6019_v28, %v5728_v12  ;;  %7662 = vmatmul.mubr.bf16.vlgmr.msra.gmra.mxu0 %v6222_v47  ;;  %v5670_v50 = vpop.f32.mrf.mxu0 }
 0x456   :  { %7686 = vmatpush3.bf16.msra.mxu0 %v8073_v54  ;;  %v6021_v0 = vpop.f32.mrf.mxu1  ;;  %7714 = vmatpush3.bf16.msra.mxu1 %v8082_v25  ;;  %v8083_v25 = vld [vmem:[%s10502_s5 + $0x90] sm:$0xff]  }
 0x457   :  { %v6184_v62 = vmax.f32 %v6098_v29, %v6099_v53  ;;  %7687 = vmatprep.subr.bf16.mxu0 %v10814_v4  ;;  %7715 = vmatprep.subr.bf16.mxu1 %v10814_v4  ;;  %v6100_v14 = vadd.f32 %v6021_v0, %v5729_v39  ;;  %v5672_v54 = vpop.f32.mrf.mxu0  ;;  %v8087_v0 = vld [vmem:[%s10502_s5 + $0x80] sm:$0xff]  }
 0x458   :  { %v6023_v42 = vpop.f32.mrf.mxu1  ;;  %7701 = vmatprep.mubr.msk.bf16.mxu0 %vm8121_vm2, %v10814_v4  ;;  %v5738_v27 = vadd.f32 %v5672_v54, %v5367_v36 }
 0x459   :  { %v6194_v5 = vmax.f32 %v6182_v6, %v6184_v62  ;;  %v6101_v20 = vadd.f32 %v6023_v42, %v5730_v26  ;;  %v8089_v26 = vld [vmem:[%s10504_s7 + $0x18] sm:$0xff]   ;;  %v8092_v42 = vld [vmem:[%s10504_s7] sm:$0xff]  }
 0x45a   :  { %7688 = vmatpush3.bf16.msra.mxu0 %v8075_v17  ;;  %v6027_v31 = vpop.f32.mrf.mxu1  ;;  %7716 = vmatpush3.bf16.msra.mxu1 %v8084_v1 }
 0x45b   :  { %v6185_v37 = vmax.f32 %v6100_v14, %v6101_v20  ;;  %7689 = vmatprep.subr.bf16.mxu0 %v10814_v4  ;;  %7717 = vmatprep.subr.bf16.mxu1 %v10814_v4  ;;  %v6209_v52 = vadd.f32 %v10344_v44, %v6194_v5  ;;  %v6102_v21 = vadd.f32 %v6027_v31, %v5731_v43 }
 0x45c   :  { %v6029_v2 = vpop.f32.mrf.mxu1 }
 0x45d   :  { %v6195_v49 = vmax.f32 %v6183_v60, %v6185_v37  ;;  %v6103_v16 = vadd.f32 %v6029_v2, %v5732_v18  ;;  %v6217_v63 = vmax.f32 %v6209_v52, 0.0  ;;  %v5737_v60 = vadd.f32 %v5670_v50, %v5366_v59 }
 0x45e   :  { %7690 = vmatpush3.bf16.msra.mxu0 %v8077_v48  ;;  %v6031_v24 = vpop.f32.mrf.mxu1  ;;  %7718 = vmatpush3.bf16.msra.mxu1 %v8086_v3 }
 0x45f   :  { %v6210_v61 = vadd.f32 %v10344_v44, %v6195_v49  ;;  %v6186_v8 = vmax.f32 %v6102_v21, %v6103_v16  ;;  %7691 = vmatprep.subr.bf16.mxu0 %v10814_v4  ;;  %7719 = vmatprep.subr.bf16.mxu1 %v10814_v4  ;;  %v6104_v11 = vadd.f32 %v6031_v24, %v5733_v15 }
 0x460   :  { %v6033_v10 = vpop.f32.mrf.mxu1 }
 0x461   :  { %v6218_v56 = vmax.f32 %v6210_v61, 0.0  ;;  %v6105_v6 = vadd.f32 %v6033_v10, %v5734_v58 }
 0x462   :  { %7692 = vmatpush3.bf16.msra.mxu0 %v8079_v46  ;;  %v6037_v55 = vpop.f32.mrf.mxu1  ;;  %7720 = vmatpush3.bf16.msra.mxu1 %v8088_v23 }
 0x463   :  { %v6223_v33 = vpack.c.bf16 %v6218_v56, %v6217_v63  ;;  %v6187_v41 = vmax.f32 %v6104_v11, %v6105_v6  ;;  %7693 = vmatprep.subr.bf16.mxu0 %v10814_v4  ;;  %v6106_v13 = vadd.f32 %v6037_v55, %v5735_v9  ;;  %v7503_v6 = vld [vmem:[%s10505_s8] ss:$0 sm:$0xff] }
 0x464   :  { %v6039_v7 = vpop.f32.mrf.mxu1 }
 0x465   :  { %v6107_v40 = vadd.f32 %v6039_v7, %v5736_v22 }
 0x466   :  { %7694 = vmatpush3.bf16.msra.mxu0 %v8081_v45  ;;  %v6041_v35 = vpop.f32.mrf.mxu1 }
 0x467   :  { %v6188_v47 = vmax.f32 %v6106_v13, %v6107_v40  ;;  %7695 = vmatprep.subr.bf16.mxu0 %v10814_v4  ;;  %v6108_v34 = vadd.f32 %v6041_v35, %v5737_v60 }
 0x468   :  { %v6043_v57 = vpop.f32.mrf.mxu1 }
 0x469   :  { %v6196_v38 = vmax.f32 %v6186_v8, %v6188_v47  ;;  %v6109_v12 = vadd.f32 %v6043_v57, %v5738_v27 }
 0x46a   :  { %7696 = vmatpush3.bf16.msra.mxu0 %v8083_v25 }
 0x46b   :  { %v6189_v28 = vmax.f32 %v6108_v34, %v6109_v12  ;;  %7697 = vmatprep.subr.bf16.mxu0 %v10814_v4  ;;  %v6211_v29 = vadd.f32 %v10344_v44, %v6196_v38 }
 0x46d   :  { %v6197_v53 = vmax.f32 %v6187_v41, %v6189_v28  ;;  %v6219_v1 = vmax.f32 %v6211_v29, 0.0 }
 0x46e   :  { %7698 = vmatpush3.bf16.msra.mxu0 %v8085_v32 }
 0x46f   :  { %v6212_v17 = vadd.f32 %v10344_v44, %v6197_v53  ;;  %7699 = vmatprep.subr.bf16.mxu0 %v10814_v4  ;;  %v8090_v44 = vld [vmem:[%s10504_s7 + $0x10] sm:$0xff]  }
 0x471   :  { %v6220_v62 = vmax.f32 %v6212_v17, 0.0 }
 0x472   :  { %7700 = vmatpush3.bf16.msra.mxu0 %v8087_v0 }
 0x473   :  { %v6224_v39 = vpack.c.bf16 %v6220_v62, %v6219_v1  ;;  %7725 = vmatprep.subr.bf16.mxu0 %v10814_v4 }
 0x475   :  { %7702 = vmatmul.mubr.bf16.vlgmr.msra.gmra.mxu0 %v6223_v33  ;;  %7722 = vmatmul.mubr.bf16.vlgmr.msra.gmra.mxu1 %v6224_v39 }
 0x476   :  { %7733 = vmatprep.mubr.msk.bf16.mxu0 %vm8121_vm2, %v10814_v4  ;;  %7726 = vmatpush3.bf16.msra.mxu0 %v8089_v26 }
 0x477   :  { %7727 = vmatprep.subr.bf16.mxu0 %v10814_v4 }
 0x47a   :  { %7728 = vmatpush3.bf16.msra.mxu0 %v8090_v44 }
 0x47b   :  { %7729 = vmatprep.subr.bf16.mxu0 %v10814_v4 }
 0x47e   :  { %7730 = vmatpush3.bf16.msra.mxu0 %v8091_v19 }
 0x47f   :  { %7731 = vmatprep.subr.bf16.mxu0 %v10814_v4 }
 0x482   :  { %7732 = vmatpush3.bf16.msra.mxu0 %v8092_v42 }
 0x505   :  { %v6429_v5 = vpop.f32.mrf.mxu1 }
 0x507   :  { %v7683_v14 = vpop.f32.mrf.mxu1 }
 0x509   :  { %v6432_v20 = vpop.f32.mrf.mxu1 }
 0x50b   :  { %v7684_v51 = vpop.f32.mrf.mxu1 }
 0x515   :  { %v6340_v31 = vpop.f32.mrf.mxu0 }
 0x516   :  { %v6430_v43 = vadd.f32 %v6429_v5, %v6340_v31 }
 0x517   :  { %v7663_v48 = vpop.f32.mrf.mxu0 }
 0x519   :  { %v6343_v3 = vpop.f32.mrf.mxu0 }
 0x51a   :  { %v6433_v4 = vadd.f32 %v6432_v20, %v6343_v3 }
 0x51b   :  { %v7664_v37 = vpop.f32.mrf.mxu0 }
 0x535   :  { %v6535_v18 = vpop.f32.mrf.mxu0  ;;  %v6643_v2 = vpop.f32.mrf.mxu1 }
 0x536   :  { %v6542_v52 = vadd.f32 %v6535_v18, %v6430_v43 }
 0x537   :  { %v7703_v49 = vpop.f32.mrf.mxu0  ;;  %v7723_v21 = vpop.f32.mrf.mxu1 }
 0x538   :  { %v6650_v16 = vadd.f32 %v6643_v2, %v6542_v52 }
 0x539   :  { %v6538_v15 = vpop.f32.mrf.mxu0  ;;  %v6646_v24 = vpop.f32.mrf.mxu1 }
 0x53a   :  { %v6543_v46 = vadd.f32 %v6538_v15, %v6433_v4  ;;  %v6659_v8 = vadd.f32 %v7502_v30, %v6650_v16 }
 0x53b   :  { %v7704_v23 = vpop.f32.mrf.mxu0  ;;  %v7724_v61 = vpop.f32.mrf.mxu1 }
 0x53c   :  { %v6651_v58 = vadd.f32 %v6646_v24, %v6543_v46  ;;  %v6661_v63 = vmax.f32 %v6659_v8, 0.0 }
 0x53e   :  { %v6660_v10 = vadd.f32 %v7502_v30, %v6651_v58 }
 0x540   :  { %v6662_v56 = vmax.f32 %v6660_v10, 0.0 }
 0x542   :  { %v6663_v11 = vpack.c.bf16 %v6662_v56, %v6661_v63 }
 0x544   :  { %7734 = vmatmul.mubr.msk.bf16.vlgmr.msra.gmra.mxu0 %vm6703_vm3, %v6663_v11 }
 0x604   :  { %v6741_v50 = vpop.f32.mrf.mxu0 }
 0x605   :  { %v6742_v59 = vadd.f32 %v7503_v6, %v6741_v50 }
 0x606   :  { %v7735_v9 = vpop.f32.mrf.mxu0 }
 0x607   :  { %6748 = vst [vmem:[%s10506_s9] sm:$0xff] %v6742_v59 }
 0x608   :  { %v6744_v55 = vpop.f32.mrf.mxu0 }
 0x609   :  { %v6745_v45 = vadd.f32 %v7503_v6, %v6744_v55 }
 0x60a   :  { %v7736_v36 = vpop.f32.mrf.mxu0 }
 0x60b   :  { %6749 = vst [vmem:[%s10506_s9 + $0x8] sm:$0xff] %v6745_v45 }
 0x60c   :  { %6754 = vsyncpa [#allocation6], 1 }

</bundles_post_ra>
